<compile_context>
chip_gen: v7x
topology: tpu7x:2x2x1
jax: 0.10.0
libtpu: 0.0.40
codegen_flags: <defaults>
</compile_context>

<pallas_src>
import functools

import jax
import jax.numpy as jnp
import numpy as np
from jax.experimental import pallas as pl
from jax.experimental.pallas import tpu as pltpu

EPS = 1e-5      # nn.BatchNorm2d default eps
LANE = 128      # TPU lane width

# Shared compiler params: 1-D grids are fully parallel (stats are per-tile
# partials, reduced on the host), so megacore (v7x) can shard the grid.
# vmem_limit set with headroom for v7x's 64 MiB VMEM.
_COMPILER_PARAMS = pltpu.CompilerParams(
    dimension_semantics=("parallel",),
    vmem_limit_bytes=48 * 1024 * 1024,
)


def _round_up(x, m):
    return ((x + m - 1) // m) * m


def _pad_to(a, shape):
    pads = [(0, s - d) for d, s in zip(a.shape, shape)]
    return jnp.pad(a, pads)


# ----------------------------- Pallas kernels ------------------------------

def matmul_stats_kernel(x_ref, w_ref, y_ref, sum_ref, sq_ref):
    """1x1 conv tile: y = x @ w (bf16 in, f32 acc) + per-channel partial stats."""
    y = jnp.dot(x_ref[...], w_ref[...], preferred_element_type=jnp.float32)
    y_ref[...] = y
    n = y.shape[1]
    sum_ref[...] = jnp.sum(y, axis=0, keepdims=True).reshape(1, 1, n)
    sq_ref[...] = jnp.sum(y * y, axis=0, keepdims=True).reshape(1, 1, n)


def conv3x3_stats_kernel(x_ref, w_ref, y_ref, sum_ref, sq_ref, *, H, W):
    """3x3 conv (padding=1, stride=1) for one image: 9 accumulated shifted matmuls.

    x_ref: (1, H+2, W+2, C) bf16 zero-padded image
    w_ref: (9, C, N)        bf16 taps (row-major dy*3+dx)
    y_ref: (1, H, W, N)     f32 conv output
    """
    C = x_ref.shape[3]
    N = w_ref.shape[2]
    acc = jnp.zeros((H * W, N), jnp.float32)
    for t in range(9):                      # static unroll over the 9 taps
        dy, dx = t // 3, t % 3
        win = x_ref[0, dy:dy + H, dx:dx + W, :]          # (H, W, C)
        acc = acc + jnp.dot(win.reshape(H * W, C), w_ref[t],
                            preferred_element_type=jnp.float32)
    y_ref[...] = acc.reshape(1, H, W, N)
    sum_ref[...] = jnp.sum(acc, axis=0, keepdims=True).reshape(1, 1, N)
    sq_ref[...] = jnp.sum(acc * acc, axis=0, keepdims=True).reshape(1, 1, N)


def bn_relu_kernel(y_ref, scale_ref, shift_ref, o_ref):
    """Apply precomputed per-channel BN scale/shift + ReLU (f32 math)."""
    z = y_ref[...] * scale_ref[...] + shift_ref[...]
    o_ref[...] = jnp.maximum(z, 0.0).astype(o_ref.dtype)


def bn_relu_matmul_stats_kernel(y_ref, scale_ref, shift_ref, w_ref,
                                o_ref, sum_ref, sq_ref, *, tm, rows_valid):
    """Fused: o_prev = relu(bn(y_prev)); y = o_prev @ w; partial stats of y."""
    z = jnp.maximum(y_ref[...] * scale_ref[...] + shift_ref[...], 0.0)
    if rows_valid is not None:
        # Zero rows past the real M (row padding) so they don't pollute stats.
        row = pl.program_id(0) * tm + jax.lax.broadcasted_iota(
            jnp.int32, z.shape, 0)
        z = jnp.where(row < rows_valid, z, 0.0)
    y = jnp.dot(z.astype(jnp.bfloat16), w_ref[...],
                preferred_element_type=jnp.float32)
    o_ref[...] = y
    n = y.shape[1]
    sum_ref[...] = jnp.sum(y, axis=0, keepdims=True).reshape(1, 1, n)
    sq_ref[...] = jnp.sum(y * y, axis=0, keepdims=True).reshape(1, 1, n)


def bn_add_relu_kernel(y_ref, scale_ref, shift_ref, res_ref, o_ref):
    """BN scale/shift + identity residual add + ReLU (all f32)."""
    z = y_ref[...] * scale_ref[...] + shift_ref[...] + res_ref[...]
    o_ref[...] = jnp.maximum(z, 0.0).astype(o_ref.dtype)


# ------------------------------- wrappers -----------------------------------

def _matmul_stats(x2d, w, tm):
    Mp, K = x2d.shape
    N = w.shape[1]
    G = Mp // tm
    y, s, sq = pl.pallas_call(
        matmul_stats_kernel,
        grid=(G,),
        in_specs=[
            pl.BlockSpec((tm, K), lambda i: (i, 0)),
            pl.BlockSpec((K, N), lambda i: (0, 0)),      # weight stays resident
        ],
        out_specs=(
            pl.BlockSpec((tm, N), lambda i: (i, 0)),
            pl.BlockSpec((1, 1, N), lambda i: (i, 0, 0)),
            pl.BlockSpec((1, 1, N), lambda i: (i, 0, 0)),
        ),
        out_shape=(
            jax.ShapeDtypeStruct((Mp, N), jnp.float32),
            jax.ShapeDtypeStruct((G, 1, N), jnp.float32),
            jax.ShapeDtypeStruct((G, 1, N), jnp.float32),
        ),
        compiler_params=_COMPILER_PARAMS,
    )(x2d, w)
    return y, s.sum(axis=0), sq.sum(axis=0)


def _conv3x3_stats(x_pad, w_taps):
    B, Hp2, Wp2, C = x_pad.shape
    H, W = Hp2 - 2, Wp2 - 2
    N = w_taps.shape[2]
    kern = functools.partial(conv3x3_stats_kernel, H=H, W=W)
    y, s, sq = pl.pallas_call(
        kern,
        grid=(B,),
        in_specs=[
            pl.BlockSpec((1, Hp2, Wp2, C), lambda b: (b, 0, 0, 0)),
            pl.BlockSpec((9, C, N), lambda b: (0, 0, 0)),
        ],
        out_specs=(
            pl.BlockSpec((1, H, W, N), lambda b: (b, 0, 0, 0)),
            pl.BlockSpec((1, 1, N), lambda b: (b, 0, 0)),
            pl.BlockSpec((1, 1, N), lambda b: (b, 0, 0)),
        ),
        out_shape=(
            jax.ShapeDtypeStruct((B, H, W, N), jnp.float32),
            jax.ShapeDtypeStruct((B, 1, N), jnp.float32),
            jax.ShapeDtypeStruct((B, 1, N), jnp.float32),
        ),
        compiler_params=_COMPILER_PARAMS,
    )(x_pad, w_taps)
    return y, s.sum(axis=0), sq.sum(axis=0)


def _bn_relu(y, scale, shift, tm, out_dtype):
    Mp, N = y.shape
    G = Mp // tm
    return pl.pallas_call(
        bn_relu_kernel,
        grid=(G,),
        in_specs=[
            pl.BlockSpec((tm, N), lambda i: (i, 0)),
            pl.BlockSpec((1, N), lambda i: (0, 0)),
            pl.BlockSpec((1, N), lambda i: (0, 0)),
        ],
        out_specs=pl.BlockSpec((tm, N), lambda i: (i, 0)),
        out_shape=jax.ShapeDtypeStruct((Mp, N), out_dtype),
        compiler_params=_COMPILER_PARAMS,
    )(y, scale, shift)


def _bn_relu_matmul_stats(y_prev, scale, shift, w, tm, m_valid):
    Mp, K = y_prev.shape
    N = w.shape[1]
    G = Mp // tm
    kern = functools.partial(
        bn_relu_matmul_stats_kernel, tm=tm,
        rows_valid=None if m_valid == Mp else m_valid)
    y, s, sq = pl.pallas_call(
        kern,
        grid=(G,),
        in_specs=[
            pl.BlockSpec((tm, K), lambda i: (i, 0)),
            pl.BlockSpec((1, K), lambda i: (0, 0)),
            pl.BlockSpec((1, K), lambda i: (0, 0)),
            pl.BlockSpec((K, N), lambda i: (0, 0)),
        ],
        out_specs=(
            pl.BlockSpec((tm, N), lambda i: (i, 0)),
            pl.BlockSpec((1, 1, N), lambda i: (i, 0, 0)),
            pl.BlockSpec((1, 1, N), lambda i: (i, 0, 0)),
        ),
        out_shape=(
            jax.ShapeDtypeStruct((Mp, N), jnp.float32),
            jax.ShapeDtypeStruct((G, 1, N), jnp.float32),
            jax.ShapeDtypeStruct((G, 1, N), jnp.float32),
        ),
        compiler_params=_COMPILER_PARAMS,
    )(y_prev, scale, shift, w)
    return y, s.sum(axis=0), sq.sum(axis=0)


def _bn_add_relu(y, scale, shift, res, tm):
    Mp, N = y.shape
    G = Mp // tm
    return pl.pallas_call(
        bn_add_relu_kernel,
        grid=(G,),
        in_specs=[
            pl.BlockSpec((tm, N), lambda i: (i, 0)),
            pl.BlockSpec((1, N), lambda i: (0, 0)),
            pl.BlockSpec((1, N), lambda i: (0, 0)),
            pl.BlockSpec((tm, N), lambda i: (i, 0)),
        ],
        out_specs=pl.BlockSpec((tm, N), lambda i: (i, 0)),
        out_shape=jax.ShapeDtypeStruct((Mp, N), jnp.float32),
        compiler_params=_COMPILER_PARAMS,
    )(y, scale, shift, res)


def _bn_scale_shift(s, sq, count, gamma, beta):
    """Per-channel BN scale/shift from single-pass sum / sum-of-squares (tiny)."""
    mean = s / count
    var = jnp.maximum(sq / count - mean * mean, 0.0)
    inv = jax.lax.rsqrt(var + EPS)
    scale = gamma * inv
    shift = beta - mean * scale
    return scale, shift


# ------------------------------ forward pass --------------------------------

def bottleneck_forward(x_nchw, params, stride=1, block_m=512):
    """Forward pass matching torch Bottleneck with downsample=None (train-mode BN)."""
    B, Cin, H, W = x_nchw.shape
    planes = params["w1"].shape[1]
    Cout = 4 * planes
    assert stride == 1 and Cin == Cout, "identity residual requires stride=1, Cin==4*planes"
    assert block_m % 8 == 0
    # TODO(synk): optional `downsample` submodule (conv+bn on the residual) not
    # implemented; this configuration (downsample=None) never uses it.

    M = B * H * W
    tm = min(block_m, _round_up(M, 8))
    Mp = _round_up(M, tm)
    Cin_p = _round_up(Cin, LANE)
    P_p = _round_up(planes, LANE)
    Cout_p = _round_up(Cout, LANE)

    # layout glue (XLA only): NCHW -> NHWC -> (M, C), zero-pad rows & lanes.
    x_nhwc = jnp.transpose(x_nchw, (0, 2, 3, 1)).astype(jnp.float32)
    x2d = _pad_to(x_nhwc.reshape(M, Cin), (Mp, Cin_p))        # f32 residual
    x2d_b = x2d.astype(jnp.bfloat16)                          # bf16 MXU input

    # weights / BN params, lane-dense and bf16 for the MXU (gamma/beta pad=0 so
    # padded channels stay exactly zero through BN+ReLU).
    w1 = _pad_to(params["w1"], (Cin_p, P_p)).astype(jnp.bfloat16)
    w2 = _pad_to(params["w2"], (3, 3, P_p, P_p)).astype(jnp.bfloat16).reshape(9, P_p, P_p)
    w3 = _pad_to(params["w3"], (P_p, Cout_p)).astype(jnp.bfloat16)
    g1 = _pad_to(params["g1"], (1, P_p)); b1 = _pad_to(params["b1"], (1, P_p))
    g2 = _pad_to(params["g2"], (1, P_p)); b2 = _pad_to(params["b2"], (1, P_p))
    g3 = _pad_to(params["g3"], (1, Cout_p)); b3 = _pad_to(params["b3"], (1, Cout_p))

    count = float(M)   # BN statistics over the real B*H*W positions

    # ---- stage 1: 1x1 conv + stats, then bn1 + ReLU -------------------------
    y1, s1, q1 = _matmul_stats(x2d_b, w1, tm)
    sc1, sh1 = _bn_scale_shift(s1, q1, count, g1, b1)
    o1 = _bn_relu(y1, sc1, sh1, tm, jnp.bfloat16)             # (Mp, P_p) bf16

    # ---- stage 2: 3x3 conv (padding=1) as 9 shifted matmuls + stats ---------
    o1_nhwc = o1[:M].reshape(B, H, W, P_p)
    o1_pad = jnp.pad(o1_nhwc, ((0, 0), (1, 1), (1, 1), (0, 0)))
    y2, s2, q2 = _conv3x3_stats(o1_pad, w2)                   # (B,H,W,P_p) f32
    sc2, sh2 = _bn_scale_shift(s2, q2, count, g2, b2)

    # ---- stage 3: fused [bn2 + ReLU] -> 1x1 conv + stats --------------------
    y2_flat = _pad_to(y2.reshape(M, P_p), (Mp, P_p))
    y3, s3, q3 = _bn_relu_matmul_stats(y2_flat, sc2, sh2, w3, tm, M)
    sc3, sh3 = _bn_scale_shift(s3, q3, count, g3, b3)

    # ---- bn3 + identity residual + ReLU -------------------------------------
    out2d = _bn_add_relu(y3, sc3, sh3, x2d, tm)               # (Mp, Cout_p) f32

    out = out2d[:M, :Cout].reshape(B, H, W, Cout)
    return jnp.transpose(out, (0, 3, 1, 2))                   # back to NCHW


# --------------------------- reference (plain JAX) ---------------------------

def ref_bottleneck(x_nchw, params, stride=1):
    x = jnp.transpose(x_nchw, (0, 2, 3, 1)).astype(jnp.float32)
    planes = params["w1"].shape[1]

    def conv(a, w_hwio, s, pad):
        return jax.lax.conv_general_dilated(
            a, w_hwio, (s, s), pad, dimension_numbers=("NHWC", "HWIO", "NHWC"))

    def bn(y, g, b):
        mu = jnp.mean(y, axis=(0, 1, 2), keepdims=True)
        var = jnp.mean(jnp.square(y - mu), axis=(0, 1, 2), keepdims=True)
        return (y - mu) * jax.lax.rsqrt(var + EPS) * g.reshape(-1) + b.reshape(-1)

    o = conv(x, params["w1"].reshape(1, 1, -1, planes), 1, [(0, 0), (0, 0)])
    o = jax.nn.relu(bn(o, params["g1"], params["b1"]))
    o = conv(o, params["w2"], stride, [(1, 1), (1, 1)])
    o = jax.nn.relu(bn(o, params["g2"], params["b2"]))
    o = conv(o, params["w3"].reshape(1, 1, planes, 4 * planes), 1, [(0, 0), (0, 0)])
    o = jax.nn.relu(bn(o, params["g3"], params["b3"]) + x)
    return jnp.transpose(o, (0, 3, 1, 2))


# ------------------------------ params / main --------------------------------

def init_params(key, inplanes, planes):
    ks = jax.random.split(key, 9)
    return dict(
        w1=0.1 * jax.random.normal(ks[0], (inplanes, planes), jnp.float32),
        w2=0.1 * jax.random.normal(ks[1], (3, 3, planes, planes), jnp.float32),
        w3=0.1 * jax.random.normal(ks[2], (planes, 4 * planes), jnp.float32),
        g1=1.0 + 0.1 * jax.random.normal(ks[3], (1, planes), jnp.float32),
        b1=0.1 * jax.random.normal(ks[4], (1, planes), jnp.float32),
        g2=1.0 + 0.1 * jax.random.normal(ks[5], (1, planes), jnp.float32),
        b2=0.1 * jax.random.normal(ks[6], (1, planes), jnp.float32),
        g3=1.0 + 0.1 * jax.random.normal(ks[7], (1, 4 * planes), jnp.float32),
        b3=0.1 * jax.random.normal(ks[8], (1, 4 * planes), jnp.float32),
    )


if __name__ == "__main__":
    key = jax.random.PRNGKey(0)
    kx, kp = jax.random.split(key)
    inplanes, planes = 64, 16          # expansion = 4 -> out channels = 64
    B, H, W = 2, 16, 16
    x = jax.random.normal(kx, (B, inplanes, H, W), jnp.float32)
    params = init_params(kp, inplanes, planes)

    # block_m=128 so the toy shape (M = 2*16*16 = 512 rows) runs a 4-step grid.
    fwd = jax.jit(functools.partial(bottleneck_forward, stride=1, block_m=128))
    out = jax.block_until_ready(fwd(x, params))
    ref = jax.block_until_ready(ref_bottleneck(x, params, stride=1))

    assert out.shape == (B, 4 * planes, H, W)
    # Tolerance loosened slightly vs the pure-f32 reference because the MXU
    # matmuls run with bf16 inputs (BN / residual math stays in f32).
    np.testing.assert_allclose(np.asarray(out), np.asarray(ref),
                               atol=1e-1, rtol=1e-1)
    print("KERNEL_OK")
</pallas_src>

<mosaic_0001>
module attributes {stable_mosaic.version = 11 : i64} {
  func.func @matmul_stats_kernel(%arg0: i32, %arg1: memref<128x128xbf16, #tpu.memory_space<vmem>>, %arg2: memref<128x128xbf16, #tpu.memory_space<vmem>>, %arg3: memref<128x128xf32, #tpu.memory_space<vmem>>, %arg4: memref<1x1x128xf32, #tpu.memory_space<vmem>>, %arg5: memref<1x1x128xf32, #tpu.memory_space<vmem>>) attributes {dimension_semantics = [#tpu.dimension_semantics<parallel>], iteration_bounds = array<i64: 4>, scalar_prefetch = 0 : i64, scratch_operands = 0 : i64, tpu.core_type = #tpu.core_type<tc>, window_params = [{transform_indices = @transform_0, window_bounds = array<i64: 128, 128>}, {pipeline_mode = #tpu.pipeline_mode<synchronous>, transform_indices = @transform_1, window_bounds = array<i64: 128, 128>}, {transform_indices = @transform_2, window_bounds = array<i64: 128, 128>}, {transform_indices = @transform_3, window_bounds = array<i64: 1, 1, 128>}, {transform_indices = @transform_4, window_bounds = array<i64: 1, 1, 128>}]} {
    %c0 = arith.constant 0 : index
    %c0_0 = arith.constant 0 : index
    %0 = vector.load %arg1[%c0, %c0_0] : memref<128x128xbf16, #tpu.memory_space<vmem>>, vector<128x128xbf16>
    %c0_1 = arith.constant 0 : index
    %c0_2 = arith.constant 0 : index
    %1 = vector.load %arg2[%c0_1, %c0_2] : memref<128x128xbf16, #tpu.memory_space<vmem>>, vector<128x128xbf16>
    %cst = arith.constant dense<0.000000e+00> : vector<128x128xf32>
    %2 = tpu.matmul %0, %1, %cst {dimension_numbers = #tpu.dot_dimension_numbers<[1], [0], [0], [1], [0, 0, 1, 1], [], []>} : vector<128x128xbf16>, vector<128x128xbf16>, vector<128x128xf32> -> vector<128x128xf32>
    %c0_3 = arith.constant 0 : index
    %c0_4 = arith.constant 0 : index
    %3 = vector.load %arg3[%c0_3, %c0_4] : memref<128x128xf32, #tpu.memory_space<vmem>>, vector<128x128xf32>
    tpu.vector_store %arg3[%c0_3, %c0_4], %2 {strides = array<i32>} : memref<128x128xf32, #tpu.memory_space<vmem>>, vector<128x128xf32>,
    %cst_5 = arith.constant dense<0.000000e+00> : vector<128xf32>
    %4 = vector.multi_reduction <add>, %2, %cst_5 [0] : vector<128x128xf32> to vector<128xf32>
    %5 = vector.shape_cast %4 : vector<128xf32> to vector<1x128xf32>
    %6 = vector.shape_cast %5 : vector<1x128xf32> to vector<1x1x128xf32>
    %c0_6 = arith.constant 0 : index
    %c0_7 = arith.constant 0 : index
    %c0_8 = arith.constant 0 : index
    %7 = vector.load %arg4[%c0_6, %c0_7, %c0_8] : memref<1x1x128xf32, #tpu.memory_space<vmem>>, vector<1x1x128xf32>
    tpu.vector_store %arg4[%c0_6, %c0_7, %c0_8], %6 {strides = array<i32>} : memref<1x1x128xf32, #tpu.memory_space<vmem>>, vector<1x1x128xf32>,
    %8 = arith.mulf %2, %2 : vector<128x128xf32>
    %cst_9 = arith.constant dense<0.000000e+00> : vector<128xf32>
    %9 = vector.multi_reduction <add>, %8, %cst_9 [0] : vector<128x128xf32> to vector<128xf32>
    %10 = vector.shape_cast %9 : vector<128xf32> to vector<1x128xf32>
    %11 = vector.shape_cast %10 : vector<1x128xf32> to vector<1x1x128xf32>
    %c0_10 = arith.constant 0 : index
    %c0_11 = arith.constant 0 : index
    %c0_12 = arith.constant 0 : index
    %12 = vector.load %arg5[%c0_10, %c0_11, %c0_12] : memref<1x1x128xf32, #tpu.memory_space<vmem>>, vector<1x1x128xf32>
    tpu.vector_store %arg5[%c0_10, %c0_11, %c0_12], %11 {strides = array<i32>} : memref<1x1x128xf32, #tpu.memory_space<vmem>>, vector<1x1x128xf32>,
    return
  }
  func.func @transform_0(%arg0: i32) -> (i32, i32) {
    %c0_i32 = arith.constant 0 : i32
    %c0_i32_0 = arith.constant 0 : i32
    return %arg0, %c0_i32 : i32, i32
  }
  func.func @transform_1(%arg0: i32) -> (i32, i32) {
    %c0_i32 = arith.constant 0 : i32
    %c0_i32_0 = arith.constant 0 : i32
    %c0_i32_1 = arith.constant 0 : i32
    return %c0_i32, %c0_i32_0 : i32, i32
  }
  func.func @transform_2(%arg0: i32) -> (i32, i32) {
    %c0_i32 = arith.constant 0 : i32
    %c0_i32_0 = arith.constant 0 : i32
    return %arg0, %c0_i32 : i32, i32
  }
  func.func @transform_3(%arg0: i32) -> (i32, i32, i32) {
    %c0_i32 = arith.constant 0 : i32
    %c0_i32_0 = arith.constant 0 : i32
    %c0_i32_1 = arith.constant 0 : i32
    return %arg0, %c0_i32, %c0_i32_0 : i32, i32, i32
  }
  func.func @transform_4(%arg0: i32) -> (i32, i32, i32) {
    %c0_i32 = arith.constant 0 : i32
    %c0_i32_0 = arith.constant 0 : i32
    %c0_i32_1 = arith.constant 0 : i32
    return %arg0, %c0_i32, %c0_i32_0 : i32, i32, i32
  }
}

module attributes {stable_mosaic.version = 11 : i64} {
  func.func @bn_relu_kernel(%arg0: i32, %arg1: memref<128x128xf32, #tpu.memory_space<vmem>>, %arg2: memref<1x128xf32, #tpu.memory_space<vmem>>, %arg3: memref<1x128xf32, #tpu.memory_space<vmem>>, %arg4: memref<128x128xbf16, #tpu.memory_space<vmem>>) attributes {dimension_semantics = [#tpu.dimension_semantics<parallel>], iteration_bounds = array<i64: 4>, scalar_prefetch = 0 : i64, scratch_operands = 0 : i64, tpu.core_type = #tpu.core_type<tc>, window_params = [{transform_indices = @transform_0, window_bounds = array<i64: 128, 128>}, {pipeline_mode = #tpu.pipeline_mode<synchronous>, transform_indices = @transform_1, window_bounds = array<i64: 1, 128>}, {pipeline_mode = #tpu.pipeline_mode<synchronous>, transform_indices = @transform_2, window_bounds = array<i64: 1, 128>}, {transform_indices = @transform_3, window_bounds = array<i64: 128, 128>}]} {
    %c0 = arith.constant 0 : index
    %c0_0 = arith.constant 0 : index
    %0 = vector.load %arg1[%c0, %c0_0] : memref<128x128xf32, #tpu.memory_space<vmem>>, vector<128x128xf32>
    %c0_1 = arith.constant 0 : index
    %c0_2 = arith.constant 0 : index
    %1 = vector.load %arg2[%c0_1, %c0_2] : memref<1x128xf32, #tpu.memory_space<vmem>>, vector<1x128xf32>
    %2 = vector.broadcast %1 : vector<1x128xf32> to vector<128x128xf32>
    %3 = arith.mulf %0, %2 : vector<128x128xf32>
    %c0_3 = arith.constant 0 : index
    %c0_4 = arith.constant 0 : index
    %4 = vector.load %arg3[%c0_3, %c0_4] : memref<1x128xf32, #tpu.memory_space<vmem>>, vector<1x128xf32>
    %5 = vector.broadcast %4 : vector<1x128xf32> to vector<128x128xf32>
    %6 = arith.addf %3, %5 : vector<128x128xf32>
    %cst = arith.constant 0.000000e+00 : f32
    %7 = vector.broadcast %cst : f32 to vector<128x128xf32>
    %8 = arith.maximumf %6, %7 : vector<128x128xf32>
    %9 = arith.truncf %8 : vector<128x128xf32> to vector<128x128xbf16>
    %c0_5 = arith.constant 0 : index
    %c0_6 = arith.constant 0 : index
    %10 = vector.load %arg4[%c0_5, %c0_6] : memref<128x128xbf16, #tpu.memory_space<vmem>>, vector<128x128xbf16>
    tpu.vector_store %arg4[%c0_5, %c0_6], %9 {strides = array<i32>} : memref<128x128xbf16, #tpu.memory_space<vmem>>, vector<128x128xbf16>,
    return
  }
  func.func @transform_0(%arg0: i32) -> (i32, i32) {
    %c0_i32 = arith.constant 0 : i32
    %c0_i32_0 = arith.constant 0 : i32
    return %arg0, %c0_i32 : i32, i32
  }
  func.func @transform_1(%arg0: i32) -> (i32, i32) {
    %c0_i32 = arith.constant 0 : i32
    %c0_i32_0 = arith.constant 0 : i32
    %c0_i32_1 = arith.constant 0 : i32
    return %c0_i32, %c0_i32_0 : i32, i32
  }
  func.func @transform_2(%arg0: i32) -> (i32, i32) {
    %c0_i32 = arith.constant 0 : i32
    %c0_i32_0 = arith.constant 0 : i32
    %c0_i32_1 = arith.constant 0 : i32
    return %c0_i32, %c0_i32_0 : i32, i32
  }
  func.func @transform_3(%arg0: i32) -> (i32, i32) {
    %c0_i32 = arith.constant 0 : i32
    %c0_i32_0 = arith.constant 0 : i32
    return %arg0, %c0_i32 : i32, i32
  }
}

module attributes {stable_mosaic.version = 11 : i64} {
  func.func @conv3x3_stats_kernel(%arg0: i32, %arg1: memref<1x18x18x128xbf16, #tpu.memory_space<vmem>>, %arg2: memref<9x128x128xbf16, #tpu.memory_space<vmem>>, %arg3: memref<1x16x16x128xf32, #tpu.memory_space<vmem>>, %arg4: memref<1x1x128xf32, #tpu.memory_space<vmem>>, %arg5: memref<1x1x128xf32, #tpu.memory_space<vmem>>) attributes {dimension_semantics = [#tpu.dimension_semantics<parallel>], iteration_bounds = array<i64: 2>, scalar_prefetch = 0 : i64, scratch_operands = 0 : i64, tpu.core_type = #tpu.core_type<tc>, window_params = [{transform_indices = @transform_0, window_bounds = array<i64: 1, 18, 18, 128>}, {pipeline_mode = #tpu.pipeline_mode<synchronous>, transform_indices = @transform_1, window_bounds = array<i64: 9, 128, 128>}, {transform_indices = @transform_2, window_bounds = array<i64: 1, 16, 16, 128>}, {transform_indices = @transform_3, window_bounds = array<i64: 1, 1, 128>}, {transform_indices = @transform_4, window_bounds = array<i64: 1, 1, 128>}]} {
    %cst = arith.constant 0.000000e+00 : f32
    %0 = vector.broadcast %cst : f32 to vector<256x128xf32>
    %c0 = arith.constant 0 : index
    %c0_0 = arith.constant 0 : index
    %c0_1 = arith.constant 0 : index
    %c0_2 = arith.constant 0 : index
    %1 = vector.load %arg1[%c0, %c0_0, %c0_1, %c0_2] : memref<1x18x18x128xbf16, #tpu.memory_space<vmem>>, vector<1x16x16x128xbf16>
    %2 = vector.shape_cast %1 : vector<1x16x16x128xbf16> to vector<16x16x128xbf16>
    %3 = vector.shape_cast %2 : vector<16x16x128xbf16> to vector<256x128xbf16>
    %c0_3 = arith.constant 0 : index
    %c0_4 = arith.constant 0 : index
    %c0_5 = arith.constant 0 : index
    %4 = vector.load %arg2[%c0_3, %c0_4, %c0_5] : memref<9x128x128xbf16, #tpu.memory_space<vmem>>, vector<1x128x128xbf16>
    %5 = vector.shape_cast %4 : vector<1x128x128xbf16> to vector<128x128xbf16>
    %cst_6 = arith.constant dense<0.000000e+00> : vector<256x128xf32>
    %6 = tpu.matmul %3, %5, %cst_6 {dimension_numbers = #tpu.dot_dimension_numbers<[1], [0], [0], [1], [0, 0, 1, 1], [], []>} : vector<256x128xbf16>, vector<128x128xbf16>, vector<256x128xf32> -> vector<256x128xf32>
    %7 = arith.addf %0, %6 : vector<256x128xf32>
    %c0_7 = arith.constant 0 : index
    %c0_8 = arith.constant 0 : index
    %c1 = arith.constant 1 : index
    %c0_9 = arith.constant 0 : index
    %8 = vector.load %arg1[%c0_7, %c0_8, %c1, %c0_9] : memref<1x18x18x128xbf16, #tpu.memory_space<vmem>>, vector<1x16x16x128xbf16>
    %9 = vector.shape_cast %8 : vector<1x16x16x128xbf16> to vector<16x16x128xbf16>
    %10 = vector.shape_cast %9 : vector<16x16x128xbf16> to vector<256x128xbf16>
    %c1_10 = arith.constant 1 : index
    %c0_11 = arith.constant 0 : index
    %c0_12 = arith.constant 0 : index
    %11 = vector.load %arg2[%c1_10, %c0_11, %c0_12] : memref<9x128x128xbf16, #tpu.memory_space<vmem>>, vector<1x128x128xbf16>
    %12 = vector.shape_cast %11 : vector<1x128x128xbf16> to vector<128x128xbf16>
    %cst_13 = arith.constant dense<0.000000e+00> : vector<256x128xf32>
    %13 = tpu.matmul %10, %12, %cst_13 {dimension_numbers = #tpu.dot_dimension_numbers<[1], [0], [0], [1], [0, 0, 1, 1], [], []>} : vector<256x128xbf16>, vector<128x128xbf16>, vector<256x128xf32> -> vector<256x128xf32>
    %14 = arith.addf %7, %13 : vector<256x128xf32>
    %c0_14 = arith.constant 0 : index
    %c0_15 = arith.constant 0 : index
    %c2 = arith.constant 2 : index
    %c0_16 = arith.constant 0 : index
    %15 = vector.load %arg1[%c0_14, %c0_15, %c2, %c0_16] : memref<1x18x18x128xbf16, #tpu.memory_space<vmem>>, vector<1x16x16x128xbf16>
    %16 = vector.shape_cast %15 : vector<1x16x16x128xbf16> to vector<16x16x128xbf16>
    %17 = vector.shape_cast %16 : vector<16x16x128xbf16> to vector<256x128xbf16>
    %c2_17 = arith.constant 2 : index
    %c0_18 = arith.constant 0 : index
    %c0_19 = arith.constant 0 : index
    %18 = vector.load %arg2[%c2_17, %c0_18, %c0_19] : memref<9x128x128xbf16, #tpu.memory_space<vmem>>, vector<1x128x128xbf16>
    %19 = vector.shape_cast %18 : vector<1x128x128xbf16> to vector<128x128xbf16>
    %cst_20 = arith.constant dense<0.000000e+00> : vector<256x128xf32>
    %20 = tpu.matmul %17, %19, %cst_20 {dimension_numbers = #tpu.dot_dimension_numbers<[1], [0], [0], [1], [0, 0, 1, 1], [], []>} : vector<256x128xbf16>, vector<128x128xbf16>, vector<256x128xf32> -> vector<256x128xf32>
    %21 = arith.addf %14, %20 : vector<256x128xf32>
    %c0_21 = arith.constant 0 : index
    %c1_22 = arith.constant 1 : index
    %c0_23 = arith.constant 0 : index
    %c0_24 = arith.constant 0 : index
    %22 = vector.load %arg1[%c0_21, %c1_22, %c0_23, %c0_24] : memref<1x18x18x128xbf16, #tpu.memory_space<vmem>>, vector<1x16x16x128xbf16>
    %23 = vector.shape_cast %22 : vector<1x16x16x128xbf16> to vector<16x16x128xbf16>
    %24 = vector.shape_cast %23 : vector<16x16x128xbf16> to vector<256x128xbf16>
    %c3 = arith.constant 3 : index
    %c0_25 = arith.constant 0 : index
    %c0_26 = arith.constant 0 : index
    %25 = vector.load %arg2[%c3, %c0_25, %c0_26] : memref<9x128x128xbf16, #tpu.memory_space<vmem>>, vector<1x128x128xbf16>
    %26 = vector.shape_cast %25 : vector<1x128x128xbf16> to vector<128x128xbf16>
    %cst_27 = arith.constant dense<0.000000e+00> : vector<256x128xf32>
    %27 = tpu.matmul %24, %26, %cst_27 {dimension_numbers = #tpu.dot_dimension_numbers<[1], [0], [0], [1], [0, 0, 1, 1], [], []>} : vector<256x128xbf16>, vector<128x128xbf16>, vector<256x128xf32> -> vector<256x128xf32>
    %28 = arith.addf %21, %27 : vector<256x128xf32>
    %c0_28 = arith.constant 0 : index
    %c1_29 = arith.constant 1 : index
    %c1_30 = arith.constant 1 : index
    %c0_31 = arith.constant 0 : index
    %29 = vector.load %arg1[%c0_28, %c1_29, %c1_30, %c0_31] : memref<1x18x18x128xbf16, #tpu.memory_space<vmem>>, vector<1x16x16x128xbf16>
    %30 = vector.shape_cast %29 : vector<1x16x16x128xbf16> to vector<16x16x128xbf16>
    %31 = vector.shape_cast %30 : vector<16x16x128xbf16> to vector<256x128xbf16>
    %c4 = arith.constant 4 : index
    %c0_32 = arith.constant 0 : index
    %c0_33 = arith.constant 0 : index
    %32 = vector.load %arg2[%c4, %c0_32, %c0_33] : memref<9x128x128xbf16, #tpu.memory_space<vmem>>, vector<1x128x128xbf16>
    %33 = vector.shape_cast %32 : vector<1x128x128xbf16> to vector<128x128xbf16>
    %cst_34 = arith.constant dense<0.000000e+00> : vector<256x128xf32>
    %34 = tpu.matmul %31, %33, %cst_34 {dimension_numbers = #tpu.dot_dimension_numbers<[1], [0], [0], [1], [0, 0, 1, 1], [], []>} : vector<256x128xbf16>, vector<128x128xbf16>, vector<256x128xf32> -> vector<256x128xf32>
    %35 = arith.addf %28, %34 : vector<256x128xf32>
    %c0_35 = arith.constant 0 : index
    %c1_36 = arith.constant 1 : index
    %c2_37 = arith.constant 2 : index
    %c0_38 = arith.constant 0 : index
    %36 = vector.load %arg1[%c0_35, %c1_36, %c2_37, %c0_38] : memref<1x18x18x128xbf16, #tpu.memory_space<vmem>>, vector<1x16x16x128xbf16>
    %37 = vector.shape_cast %36 : vector<1x16x16x128xbf16> to vector<16x16x128xbf16>
    %38 = vector.shape_cast %37 : vector<16x16x128xbf16> to vector<256x128xbf16>
    %c5 = arith.constant 5 : index
    %c0_39 = arith.constant 0 : index
    %c0_40 = arith.constant 0 : index
    %39 = vector.load %arg2[%c5, %c0_39, %c0_40] : memref<9x128x128xbf16, #tpu.memory_space<vmem>>, vector<1x128x128xbf16>
    %40 = vector.shape_cast %39 : vector<1x128x128xbf16> to vector<128x128xbf16>
    %cst_41 = arith.constant dense<0.000000e+00> : vector<256x128xf32>
    %41 = tpu.matmul %38, %40, %cst_41 {dimension_numbers = #tpu.dot_dimension_numbers<[1], [0], [0], [1], [0, 0, 1, 1], [], []>} : vector<256x128xbf16>, vector<128x128xbf16>, vector<256x128xf32> -> vector<256x128xf32>
    %42 = arith.addf %35, %41 : vector<256x128xf32>
    %c0_42 = arith.constant 0 : index
    %c2_43 = arith.constant 2 : index
    %c0_44 = arith.constant 0 : index
    %c0_45 = arith.constant 0 : index
    %43 = vector.load %arg1[%c0_42, %c2_43, %c0_44, %c0_45] : memref<1x18x18x128xbf16, #tpu.memory_space<vmem>>, vector<1x16x16x128xbf16>
    %44 = vector.shape_cast %43 : vector<1x16x16x128xbf16> to vector<16x16x128xbf16>
    %45 = vector.shape_cast %44 : vector<16x16x128xbf16> to vector<256x128xbf16>
    %c6 = arith.constant 6 : index
    %c0_46 = arith.constant 0 : index
    %c0_47 = arith.constant 0 : index
    %46 = vector.load %arg2[%c6, %c0_46, %c0_47] : memref<9x128x128xbf16, #tpu.memory_space<vmem>>, vector<1x128x128xbf16>
    %47 = vector.shape_cast %46 : vector<1x128x128xbf16> to vector<128x128xbf16>
    %cst_48 = arith.constant dense<0.000000e+00> : vector<256x128xf32>
    %48 = tpu.matmul %45, %47, %cst_48 {dimension_numbers = #tpu.dot_dimension_numbers<[1], [0], [0], [1], [0, 0, 1, 1], [], []>} : vector<256x128xbf16>, vector<128x128xbf16>, vector<256x128xf32> -> vector<256x128xf32>
    %49 = arith.addf %42, %48 : vector<256x128xf32>
    %c0_49 = arith.constant 0 : index
    %c2_50 = arith.constant 2 : index
    %c1_51 = arith.constant 1 : index
    %c0_52 = arith.constant 0 : index
    %50 = vector.load %arg1[%c0_49, %c2_50, %c1_51, %c0_52] : memref<1x18x18x128xbf16, #tpu.memory_space<vmem>>, vector<1x16x16x128xbf16>
    %51 = vector.shape_cast %50 : vector<1x16x16x128xbf16> to vector<16x16x128xbf16>
    %52 = vector.shape_cast %51 : vector<16x16x128xbf16> to vector<256x128xbf16>
    %c7 = arith.constant 7 : index
    %c0_53 = arith.constant 0 : index
    %c0_54 = arith.constant 0 : index
    %53 = vector.load %arg2[%c7, %c0_53, %c0_54] : memref<9x128x128xbf16, #tpu.memory_space<vmem>>, vector<1x128x128xbf16>
    %54 = vector.shape_cast %53 : vector<1x128x128xbf16> to vector<128x128xbf16>
    %cst_55 = arith.constant dense<0.000000e+00> : vector<256x128xf32>
    %55 = tpu.matmul %52, %54, %cst_55 {dimension_numbers = #tpu.dot_dimension_numbers<[1], [0], [0], [1], [0, 0, 1, 1], [], []>} : vector<256x128xbf16>, vector<128x128xbf16>, vector<256x128xf32> -> vector<256x128xf32>
    %56 = arith.addf %49, %55 : vector<256x128xf32>
    %c0_56 = arith.constant 0 : index
    %c2_57 = arith.constant 2 : index
    %c2_58 = arith.constant 2 : index
    %c0_59 = arith.constant 0 : index
    %57 = vector.load %arg1[%c0_56, %c2_57, %c2_58, %c0_59] : memref<1x18x18x128xbf16, #tpu.memory_space<vmem>>, vector<1x16x16x128xbf16>
    %58 = vector.shape_cast %57 : vector<1x16x16x128xbf16> to vector<16x16x128xbf16>
    %59 = vector.shape_cast %58 : vector<16x16x128xbf16> to vector<256x128xbf16>
    %c8 = arith.constant 8 : index
    %c0_60 = arith.constant 0 : index
    %c0_61 = arith.constant 0 : index
    %60 = vector.load %arg2[%c8, %c0_60, %c0_61] : memref<9x128x128xbf16, #tpu.memory_space<vmem>>, vector<1x128x128xbf16>
    %61 = vector.shape_cast %60 : vector<1x128x128xbf16> to vector<128x128xbf16>
    %cst_62 = arith.constant dense<0.000000e+00> : vector<256x128xf32>
    %62 = tpu.matmul %59, %61, %cst_62 {dimension_numbers = #tpu.dot_dimension_numbers<[1], [0], [0], [1], [0, 0, 1, 1], [], []>} : vector<256x128xbf16>, vector<128x128xbf16>, vector<256x128xf32> -> vector<256x128xf32>
    %63 = arith.addf %56, %62 : vector<256x128xf32>
    %64 = vector.shape_cast %63 : vector<256x128xf32> to vector<1x16x16x128xf32>
    %c0_63 = arith.constant 0 : index
    %c0_64 = arith.constant 0 : index
    %c0_65 = arith.constant 0 : index
    %c0_66 = arith.constant 0 : index
    %65 = vector.load %arg3[%c0_63, %c0_64, %c0_65, %c0_66] : memref<1x16x16x128xf32, #tpu.memory_space<vmem>>, vector<1x16x16x128xf32>
    tpu.vector_store %arg3[%c0_63, %c0_64, %c0_65, %c0_66], %64 {strides = array<i32>} : memref<1x16x16x128xf32, #tpu.memory_space<vmem>>, vector<1x16x16x128xf32>,
    %cst_67 = arith.constant dense<0.000000e+00> : vector<128xf32>
    %66 = vector.multi_reduction <add>, %63, %cst_67 [0] : vector<256x128xf32> to vector<128xf32>
    %67 = vector.shape_cast %66 : vector<128xf32> to vector<1x128xf32>
    %68 = vector.shape_cast %67 : vector<1x128xf32> to vector<1x1x128xf32>
    %c0_68 = arith.constant 0 : index
    %c0_69 = arith.constant 0 : index
    %c0_70 = arith.constant 0 : index
    %69 = vector.load %arg4[%c0_68, %c0_69, %c0_70] : memref<1x1x128xf32, #tpu.memory_space<vmem>>, vector<1x1x128xf32>
    tpu.vector_store %arg4[%c0_68, %c0_69, %c0_70], %68 {strides = array<i32>} : memref<1x1x128xf32, #tpu.memory_space<vmem>>, vector<1x1x128xf32>,
    %70 = arith.mulf %63, %63 : vector<256x128xf32>
    %cst_71 = arith.constant dense<0.000000e+00> : vector<128xf32>
    %71 = vector.multi_reduction <add>, %70, %cst_71 [0] : vector<256x128xf32> to vector<128xf32>
    %72 = vector.shape_cast %71 : vector<128xf32> to vector<1x128xf32>
    %73 = vector.shape_cast %72 : vector<1x128xf32> to vector<1x1x128xf32>
    %c0_72 = arith.constant 0 : index
    %c0_73 = arith.constant 0 : index
    %c0_74 = arith.constant 0 : index
    %74 = vector.load %arg5[%c0_72, %c0_73, %c0_74] : memref<1x1x128xf32, #tpu.memory_space<vmem>>, vector<1x1x128xf32>
    tpu.vector_store %arg5[%c0_72, %c0_73, %c0_74], %73 {strides = array<i32>} : memref<1x1x128xf32, #tpu.memory_space<vmem>>, vector<1x1x128xf32>,
    return
  }
  func.func @transform_0(%arg0: i32) -> (i32, i32, i32, i32) {
    %c0_i32 = arith.constant 0 : i32
    %c0_i32_0 = arith.constant 0 : i32
    %c0_i32_1 = arith.constant 0 : i32
    %c0_i32_2 = arith.constant 0 : i32
    return %arg0, %c0_i32, %c0_i32_0, %c0_i32_1 : i32, i32, i32, i32
  }
  func.func @transform_1(%arg0: i32) -> (i32, i32, i32) {
    %c0_i32 = arith.constant 0 : i32
    %c0_i32_0 = arith.constant 0 : i32
    %c0_i32_1 = arith.constant 0 : i32
    %c0_i32_2 = arith.constant 0 : i32
    return %c0_i32, %c0_i32_0, %c0_i32_1 : i32, i32, i32
  }
  func.func @transform_2(%arg0: i32) -> (i32, i32, i32, i32) {
    %c0_i32 = arith.constant 0 : i32
    %c0_i32_0 = arith.constant 0 : i32
    %c0_i32_1 = arith.constant 0 : i32
    %c0_i32_2 = arith.constant 0 : i32
    return %arg0, %c0_i32, %c0_i32_0, %c0_i32_1 : i32, i32, i32, i32
  }
  func.func @transform_3(%arg0: i32) -> (i32, i32, i32) {
    %c0_i32 = arith.constant 0 : i32
    %c0_i32_0 = arith.constant 0 : i32
    %c0_i32_1 = arith.constant 0 : i32
    return %arg0, %c0_i32, %c0_i32_0 : i32, i32, i32
  }
  func.func @transform_4(%arg0: i32) -> (i32, i32, i32) {
    %c0_i32 = arith.constant 0 : i32
    %c0_i32_0 = arith.constant 0 : i32
    %c0_i32_1 = arith.constant 0 : i32
    return %arg0, %c0_i32, %c0_i32_0 : i32, i32, i32
  }
}

module attributes {stable_mosaic.version = 11 : i64} {
  func.func @bn_relu_matmul_stats_kernel(%arg0: i32, %arg1: memref<128x128xf32, #tpu.memory_space<vmem>>, %arg2: memref<1x128xf32, #tpu.memory_space<vmem>>, %arg3: memref<1x128xf32, #tpu.memory_space<vmem>>, %arg4: memref<128x128xbf16, #tpu.memory_space<vmem>>, %arg5: memref<128x128xf32, #tpu.memory_space<vmem>>, %arg6: memref<1x1x128xf32, #tpu.memory_space<vmem>>, %arg7: memref<1x1x128xf32, #tpu.memory_space<vmem>>) attributes {dimension_semantics = [#tpu.dimension_semantics<parallel>], iteration_bounds = array<i64: 4>, scalar_prefetch = 0 : i64, scratch_operands = 0 : i64, tpu.core_type = #tpu.core_type<tc>, window_params = [{transform_indices = @transform_0, window_bounds = array<i64: 128, 128>}, {pipeline_mode = #tpu.pipeline_mode<synchronous>, transform_indices = @transform_1, window_bounds = array<i64: 1, 128>}, {pipeline_mode = #tpu.pipeline_mode<synchronous>, transform_indices = @transform_2, window_bounds = array<i64: 1, 128>}, {pipeline_mode = #tpu.pipeline_mode<synchronous>, transform_indices = @transform_3, window_bounds = array<i64: 128, 128>}, {transform_indices = @transform_4, window_bounds = array<i64: 128, 128>}, {transform_indices = @transform_5, window_bounds = array<i64: 1, 1, 128>}, {transform_indices = @transform_6, window_bounds = array<i64: 1, 1, 128>}]} {
    %c0 = arith.constant 0 : index
    %c0_0 = arith.constant 0 : index
    %0 = vector.load %arg1[%c0, %c0_0] : memref<128x128xf32, #tpu.memory_space<vmem>>, vector<128x128xf32>
    %c0_1 = arith.constant 0 : index
    %c0_2 = arith.constant 0 : index
    %1 = vector.load %arg2[%c0_1, %c0_2] : memref<1x128xf32, #tpu.memory_space<vmem>>, vector<1x128xf32>
    %2 = vector.broadcast %1 : vector<1x128xf32> to vector<128x128xf32>
    %3 = arith.mulf %0, %2 : vector<128x128xf32>
    %c0_3 = arith.constant 0 : index
    %c0_4 = arith.constant 0 : index
    %4 = vector.load %arg3[%c0_3, %c0_4] : memref<1x128xf32, #tpu.memory_space<vmem>>, vector<1x128xf32>
    %5 = vector.broadcast %4 : vector<1x128xf32> to vector<128x128xf32>
    %6 = arith.addf %3, %5 : vector<128x128xf32>
    %cst = arith.constant 0.000000e+00 : f32
    %7 = vector.broadcast %cst : f32 to vector<128x128xf32>
    %8 = arith.maximumf %6, %7 : vector<128x128xf32>
    %9 = arith.truncf %8 : vector<128x128xf32> to vector<128x128xbf16>
    %c0_5 = arith.constant 0 : index
    %c0_6 = arith.constant 0 : index
    %10 = vector.load %arg4[%c0_5, %c0_6] : memref<128x128xbf16, #tpu.memory_space<vmem>>, vector<128x128xbf16>
    %cst_7 = arith.constant dense<0.000000e+00> : vector<128x128xf32>
    %11 = tpu.matmul %9, %10, %cst_7 {dimension_numbers = #tpu.dot_dimension_numbers<[1], [0], [0], [1], [0, 0, 1, 1], [], []>} : vector<128x128xbf16>, vector<128x128xbf16>, vector<128x128xf32> -> vector<128x128xf32>
    %c0_8 = arith.constant 0 : index
    %c0_9 = arith.constant 0 : index
    %12 = vector.load %arg5[%c0_8, %c0_9] : memref<128x128xf32, #tpu.memory_space<vmem>>, vector<128x128xf32>
    tpu.vector_store %arg5[%c0_8, %c0_9], %11 {strides = array<i32>} : memref<128x128xf32, #tpu.memory_space<vmem>>, vector<128x128xf32>,
    %cst_10 = arith.constant dense<0.000000e+00> : vector<128xf32>
    %13 = vector.multi_reduction <add>, %11, %cst_10 [0] : vector<128x128xf32> to vector<128xf32>
    %14 = vector.shape_cast %13 : vector<128xf32> to vector<1x128xf32>
    %15 = vector.shape_cast %14 : vector<1x128xf32> to vector<1x1x128xf32>
    %c0_11 = arith.constant 0 : index
    %c0_12 = arith.constant 0 : index
    %c0_13 = arith.constant 0 : index
    %16 = vector.load %arg6[%c0_11, %c0_12, %c0_13] : memref<1x1x128xf32, #tpu.memory_space<vmem>>, vector<1x1x128xf32>
    tpu.vector_store %arg6[%c0_11, %c0_12, %c0_13], %15 {strides = array<i32>} : memref<1x1x128xf32, #tpu.memory_space<vmem>>, vector<1x1x128xf32>,
    %17 = arith.mulf %11, %11 : vector<128x128xf32>
    %cst_14 = arith.constant dense<0.000000e+00> : vector<128xf32>
    %18 = vector.multi_reduction <add>, %17, %cst_14 [0] : vector<128x128xf32> to vector<128xf32>
    %19 = vector.shape_cast %18 : vector<128xf32> to vector<1x128xf32>
    %20 = vector.shape_cast %19 : vector<1x128xf32> to vector<1x1x128xf32>
    %c0_15 = arith.constant 0 : index
    %c0_16 = arith.constant 0 : index
    %c0_17 = arith.constant 0 : index
    %21 = vector.load %arg7[%c0_15, %c0_16, %c0_17] : memref<1x1x128xf32, #tpu.memory_space<vmem>>, vector<1x1x128xf32>
    tpu.vector_store %arg7[%c0_15, %c0_16, %c0_17], %20 {strides = array<i32>} : memref<1x1x128xf32, #tpu.memory_space<vmem>>, vector<1x1x128xf32>,
    return
  }
  func.func @transform_0(%arg0: i32) -> (i32, i32) {
    %c0_i32 = arith.constant 0 : i32
    %c0_i32_0 = arith.constant 0 : i32
    return %arg0, %c0_i32 : i32, i32
  }
  func.func @transform_1(%arg0: i32) -> (i32, i32) {
    %c0_i32 = arith.constant 0 : i32
    %c0_i32_0 = arith.constant 0 : i32
    %c0_i32_1 = arith.constant 0 : i32
    return %c0_i32, %c0_i32_0 : i32, i32
  }
  func.func @transform_2(%arg0: i32) -> (i32, i32) {
    %c0_i32 = arith.constant 0 : i32
    %c0_i32_0 = arith.constant 0 : i32
    %c0_i32_1 = arith.constant 0 : i32
    return %c0_i32, %c0_i32_0 : i32, i32
  }
  func.func @transform_3(%arg0: i32) -> (i32, i32) {
    %c0_i32 = arith.constant 0 : i32
    %c0_i32_0 = arith.constant 0 : i32
    %c0_i32_1 = arith.constant 0 : i32
    return %c0_i32, %c0_i32_0 : i32, i32
  }
  func.func @transform_4(%arg0: i32) -> (i32, i32) {
    %c0_i32 = arith.constant 0 : i32
    %c0_i32_0 = arith.constant 0 : i32
    return %arg0, %c0_i32 : i32, i32
  }
  func.func @transform_5(%arg0: i32) -> (i32, i32, i32) {
    %c0_i32 = arith.constant 0 : i32
    %c0_i32_0 = arith.constant 0 : i32
    %c0_i32_1 = arith.constant 0 : i32
    return %arg0, %c0_i32, %c0_i32_0 : i32, i32, i32
  }
  func.func @transform_6(%arg0: i32) -> (i32, i32, i32) {
    %c0_i32 = arith.constant 0 : i32
    %c0_i32_0 = arith.constant 0 : i32
    %c0_i32_1 = arith.constant 0 : i32
    return %arg0, %c0_i32, %c0_i32_0 : i32, i32, i32
  }
}

module attributes {stable_mosaic.version = 11 : i64} {
  func.func @bn_add_relu_kernel(%arg0: i32, %arg1: memref<128x128xf32, #tpu.memory_space<vmem>>, %arg2: memref<1x128xf32, #tpu.memory_space<vmem>>, %arg3: memref<1x128xf32, #tpu.memory_space<vmem>>, %arg4: memref<128x128xf32, #tpu.memory_space<vmem>>, %arg5: memref<128x128xf32, #tpu.memory_space<vmem>>) attributes {dimension_semantics = [#tpu.dimension_semantics<parallel>], iteration_bounds = array<i64: 4>, scalar_prefetch = 0 : i64, scratch_operands = 0 : i64, tpu.core_type = #tpu.core_type<tc>, window_params = [{transform_indices = @transform_0, window_bounds = array<i64: 128, 128>}, {pipeline_mode = #tpu.pipeline_mode<synchronous>, transform_indices = @transform_1, window_bounds = array<i64: 1, 128>}, {pipeline_mode = #tpu.pipeline_mode<synchronous>, transform_indices = @transform_2, window_bounds = array<i64: 1, 128>}, {transform_indices = @transform_3, window_bounds = array<i64: 128, 128>}, {transform_indices = @transform_4, window_bounds = array<i64: 128, 128>}]} {
    %c0 = arith.constant 0 : index
    %c0_0 = arith.constant 0 : index
    %0 = vector.load %arg1[%c0, %c0_0] : memref<128x128xf32, #tpu.memory_space<vmem>>, vector<128x128xf32>
    %c0_1 = arith.constant 0 : index
    %c0_2 = arith.constant 0 : index
    %1 = vector.load %arg2[%c0_1, %c0_2] : memref<1x128xf32, #tpu.memory_space<vmem>>, vector<1x128xf32>
    %2 = vector.broadcast %1 : vector<1x128xf32> to vector<128x128xf32>
    %3 = arith.mulf %0, %2 : vector<128x128xf32>
    %c0_3 = arith.constant 0 : index
    %c0_4 = arith.constant 0 : index
    %4 = vector.load %arg3[%c0_3, %c0_4] : memref<1x128xf32, #tpu.memory_space<vmem>>, vector<1x128xf32>
    %5 = vector.broadcast %4 : vector<1x128xf32> to vector<128x128xf32>
    %6 = arith.addf %3, %5 : vector<128x128xf32>
    %c0_5 = arith.constant 0 : index
    %c0_6 = arith.constant 0 : index
    %7 = vector.load %arg4[%c0_5, %c0_6] : memref<128x128xf32, #tpu.memory_space<vmem>>, vector<128x128xf32>
    %8 = arith.addf %6, %7 : vector<128x128xf32>
    %cst = arith.constant 0.000000e+00 : f32
    %9 = vector.broadcast %cst : f32 to vector<128x128xf32>
    %10 = arith.maximumf %8, %9 : vector<128x128xf32>
    %c0_7 = arith.constant 0 : index
    %c0_8 = arith.constant 0 : index
    %11 = vector.load %arg5[%c0_7, %c0_8] : memref<128x128xf32, #tpu.memory_space<vmem>>, vector<128x128xf32>
    tpu.vector_store %arg5[%c0_7, %c0_8], %10 {strides = array<i32>} : memref<128x128xf32, #tpu.memory_space<vmem>>, vector<128x128xf32>,
    return
  }
  func.func @transform_0(%arg0: i32) -> (i32, i32) {
    %c0_i32 = arith.constant 0 : i32
    %c0_i32_0 = arith.constant 0 : i32
    return %arg0, %c0_i32 : i32, i32
  }
  func.func @transform_1(%arg0: i32) -> (i32, i32) {
    %c0_i32 = arith.constant 0 : i32
    %c0_i32_0 = arith.constant 0 : i32
    %c0_i32_1 = arith.constant 0 : i32
    return %c0_i32, %c0_i32_0 : i32, i32
  }
  func.func @transform_2(%arg0: i32) -> (i32, i32) {
    %c0_i32 = arith.constant 0 : i32
    %c0_i32_0 = arith.constant 0 : i32
    %c0_i32_1 = arith.constant 0 : i32
    return %c0_i32, %c0_i32_0 : i32, i32
  }
  func.func @transform_3(%arg0: i32) -> (i32, i32) {
    %c0_i32 = arith.constant 0 : i32
    %c0_i32_0 = arith.constant 0 : i32
    return %arg0, %c0_i32 : i32, i32
  }
  func.func @transform_4(%arg0: i32) -> (i32, i32) {
    %c0_i32 = arith.constant 0 : i32
    %c0_i32_0 = arith.constant 0 : i32
    return %arg0, %c0_i32 : i32, i32
  }
}

</mosaic_0001>

<bundles_post_ra>
// kernel: bottleneck_forward.6
= control target key start
LH: loop header
LB: loop body
LE: loop exit
PB: predicated region body
PF: predicated region fallthrough
CT: control target
= control target key end

     0   :  { %s516_s12 = smov 0   ;;  %s607_s0 = inlined_call_operand.vmem [shape: f32[512,128], index: 0, kind: input, shape index: {}]   ;;  %s608_s1 = inlined_call_operand.vmem [shape: f32[1,128], index: 1, kind: input, shape index: {}]   ;;  %s609_s2 = inlined_call_operand.vmem [shape: f32[1,128], index: 2, kind: input, shape index: {}]   ;;  %s610_s3 = inlined_call_operand.vmem [shape: bf16[512,128], index: 3, kind: output, shape index: {}]  }
   0x1 LB: > { %s388_s13 = sadd.s32 4294967295, %s494_s12   ;;  %p392_p0 = scmp.ge.s32.totalorder %s494_s12, 1  ;;  %s494_s12 = sphi %s516_s12, %s13_s12  }
   0x2   : > { %p138_p1 = scmp.lt.s32.totalorder %s494_s12, 5 }
   0x4   : > { %p139_p2 = pnand %p392_p0, %p138_p1 }
   0x5   : > { %s393_s14 = sshll.u32 (!%p139_p2), %s388_s13, 4  ;;  %v530_v0 = vld [vmem:[%s608_s1] ss:$0 sm:$0xff] (!%p139_p2) }
   0x6   : > { %142 = sbr.rel (%p139_p2) target bundleno = 37 (0x25), region = 32  ;;  %p163_p3 = scmp.lt.s32.totalorder (!%p139_p2), %s393_s14, 63  ;;  %v540_v1 = vld [vmem:[%s609_s2] ss:$0 sm:$0xff] (!%p139_p2) }
   0xd   : > { %s612_s14 = smov (!%p163_p3, %s393_s14), 63 }
   0xe   : > { %s394_s15 = sshll.u32 %s612_s14, 3  ;;  %s396_s23 = sshll.u32 %s612_s14, 2 }
   0xf   : > { %s535_s20 = scalar_lea.vmem %s607_s0, %s394_s15  ;;  %s572_s26 = scalar_lea.vmem %s610_s3, %s396_s23 }
  0x10   : > { %v174_v2 = vld [vmem:[%s535_s20] sm:$0xff]  ;;  %v175_v3 = vld [vmem:[%s535_s20 + $0x8] sm:$0xff]  ;;  %v176_v4 = vld [vmem:[%s535_s20 + $0x10] sm:$0xff] }
  0x11   : > { %v197_v5 = vmul.f32 %v530_v0, %v174_v2  ;;  %v198_v6 = vmul.f32 %v530_v0, %v175_v3  ;;  %v177_v7 = vld [vmem:[%s535_s20 + $0x18] sm:$0xff]  ;;  %v199_v8 = vmul.f32 %v530_v0, %v176_v4  ;;  %v178_v9 = vld [vmem:[%s535_s20 + $0x20] sm:$0xff]  ;;  %v179_v10 = vld [vmem:[%s535_s20 + $0x28] sm:$0xff] }
  0x12   : > { %v200_v11 = vmul.f32 %v530_v0, %v177_v7  ;;  %v201_v12 = vmul.f32 %v530_v0, %v178_v9  ;;  %v202_v13 = vmul.f32 %v530_v0, %v179_v10  ;;  %v180_v14 = vld [vmem:[%s535_s20 + $0x30] sm:$0xff]  ;;  %v181_v15 = vld [vmem:[%s535_s20 + $0x38] sm:$0xff]  ;;  %v182_v24 = vld [vmem:[%s535_s20 + $0x40] sm:$0xff] }
  0x13   : > { %v220_v16 = vadd.f32 %v540_v1, %v197_v5  ;;  %v221_v17 = vadd.f32 %v540_v1, %v198_v6  ;;  %v222_v18 = vadd.f32 %v540_v1, %v199_v8  ;;  %v203_v19 = vmul.f32 %v530_v0, %v180_v14  ;;  %v183_v25 = vld [vmem:[%s535_s20 + $0x48] sm:$0xff]  ;;  %v184_v30 = vld [vmem:[%s535_s20 + $0x50] sm:$0xff]  ;;  %v185_v35 = vld [vmem:[%s535_s20 + $0x58] sm:$0xff] }
  0x14   : > { %v223_v20 = vadd.f32 %v540_v1, %v200_v11  ;;  %v224_v21 = vadd.f32 %v540_v1, %v201_v12  ;;  %v225_v22 = vadd.f32 %v540_v1, %v202_v13  ;;  %v204_v23 = vmul.f32 %v530_v0, %v181_v15  ;;  %v186_v36 = vld [vmem:[%s535_s20 + $0x60] sm:$0xff]  ;;  %v187_v41 = vld [vmem:[%s535_s20 + $0x68] sm:$0xff]  ;;  %v188_v42 = vld [vmem:[%s535_s20 + $0x70] sm:$0xff] }
  0x15   : > { %v236_v26 = vmax.f32 %v220_v16, 0.0  ;;  %v237_v27 = vmax.f32 %v221_v17, 0.0  ;;  %v238_v28 = vmax.f32 %v222_v18, 0.0  ;;  %v226_v29 = vadd.f32 %v540_v1, %v203_v19  ;;  %v189_v51 = vld [vmem:[%s535_s20 + $0x78] sm:$0xff] }
  0x16   : > { %v239_v31 = vmax.f32 %v223_v20, 0.0  ;;  %v240_v32 = vmax.f32 %v224_v21, 0.0  ;;  %v241_v33 = vmax.f32 %v225_v22, 0.0  ;;  %v227_v34 = vadd.f32 %v540_v1, %v204_v23 }
  0x17   : > { %v436_v37 = vpack.c.bf16 %v237_v27, %v236_v26  ;;  %v242_v38 = vmax.f32 %v226_v29, 0.0  ;;  %v205_v39 = vmul.f32 %v530_v0, %v182_v24  ;;  %v206_v40 = vmul.f32 %v530_v0, %v183_v25 }
  0x18   : > { %v441_v43 = vpack.c.bf16 %v239_v31, %v238_v28  ;;  %v446_v44 = vpack.c.bf16 %v241_v33, %v240_v32  ;;  %v243_v45 = vmax.f32 %v227_v34, 0.0  ;;  %v207_v46 = vmul.f32 %v530_v0, %v184_v30 }
  0x19   : > { %437 = vst [vmem:[%s572_s26] sm:$0xff] %v436_v37   ;;  %v228_v47 = vadd.f32 %v540_v1, %v205_v39  ;;  %v229_v48 = vadd.f32 %v540_v1, %v206_v40  ;;  %v208_v49 = vmul.f32 %v530_v0, %v185_v35  ;;  %v209_v50 = vmul.f32 %v530_v0, %v186_v36 }
  0x1a   : > { %473 = vst [vmem:[%s572_s26 + $0x8] sm:$0xff] %v441_v43   ;;  %474 = vst [vmem:[%s572_s26 + $0x10] sm:$0xff] %v446_v44   ;;  %v451_v52 = vpack.c.bf16 %v243_v45, %v242_v38  ;;  %v230_v53 = vadd.f32 %v540_v1, %v207_v46  ;;  %v210_v54 = vmul.f32 %v530_v0, %v187_v41 }
  0x1b   : > { %v211_v55 = vmul.f32 %v530_v0, %v188_v42  ;;  %v244_v56 = vmax.f32 %v228_v47, 0.0  ;;  %v245_v57 = vmax.f32 %v229_v48, 0.0  ;;  %v231_v58 = vadd.f32 %v540_v1, %v208_v49 }
  0x1c   : > { %v232_v59 = vadd.f32 %v540_v1, %v209_v50  ;;  %475 = vst [vmem:[%s572_s26 + $0x18] sm:$0xff] %v451_v52   ;;  %v246_v60 = vmax.f32 %v230_v53, 0.0  ;;  %v233_v61 = vadd.f32 %v540_v1, %v210_v54  ;;  %v212_v62 = vmul.f32 %v530_v0, %v189_v51 }
  0x1d   : > { %v234_v63 = vadd.f32 %v540_v1, %v211_v55  ;;  %v456_v2 = vpack.c.bf16 %v245_v57, %v244_v56  ;;  %v247_v3 = vmax.f32 %v231_v58, 0.0 }
  0x1e   : > { %v248_v4 = vmax.f32 %v232_v59, 0.0  ;;  %v249_v5 = vmax.f32 %v233_v61, 0.0  ;;  %v235_v6 = vadd.f32 %v540_v1, %v212_v62 }
  0x1f   : > { %v250_v7 = vmax.f32 %v234_v63, 0.0  ;;  %476 = vst [vmem:[%s572_s26 + $0x20] sm:$0xff] %v456_v2   ;;  %v461_v8 = vpack.c.bf16 %v247_v3, %v246_v60 }
  0x20   : > { %v466_v9 = vpack.c.bf16 %v249_v5, %v248_v4  ;;  %v251_v10 = vmax.f32 %v235_v6, 0.0 }
  0x21   : > { %477 = vst [vmem:[%s572_s26 + $0x28] sm:$0xff] %v461_v8  }
  0x22   : > { %478 = vst [vmem:[%s572_s26 + $0x30] sm:$0xff] %v466_v9   ;;  %v471_v11 = vpack.c.bf16 %v251_v10, %v250_v7 }
  0x24   : > { %479 = vst [vmem:[%s572_s26 + $0x38] sm:$0xff] %v471_v11  }
  0x25 PF: > { %s13_s12 = sadd.s32 1, %s494_s12  }
  0x26   : > { %p10_p4 = scmp.ge.s32.totalorder %s13_s12, 6  }
  0x28   :  { %12 = sbr.rel (!%p10_p4) target bundleno = 1 (0x1), region = 62 }

// kernel: bottleneck_forward.5
= control target key start
LH: loop header
LB: loop body
LE: loop exit
PB: predicated region body
PF: predicated region fallthrough
CT: control target
= control target key end

     0   :  { %s774_s15 = smov 0   ;;  %s858_s0 = inlined_call_operand.vmem [shape: bf16[512,128], index: 0, kind: input, shape index: {}]   ;;  %s859_s1 = inlined_call_operand.vmem [shape: bf16[128,128], index: 1, kind: input, shape index: {}]   ;;  %s860_s2 = inlined_call_operand.vmem [shape: f32[512,128], index: 2, kind: output, shape index: {0}]   ;;  %s861_s3 = inlined_call_operand.vmem [shape: f32[4,1,128], index: 3, kind: output, shape index: {1}]   ;;  %s862_s4 = inlined_call_operand.vmem [shape: f32[4,1,128], index: 4, kind: output, shape index: {2}]  }
   0x1 LB: > { %s780_s16 = sadd.s32 4294967295, %s747_s15   ;;  %p630_p0 = scmp.ge.s32.totalorder %s747_s15, 1  ;;  %s747_s15 = sphi %s774_s15, %s15_s15  }
   0x2   : > { %p168_p1 = scmp.lt.s32.totalorder %s747_s15, 5 }
   0x4   : > { %p169_p2 = pnand %p630_p0, %p168_p1 }
   0x5   : > { %v725_v0 = vld [vmem:[%s859_s1] sm:$0xff] (!%p169_p2)   ;;  %s631_s19 = sshll.u32 (!%p169_p2), %s780_s16, 4  ;;  %v726_v1 = vld [vmem:[%s859_s1 + $0x8] sm:$0xff] (!%p169_p2)   ;;  %v727_v2 = vld [vmem:[%s859_s1 + $0x10] sm:$0xff] (!%p169_p2)   ;;  %p212_p4 = scmp.lt.s32.totalorder (!%p169_p2), %s780_s16, 3 }
   0x6   : > { %172 = sbr.rel (%p169_p2) target bundleno = 298 (0x12a), region = 28  ;;  %p201_p3 = scmp.lt.s32.totalorder (!%p169_p2), %s631_s19, 63  ;;  %669 = vmatprep.subr.bf16.mxu0 (!%p169_p2), %v725_v0  ;;  %701 = vmatprep.subr.bf16.mxu1 (!%p169_p2), %v725_v0  ;;  %v728_v3 = vld [vmem:[%s859_s1 + $0x18] sm:$0xff] (!%p169_p2)   ;;  %v729_v5 = vld [vmem:[%s859_s1 + $0x20] sm:$0xff] (!%p169_p2)   ;;  %v730_v7 = vld [vmem:[%s859_s1 + $0x28] sm:$0xff] (!%p169_p2)  }
   0x7   : > { %670 = vmatpush3.bf16.msra.mxu0 (!%p169_p2), %v725_v0  ;;  %709 = vmatpush3.bf16.msra.mxu1 (!%p169_p2), %v725_v0  ;;  %v731_v8 = vld [vmem:[%s859_s1 + $0x30] sm:$0xff] (!%p169_p2)   ;;  %v732_v9 = vld [vmem:[%s859_s1 + $0x38] sm:$0xff] (!%p169_p2)  }
   0x8   : > { %671 = vmatprep.subr.bf16.mxu0 (!%p169_p2), %v726_v1  ;;  %702 = vmatprep.subr.bf16.mxu1 (!%p169_p2), %v726_v1 }
   0xb   : > { %672 = vmatpush3.bf16.msra.mxu0 (!%p169_p2), %v726_v1  ;;  %710 = vmatpush3.bf16.msra.mxu1 (!%p169_p2), %v726_v1 }
   0xc   : > { %673 = vmatprep.subr.bf16.mxu0 (!%p169_p2), %v727_v2  ;;  %703 = vmatprep.subr.bf16.mxu1 (!%p169_p2), %v727_v2 }
   0xd   : > { %s864_s19 = smov (!%p201_p3, %s631_s19), 63  ;;  %s866_s16 = smov (!%p212_p4, %s780_s16), 3 }
   0xe   : > { %s632_s24 = sshll.u32 %s864_s19, 2  ;;  %s634_s12 = sshll.u32 %s864_s19, 3 }
   0xf   : > { %s800_s27 = scalar_lea.vmem %s858_s0, %s632_s24  ;;  %674 = vmatpush3.bf16.msra.mxu0 %v727_v2  ;;  %711 = vmatpush3.bf16.msra.mxu1 %v727_v2  ;;  %s829_s17 = scalar_lea.vmem %s860_s2, %s634_s12 }
  0x10   : > { %v733_v4 = vld [vmem:[%s800_s27] sm:$0xff]   ;;  %675 = vmatprep.subr.bf16.mxu0 %v728_v3  ;;  %704 = vmatprep.subr.bf16.mxu1 %v728_v3  ;;  %v734_v10 = vld [vmem:[%s800_s27 + $0x8] sm:$0xff]   ;;  %v735_v12 = vld [vmem:[%s800_s27 + $0x10] sm:$0xff]   ;;  %s214_s20 = scalar_lea.vmem %s861_s3, %s866_s16  ;;  %s217_s23 = scalar_lea.vmem %s862_s4, %s866_s16 }
  0x11   : > { %685 = vmatprep.mubr.bf16.mxu0 %v733_v4  ;;  %v737_v6 = vld [vmem:[%s800_s27 + $0x20] sm:$0xff]   ;;  %v738_v11 = vld [vmem:[%s800_s27 + $0x28] sm:$0xff]   ;;  %v739_v13 = vld [vmem:[%s800_s27 + $0x30] sm:$0xff]  }
  0x12   : > { %693 = vmatprep.mubr.bf16.mxu1 %v737_v6  ;;  %v736_v14 = vld [vmem:[%s800_s27 + $0x18] sm:$0xff]  }
  0x13   : > { %676 = vmatpush3.bf16.msra.mxu0 %v728_v3  ;;  %712 = vmatpush3.bf16.msra.mxu1 %v728_v3  ;;  %v740_v15 = vld [vmem:[%s800_s27 + $0x38] sm:$0xff]  }
  0x14   : > { %677 = vmatprep.subr.bf16.mxu0 %v729_v5  ;;  %705 = vmatprep.subr.bf16.mxu1 %v729_v5 }
  0x17   : > { %678 = vmatpush3.bf16.msra.mxu0 %v729_v5  ;;  %713 = vmatpush3.bf16.msra.mxu1 %v729_v5 }
  0x18   : > { %679 = vmatprep.subr.bf16.mxu0 %v730_v7  ;;  %706 = vmatprep.subr.bf16.mxu1 %v730_v7 }
  0x1b   : > { %680 = vmatpush3.bf16.msra.mxu0 %v730_v7  ;;  %714 = vmatpush3.bf16.msra.mxu1 %v730_v7 }
  0x1c   : > { %681 = vmatprep.subr.bf16.mxu0 %v731_v8  ;;  %707 = vmatprep.subr.bf16.mxu1 %v731_v8 }
  0x1f   : > { %682 = vmatpush3.bf16.msra.mxu0 %v731_v8  ;;  %715 = vmatpush3.bf16.msra.mxu1 %v731_v8 }
  0x20   : > { %683 = vmatprep.subr.bf16.mxu0 %v732_v9  ;;  %708 = vmatprep.subr.bf16.mxu1 %v732_v9 }
  0x23   : > { %684 = vmatpush3.bf16.msra.mxu0 %v732_v9  ;;  %716 = vmatpush3.bf16.msra.mxu1 %v732_v9 }
  0x26   : > { %686 = vmatmul.mubr.bf16.vlgmr.msra.gmra.mrb[0].mxu0 %v734_v10  ;;  %694 = vmatmul.mubr.bf16.vlgmr.msra.gmra.mrb[0].mxu1 %v738_v11 }
  0x27   : > { %689 = vmatprep.mubr.bf16.mxu0 %v735_v12  ;;  %697 = vmatprep.mubr.bf16.mxu1 %v739_v13 }
  0x2e   : > { %690 = vmatmul.mubr.bf16.gmra.mrb[4].mxu0 %v736_v14  ;;  %698 = vmatmul.mubr.bf16.gmra.mrb[4].mxu1 %v740_v15 }
  0xf9   : > { %v687_v16 = vpop.f32.mrb[0].mxu0  ;;  %v695_v17 = vpop.f32.mrb[0].mxu1 }
  0xfa   : > { %446 = vst [vmem:[%s829_s17 + $0x10] sm:$0xff] %v687_v16  ;;  %v381_v18 = vpop.f32.mrb[1].mxu0  ;;  %454 = vst [vmem:[%s829_s17 + $0x50] sm:$0xff] %v695_v17  ;;  %v413_v19 = vpop.f32.mrb[1].mxu1  ;;  %v484_v27 = vmul.f32 %v687_v16, %v687_v16  ;;  %v492_v59 = vmul.f32 %v695_v17, %v695_v17 }
  0xfb   : > { %444 = vst [vmem:[%s829_s17] sm:$0xff] %v381_v18  ;;  %v688_v20 = vpop.f32.mrb[2].mxu0  ;;  %452 = vst [vmem:[%s829_s17 + $0x40] sm:$0xff] %v413_v19  ;;  %v696_v21 = vpop.f32.mrb[2].mxu1  ;;  %v482_v24 = vmul.f32 %v381_v18, %v381_v18  ;;  %v490_v53 = vmul.f32 %v413_v19, %v413_v19 }
  0xfc   : > { %447 = vst [vmem:[%s829_s17 + $0x18] sm:$0xff] %v688_v20  ;;  %v384_v22 = vpop.f32.mrb[3].mxu0  ;;  %455 = vst [vmem:[%s829_s17 + $0x58] sm:$0xff] %v696_v21  ;;  %v416_v23 = vpop.f32.mrb[3].mxu1  ;;  %v485_v30 = vmul.f32 %v688_v20, %v688_v20  ;;  %v493_v62 = vmul.f32 %v696_v21, %v696_v21 }
  0xfd   : > { %445 = vst [vmem:[%s829_s17 + $0x8] sm:$0xff] %v384_v22  ;;  %v460_v25 = vadd.f32 %v384_v22, %v381_v18  ;;  %v483_v26 = vmul.f32 %v384_v22, %v384_v22  ;;  %453 = vst [vmem:[%s829_s17 + $0x48] sm:$0xff] %v416_v23  ;;  %v491_v58 = vmul.f32 %v416_v23, %v416_v23 }
  0xff   : > { %v461_v28 = vadd.f32 %v687_v16, %v460_v25  ;;  %v498_v29 = vadd.f32 %v483_v26, %v482_v24 }
 0x101   : > { %v499_v31 = vadd.f32 %v498_v29, %v484_v27  ;;  %v691_v32 = vpop.f32.mrb[4].mxu0  ;;  %v462_v33 = vadd.f32 %v688_v20, %v461_v28  ;;  %v699_v34 = vpop.f32.mrb[4].mxu1 }
 0x102   : > { %450 = vst [vmem:[%s829_s17 + $0x30] sm:$0xff] %v691_v32  ;;  %v397_v35 = vpop.f32.mrb[5].mxu0  ;;  %458 = vst [vmem:[%s829_s17 + $0x70] sm:$0xff] %v699_v34  ;;  %v429_v36 = vpop.f32.mrb[5].mxu1  ;;  %v488_v47 = vmul.f32 %v691_v32, %v691_v32  ;;  %v496_v7 = vmul.f32 %v699_v34, %v699_v34 }
 0x103   : > { %448 = vst [vmem:[%s829_s17 + $0x20] sm:$0xff] %v397_v35  ;;  %v463_v37 = vadd.f32 %v462_v33, %v397_v35  ;;  %v486_v38 = vmul.f32 %v397_v35, %v397_v35  ;;  %v500_v39 = vadd.f32 %v499_v31, %v485_v30  ;;  %v692_v40 = vpop.f32.mrb[6].mxu0  ;;  %456 = vst [vmem:[%s829_s17 + $0x60] sm:$0xff] %v429_v36  ;;  %v700_v41 = vpop.f32.mrb[6].mxu1 }
 0x104   : > { %451 = vst [vmem:[%s829_s17 + $0x38] sm:$0xff] %v692_v40  ;;  %v400_v42 = vpop.f32.mrb[7].mxu0  ;;  %459 = vst [vmem:[%s829_s17 + $0x78] sm:$0xff] %v700_v41  ;;  %v432_v43 = vpop.f32.mrb[7].mxu1  ;;  %v489_v50 = vmul.f32 %v692_v40, %v692_v40  ;;  %v494_v1 = vmul.f32 %v429_v36, %v429_v36  ;;  %v497_v10 = vmul.f32 %v700_v41, %v700_v41 }
 0x105   : > { %v501_v44 = vadd.f32 %v500_v39, %v486_v38  ;;  %449 = vst [vmem:[%s829_s17 + $0x28] sm:$0xff] %v400_v42  ;;  %v464_v45 = vadd.f32 %v463_v37, %v400_v42  ;;  %v487_v46 = vmul.f32 %v400_v42, %v400_v42  ;;  %457 = vst [vmem:[%s829_s17 + $0x68] sm:$0xff] %v432_v43 }
 0x106   : > { %v495_v6 = vmul.f32 %v432_v43, %v432_v43 }
 0x107   : > { %v465_v48 = vadd.f32 %v691_v32, %v464_v45  ;;  %v502_v49 = vadd.f32 %v501_v44, %v487_v46 }
 0x109   : > { %v503_v51 = vadd.f32 %v502_v49, %v488_v47  ;;  %v466_v52 = vadd.f32 %v692_v40, %v465_v48 }
 0x10b   : > { %v467_v54 = vadd.f32 %v466_v52, %v413_v19  ;;  %v504_v55 = vadd.f32 %v503_v51, %v489_v50 }
 0x10d   : > { %v505_v56 = vadd.f32 %v504_v55, %v490_v53  ;;  %v468_v57 = vadd.f32 %v467_v54, %v416_v23 }
 0x10f   : > { %v469_v60 = vadd.f32 %v695_v17, %v468_v57  ;;  %v506_v61 = vadd.f32 %v505_v56, %v491_v58 }
 0x111   : > { %v507_v63 = vadd.f32 %v506_v61, %v492_v59  ;;  %v470_v0 = vadd.f32 %v696_v21, %v469_v60 }
 0x113   : > { %v471_v2 = vadd.f32 %v470_v0, %v429_v36  ;;  %v508_v3 = vadd.f32 %v507_v63, %v493_v62 }
 0x115   : > { %v509_v4 = vadd.f32 %v508_v3, %v494_v1  ;;  %v472_v5 = vadd.f32 %v471_v2, %v432_v43 }
 0x117   : > { %v473_v8 = vadd.f32 %v699_v34, %v472_v5  ;;  %v510_v9 = vadd.f32 %v509_v4, %v495_v6 }
 0x119   : > { %v474_v11 = vadd.f32 %v700_v41, %v473_v8  ;;  %v511_v12 = vadd.f32 %v510_v9, %v496_v7 }
 0x11b   : > { %v475_v13 = vrot.slane %v474_v11, 4  ;;  %v512_v14 = vadd.f32 %v511_v12, %v497_v10 }
 0x11d   : > { %v476_v15 = vadd.f32 %v475_v13, %v474_v11  ;;  %v513_v16 = vrot.slane %v512_v14, 4 }
 0x11f   : > { %v477_v17 = vrot.slane %v476_v15, 2  ;;  %v514_v18 = vadd.f32 %v513_v16, %v512_v14 }
 0x121   : > { %v478_v19 = vadd.f32 %v477_v17, %v476_v15  ;;  %v515_v20 = vrot.slane %v514_v18, 2 }
 0x123   : > { %v479_v21 = vrot.slane %v478_v19, 1  ;;  %v516_v22 = vadd.f32 %v515_v20, %v514_v18 }
 0x125   : > { %v480_v23 = vadd.f32 %v479_v21, %v478_v19  ;;  %v517_v24 = vrot.slane %v516_v22, 1 }
 0x127   : > { %481 = vst [vmem:[%s214_s20] sm:$0x1] %v480_v23  ;;  %v518_v25 = vadd.f32 %v517_v24, %v516_v22 }
 0x129   : > { %519 = vst [vmem:[%s217_s23] sm:$0x1] %v518_v25 }
 0x12a PF: > { %s15_s15 = sadd.s32 1, %s747_s15  }
 0x12b   : > { %p12_p5 = scmp.ge.s32.totalorder %s15_s15, 6  }
 0x12d   :  { %14 = sbr.rel (!%p12_p5) target bundleno = 1 (0x1), region = 82 }

// kernel: bottleneck_forward.8
= control target key start
LH: loop header
LB: loop body
LE: loop exit
PB: predicated region body
PF: predicated region fallthrough
CT: control target
= control target key end

     0   :  { %s846_s21 = smov 0   ;;  %s983_s0 = inlined_call_operand.vmem [shape: f32[512,128], index: 0, kind: input, shape index: {}]   ;;  %s984_s1 = inlined_call_operand.vmem [shape: f32[1,128], index: 1, kind: input, shape index: {}]   ;;  %s985_s2 = inlined_call_operand.vmem [shape: f32[1,128], index: 2, kind: input, shape index: {}]   ;;  %s986_s3 = inlined_call_operand.vmem [shape: bf16[128,128], index: 3, kind: input, shape index: {}]   ;;  %s987_s4 = inlined_call_operand.vmem [shape: f32[512,128], index: 4, kind: output, shape index: {0}]   ;;  %s988_s5 = inlined_call_operand.vmem [shape: f32[4,1,128], index: 5, kind: output, shape index: {1}]   ;;  %s989_s6 = inlined_call_operand.vmem [shape: f32[4,1,128], index: 6, kind: output, shape index: {2}]  }
   0x1 LB: > { %s852_s22 = sadd.s32 4294967295, %s809_s21   ;;  %p706_p0 = scmp.ge.s32.totalorder %s809_s21, 1  ;;  %s809_s21 = sphi %s846_s21, %s17_s21  }
   0x2   : > { %p218_p1 = scmp.lt.s32.totalorder %s809_s21, 5 }
   0x4   : > { %p219_p2 = pnand %p706_p0, %p218_p1 }
   0x5   : > { %v795_v0 = vld [vmem:[%s986_s3] sm:$0xff] (!%p219_p2)   ;;  %s707_s25 = sshll.u32 (!%p219_p2), %s852_s22, 4  ;;  %v796_v1 = vld [vmem:[%s986_s3 + $0x8] sm:$0xff] (!%p219_p2)   ;;  %v797_v2 = vld [vmem:[%s986_s3 + $0x10] sm:$0xff] (!%p219_p2)   ;;  %p266_p4 = scmp.lt.s32.totalorder (!%p219_p2), %s852_s22, 3 }
   0x6   : > { %222 = sbr.rel (%p219_p2) target bundleno = 298 (0x12a), region = 36  ;;  %p255_p3 = scmp.lt.s32.totalorder (!%p219_p2), %s707_s25, 63  ;;  %739 = vmatprep.subr.bf16.mxu0 (!%p219_p2), %v795_v0  ;;  %771 = vmatprep.subr.bf16.mxu1 (!%p219_p2), %v795_v0  ;;  %v798_v3 = vld [vmem:[%s986_s3 + $0x18] sm:$0xff] (!%p219_p2)   ;;  %v884_v6 = vld [vmem:[%s984_s1] ss:$0 sm:$0xff] (!%p219_p2)  ;;  %v800_v17 = vld [vmem:[%s986_s3 + $0x28] sm:$0xff] (!%p219_p2)  }
   0x7   : > { %740 = vmatpush3.bf16.msra.mxu0 (!%p219_p2), %v795_v0  ;;  %779 = vmatpush3.bf16.msra.mxu1 (!%p219_p2), %v795_v0  ;;  %v891_v9 = vld [vmem:[%s985_s2] ss:$0 sm:$0xff] (!%p219_p2)  ;;  %v801_v40 = vld [vmem:[%s986_s3 + $0x30] sm:$0xff] (!%p219_p2)   ;;  %v802_v55 = vld [vmem:[%s986_s3 + $0x38] sm:$0xff] (!%p219_p2)  }
   0x8   : > { %741 = vmatprep.subr.bf16.mxu0 (!%p219_p2), %v796_v1  ;;  %772 = vmatprep.subr.bf16.mxu1 (!%p219_p2), %v796_v1  ;;  %v799_v12 = vld [vmem:[%s986_s3 + $0x20] sm:$0xff] (!%p219_p2)  }
   0xb   : > { %742 = vmatpush3.bf16.msra.mxu0 (!%p219_p2), %v796_v1  ;;  %780 = vmatpush3.bf16.msra.mxu1 (!%p219_p2), %v796_v1 }
   0xc   : > { %743 = vmatprep.subr.bf16.mxu0 (!%p219_p2), %v797_v2  ;;  %773 = vmatprep.subr.bf16.mxu1 (!%p219_p2), %v797_v2 }
   0xd   : > { %s991_s25 = smov (!%p255_p3, %s707_s25), 63  ;;  %s993_s22 = smov (!%p266_p4, %s852_s22), 3 }
   0xe   : > { %s708_s30 = sshll.u32 %s991_s25, 3  ;;  %s268_s7 = scalar_lea.vmem %s988_s5, %s993_s22 }
   0xf   : > { %s874_s9 = scalar_lea.vmem %s983_s0, %s708_s30  ;;  %744 = vmatpush3.bf16.msra.mxu0 %v797_v2  ;;  %781 = vmatpush3.bf16.msra.mxu1 %v797_v2  ;;  %s954_s29 = scalar_lea.vmem %s987_s4, %s708_s30 }
  0x10   : > { %v273_v4 = vld [vmem:[%s874_s9] sm:$0xff]  ;;  %v274_v5 = vld [vmem:[%s874_s9 + $0x8] sm:$0xff]  ;;  %745 = vmatprep.subr.bf16.mxu0 %v798_v3  ;;  %774 = vmatprep.subr.bf16.mxu1 %v798_v3  ;;  %v275_v18 = vld [vmem:[%s874_s9 + $0x10] sm:$0xff]  ;;  %s271_s10 = scalar_lea.vmem %s989_s6, %s993_s22 }
  0x11   : > { %v296_v7 = vmul.f32 %v884_v6, %v273_v4  ;;  %v297_v8 = vmul.f32 %v884_v6, %v274_v5  ;;  %v281_v13 = vld [vmem:[%s874_s9 + $0x40] sm:$0xff]  ;;  %v282_v16 = vld [vmem:[%s874_s9 + $0x48] sm:$0xff]  ;;  %v276_v19 = vld [vmem:[%s874_s9 + $0x18] sm:$0xff]  ;;  %v298_v29 = vmul.f32 %v884_v6, %v275_v18 }
  0x12   : > { %v277_v21 = vld [vmem:[%s874_s9 + $0x20] sm:$0xff]  ;;  %v304_v22 = vmul.f32 %v884_v6, %v281_v13  ;;  %v283_v23 = vld [vmem:[%s874_s9 + $0x50] sm:$0xff]  ;;  %v284_v24 = vld [vmem:[%s874_s9 + $0x58] sm:$0xff]  ;;  %v305_v26 = vmul.f32 %v884_v6, %v282_v16  ;;  %v299_v30 = vmul.f32 %v884_v6, %v276_v19 }
  0x13   : > { %v319_v10 = vadd.f32 %v891_v9, %v296_v7  ;;  %v320_v11 = vadd.f32 %v891_v9, %v297_v8  ;;  %746 = vmatpush3.bf16.msra.mxu0 %v798_v3  ;;  %782 = vmatpush3.bf16.msra.mxu1 %v798_v3  ;;  %v278_v25 = vld [vmem:[%s874_s9 + $0x28] sm:$0xff]  ;;  %v285_v27 = vld [vmem:[%s874_s9 + $0x60] sm:$0xff]  ;;  %v300_v32 = vmul.f32 %v884_v6, %v277_v21  ;;  %v279_v45 = vld [vmem:[%s874_s9 + $0x30] sm:$0xff] }
  0x14   : > { %747 = vmatprep.subr.bf16.mxu0 %v799_v12  ;;  %775 = vmatprep.subr.bf16.mxu1 %v799_v12  ;;  %v286_v28 = vld [vmem:[%s874_s9 + $0x68] sm:$0xff]  ;;  %v327_v31 = vadd.f32 %v891_v9, %v304_v22  ;;  %v328_v33 = vadd.f32 %v891_v9, %v305_v26  ;;  %v306_v34 = vmul.f32 %v884_v6, %v283_v23  ;;  %v280_v46 = vld [vmem:[%s874_s9 + $0x38] sm:$0xff]  ;;  %v287_v53 = vld [vmem:[%s874_s9 + $0x70] sm:$0xff] }
  0x15   : > { %v335_v14 = vmax.f32 %v319_v10, 0.0  ;;  %v336_v15 = vmax.f32 %v320_v11, 0.0  ;;  %v307_v35 = vmul.f32 %v884_v6, %v284_v24  ;;  %v301_v36 = vmul.f32 %v884_v6, %v278_v25  ;;  %v288_v54 = vld [vmem:[%s874_s9 + $0x78] sm:$0xff] }
  0x16   : > { %v343_v37 = vmax.f32 %v327_v31, 0.0  ;;  %v308_v38 = vmul.f32 %v884_v6, %v285_v27  ;;  %v309_v39 = vmul.f32 %v884_v6, %v286_v28  ;;  %v344_v41 = vmax.f32 %v328_v33, 0.0 }
  0x17   : > { %v351_v20 = vpack.c.bf16 %v336_v15, %v335_v14  ;;  %748 = vmatpush3.bf16.msra.mxu0 %v799_v12  ;;  %783 = vmatpush3.bf16.msra.mxu1 %v799_v12  ;;  %v321_v42 = vadd.f32 %v891_v9, %v298_v29  ;;  %v322_v43 = vadd.f32 %v891_v9, %v299_v30 }
  0x18   : > { %749 = vmatprep.subr.bf16.mxu0 %v800_v17  ;;  %776 = vmatprep.subr.bf16.mxu1 %v800_v17  ;;  %v323_v44 = vadd.f32 %v891_v9, %v300_v32  ;;  %v355_v47 = vpack.c.bf16 %v344_v41, %v343_v37  ;;  %v329_v48 = vadd.f32 %v891_v9, %v306_v34 }
  0x19   : > { %755 = vmatprep.mubr.bf16.mxu0 %v351_v20  ;;  %v330_v49 = vadd.f32 %v891_v9, %v307_v35  ;;  %v324_v50 = vadd.f32 %v891_v9, %v301_v36  ;;  %v331_v51 = vadd.f32 %v891_v9, %v308_v38  ;;  %v332_v52 = vadd.f32 %v891_v9, %v309_v39 }
  0x1a   : > { %v337_v56 = vmax.f32 %v321_v42, 0.0  ;;  %v338_v57 = vmax.f32 %v322_v43, 0.0  ;;  %v302_v58 = vmul.f32 %v884_v6, %v279_v45  ;;  %v303_v59 = vmul.f32 %v884_v6, %v280_v46  ;;  %763 = vmatprep.mubr.bf16.mxu1 %v355_v47 }
  0x1b   : > { %750 = vmatpush3.bf16.msra.mxu0 %v800_v17  ;;  %784 = vmatpush3.bf16.msra.mxu1 %v800_v17  ;;  %v345_v60 = vmax.f32 %v329_v48, 0.0  ;;  %v346_v61 = vmax.f32 %v330_v49, 0.0  ;;  %v310_v62 = vmul.f32 %v884_v6, %v287_v53  ;;  %v311_v63 = vmul.f32 %v884_v6, %v288_v54 }
  0x1c   : > { %751 = vmatprep.subr.bf16.mxu0 %v801_v40  ;;  %777 = vmatprep.subr.bf16.mxu1 %v801_v40  ;;  %v339_v0 = vmax.f32 %v323_v44, 0.0  ;;  %v340_v1 = vmax.f32 %v324_v50, 0.0  ;;  %v347_v2 = vmax.f32 %v331_v51, 0.0  ;;  %v348_v3 = vmax.f32 %v332_v52, 0.0 }
  0x1d   : > { %v352_v4 = vpack.c.bf16 %v338_v57, %v337_v56  ;;  %v325_v5 = vadd.f32 %v891_v9, %v302_v58  ;;  %v326_v7 = vadd.f32 %v891_v9, %v303_v59  ;;  %v356_v8 = vpack.c.bf16 %v346_v61, %v345_v60 }
  0x1e   : > { %v333_v10 = vadd.f32 %v891_v9, %v310_v62  ;;  %v334_v11 = vadd.f32 %v891_v9, %v311_v63  ;;  %v353_v6 = vpack.c.bf16 %v340_v1, %v339_v0  ;;  %v357_v12 = vpack.c.bf16 %v348_v3, %v347_v2 }
  0x1f   : > { %752 = vmatpush3.bf16.msra.mxu0 %v801_v40  ;;  %785 = vmatpush3.bf16.msra.mxu1 %v801_v40  ;;  %v341_v13 = vmax.f32 %v325_v5, 0.0  ;;  %v342_v14 = vmax.f32 %v326_v7, 0.0 }
  0x20   : > { %753 = vmatprep.subr.bf16.mxu0 %v802_v55  ;;  %778 = vmatprep.subr.bf16.mxu1 %v802_v55  ;;  %v349_v15 = vmax.f32 %v333_v10, 0.0  ;;  %v350_v16 = vmax.f32 %v334_v11, 0.0 }
  0x21   : > { %v354_v17 = vpack.c.bf16 %v342_v14, %v341_v13 }
  0x22   : > { %v358_v18 = vpack.c.bf16 %v350_v16, %v349_v15 }
  0x23   : > { %754 = vmatpush3.bf16.msra.mxu0 %v802_v55  ;;  %786 = vmatpush3.bf16.msra.mxu1 %v802_v55 }
  0x26   : > { %756 = vmatmul.mubr.bf16.vlgmr.msra.gmra.mrb[0].mxu0 %v352_v4  ;;  %764 = vmatmul.mubr.bf16.vlgmr.msra.gmra.mrb[0].mxu1 %v356_v8 }
  0x27   : > { %759 = vmatprep.mubr.bf16.mxu0 %v353_v6  ;;  %767 = vmatprep.mubr.bf16.mxu1 %v357_v12 }
  0x2e   : > { %760 = vmatmul.mubr.bf16.gmra.mrb[4].mxu0 %v354_v17  ;;  %768 = vmatmul.mubr.bf16.gmra.mrb[4].mxu1 %v358_v18 }
  0xf9   : > { %v757_v9 = vpop.f32.mrb[0].mxu0  ;;  %v765_v19 = vpop.f32.mrb[0].mxu1 }
  0xfa   : > { %522 = vst [vmem:[%s954_s29 + $0x10] sm:$0xff] %v757_v9  ;;  %v457_v20 = vpop.f32.mrb[1].mxu0  ;;  %530 = vst [vmem:[%s954_s29 + $0x50] sm:$0xff] %v765_v19  ;;  %v489_v21 = vpop.f32.mrb[1].mxu1  ;;  %v560_v29 = vmul.f32 %v757_v9, %v757_v9  ;;  %v568_v61 = vmul.f32 %v765_v19, %v765_v19 }
  0xfb   : > { %520 = vst [vmem:[%s954_s29] sm:$0xff] %v457_v20  ;;  %v758_v22 = vpop.f32.mrb[2].mxu0  ;;  %528 = vst [vmem:[%s954_s29 + $0x40] sm:$0xff] %v489_v21  ;;  %v766_v23 = vpop.f32.mrb[2].mxu1  ;;  %v558_v26 = vmul.f32 %v457_v20, %v457_v20  ;;  %v566_v55 = vmul.f32 %v489_v21, %v489_v21 }
  0xfc   : > { %523 = vst [vmem:[%s954_s29 + $0x18] sm:$0xff] %v758_v22  ;;  %v460_v24 = vpop.f32.mrb[3].mxu0  ;;  %531 = vst [vmem:[%s954_s29 + $0x58] sm:$0xff] %v766_v23  ;;  %v492_v25 = vpop.f32.mrb[3].mxu1  ;;  %v561_v32 = vmul.f32 %v758_v22, %v758_v22  ;;  %v569_v0 = vmul.f32 %v766_v23, %v766_v23 }
  0xfd   : > { %521 = vst [vmem:[%s954_s29 + $0x8] sm:$0xff] %v460_v24  ;;  %v536_v27 = vadd.f32 %v460_v24, %v457_v20  ;;  %v559_v28 = vmul.f32 %v460_v24, %v460_v24  ;;  %529 = vst [vmem:[%s954_s29 + $0x48] sm:$0xff] %v492_v25  ;;  %v567_v60 = vmul.f32 %v492_v25, %v492_v25 }
  0xff   : > { %v537_v30 = vadd.f32 %v757_v9, %v536_v27  ;;  %v574_v31 = vadd.f32 %v559_v28, %v558_v26 }
 0x101   : > { %v575_v33 = vadd.f32 %v574_v31, %v560_v29  ;;  %v761_v34 = vpop.f32.mrb[4].mxu0  ;;  %v538_v35 = vadd.f32 %v758_v22, %v537_v30  ;;  %v769_v36 = vpop.f32.mrb[4].mxu1 }
 0x102   : > { %526 = vst [vmem:[%s954_s29 + $0x30] sm:$0xff] %v761_v34  ;;  %v473_v37 = vpop.f32.mrb[5].mxu0  ;;  %534 = vst [vmem:[%s954_s29 + $0x70] sm:$0xff] %v769_v36  ;;  %v505_v38 = vpop.f32.mrb[5].mxu1  ;;  %v564_v49 = vmul.f32 %v761_v34, %v761_v34  ;;  %v572_v11 = vmul.f32 %v769_v36, %v769_v36 }
 0x103   : > { %524 = vst [vmem:[%s954_s29 + $0x20] sm:$0xff] %v473_v37  ;;  %v539_v39 = vadd.f32 %v538_v35, %v473_v37  ;;  %v562_v40 = vmul.f32 %v473_v37, %v473_v37  ;;  %v576_v41 = vadd.f32 %v575_v33, %v561_v32  ;;  %v762_v42 = vpop.f32.mrb[6].mxu0  ;;  %532 = vst [vmem:[%s954_s29 + $0x60] sm:$0xff] %v505_v38  ;;  %v770_v43 = vpop.f32.mrb[6].mxu1 }
 0x104   : > { %527 = vst [vmem:[%s954_s29 + $0x38] sm:$0xff] %v762_v42  ;;  %v476_v44 = vpop.f32.mrb[7].mxu0  ;;  %535 = vst [vmem:[%s954_s29 + $0x78] sm:$0xff] %v770_v43  ;;  %v508_v45 = vpop.f32.mrb[7].mxu1  ;;  %v565_v52 = vmul.f32 %v762_v42, %v762_v42  ;;  %v570_v3 = vmul.f32 %v505_v38, %v505_v38  ;;  %v573_v13 = vmul.f32 %v770_v43, %v770_v43 }
 0x105   : > { %v577_v46 = vadd.f32 %v576_v41, %v562_v40  ;;  %525 = vst [vmem:[%s954_s29 + $0x28] sm:$0xff] %v476_v44  ;;  %v540_v47 = vadd.f32 %v539_v39, %v476_v44  ;;  %v563_v48 = vmul.f32 %v476_v44, %v476_v44  ;;  %533 = vst [vmem:[%s954_s29 + $0x68] sm:$0xff] %v508_v45 }
 0x106   : > { %v571_v10 = vmul.f32 %v508_v45, %v508_v45 }
 0x107   : > { %v541_v50 = vadd.f32 %v761_v34, %v540_v47  ;;  %v578_v51 = vadd.f32 %v577_v46, %v563_v48 }
 0x109   : > { %v579_v53 = vadd.f32 %v578_v51, %v564_v49  ;;  %v542_v54 = vadd.f32 %v762_v42, %v541_v50 }
 0x10b   : > { %v543_v56 = vadd.f32 %v542_v54, %v489_v21  ;;  %v580_v57 = vadd.f32 %v579_v53, %v565_v52 }
 0x10d   : > { %v581_v58 = vadd.f32 %v580_v57, %v566_v55  ;;  %v544_v59 = vadd.f32 %v543_v56, %v492_v25 }
 0x10f   : > { %v545_v62 = vadd.f32 %v765_v19, %v544_v59  ;;  %v582_v63 = vadd.f32 %v581_v58, %v567_v60 }
 0x111   : > { %v583_v1 = vadd.f32 %v582_v63, %v568_v61  ;;  %v546_v2 = vadd.f32 %v766_v23, %v545_v62 }
 0x113   : > { %v547_v4 = vadd.f32 %v546_v2, %v505_v38  ;;  %v584_v5 = vadd.f32 %v583_v1, %v569_v0 }
 0x115   : > { %v585_v7 = vadd.f32 %v584_v5, %v570_v3  ;;  %v548_v8 = vadd.f32 %v547_v4, %v508_v45 }
 0x117   : > { %v549_v6 = vadd.f32 %v769_v36, %v548_v8  ;;  %v586_v12 = vadd.f32 %v585_v7, %v571_v10 }
 0x119   : > { %v550_v14 = vadd.f32 %v770_v43, %v549_v6  ;;  %v587_v15 = vadd.f32 %v586_v12, %v572_v11 }
 0x11b   : > { %v551_v16 = vrot.slane %v550_v14, 4  ;;  %v588_v17 = vadd.f32 %v587_v15, %v573_v13 }
 0x11d   : > { %v552_v18 = vadd.f32 %v551_v16, %v550_v14  ;;  %v589_v9 = vrot.slane %v588_v17, 4 }
 0x11f   : > { %v553_v19 = vrot.slane %v552_v18, 2  ;;  %v590_v20 = vadd.f32 %v589_v9, %v588_v17 }
 0x121   : > { %v554_v21 = vadd.f32 %v553_v19, %v552_v18  ;;  %v591_v22 = vrot.slane %v590_v20, 2 }
 0x123   : > { %v555_v23 = vrot.slane %v554_v21, 1  ;;  %v592_v24 = vadd.f32 %v591_v22, %v590_v20 }
 0x125   : > { %v556_v25 = vadd.f32 %v555_v23, %v554_v21  ;;  %v593_v26 = vrot.slane %v592_v24, 1 }
 0x127   : > { %557 = vst [vmem:[%s268_s7] sm:$0x1] %v556_v25  ;;  %v594_v27 = vadd.f32 %v593_v26, %v592_v24 }
 0x129   : > { %595 = vst [vmem:[%s271_s10] sm:$0x1] %v594_v27 }
 0x12a PF: > { %s17_s21 = sadd.s32 1, %s809_s21  }
 0x12b   : > { %p14_p5 = scmp.ge.s32.totalorder %s17_s21, 6  }
 0x12d   :  { %16 = sbr.rel (!%p14_p5) target bundleno = 1 (0x1), region = 90 }

// kernel: bottleneck_forward.9
= control target key start
LH: loop header
LB: loop body
LE: loop exit
PB: predicated region body
PF: predicated region fallthrough
CT: control target
= control target key end

     0   :  { %9 = vsyncpa [#allocation3], 0  ;;  %s794_s0 = inlined_call_operand.vmem [shape: f32[512,128], index: 0, kind: input, shape index: {}]   ;;  %s795_s1 = inlined_call_operand.vmem [shape: f32[1,128], index: 1, kind: input, shape index: {}]   ;;  %s796_s2 = inlined_call_operand.vmem [shape: f32[1,128], index: 2, kind: input, shape index: {}]   ;;  %s797_s3 = inlined_call_operand.vmem [shape: f32[512,128], index: 3, kind: input, shape index: {}]   ;;  %s798_s4 = inlined_call_operand.hbm [shape: f32[512,128], index: 4, kind: output, shape index: {}]  }
   0x1   :  { %11 = vsyncpa [#allocation3 + $0x1], 0  ;;  %s585_s15 = smov 0   ;;  %s587_s16 = smov 0  }
   0x2   :  { %s589_s17 = smov 0   ;;  %s591_s18 = smov 0  }
   0x3 LB: > { %s606_s19 = sadd.s32 4294967295, %s555_s18   ;;  %s435_s20 = sadd.s32 4294967294, %s555_s18   ;;  %s555_s18 = sphi %s591_s18, %s804_s18   ;;  %s551_s17 = sphi %s589_s17, %s803_s17   ;;  %s547_s16 = sphi %s587_s16, %s802_s16   ;;  %s543_s15 = sphi %s585_s15, %s801_s15  }
   0x4   : > { %s610_s21 = sadd.s32 1, %s555_s18   ;;  %s118_s22 = sadd.s32 1, %s551_s17 }
   0x5   : > { %s115_s23 = ssub.s32 %s555_s18, %s610_s21  ;;  %p128_p0 = scmp.ne.s32.totalorder %s551_s17, %s547_s16 }
   0x6   : > { %p116_p1 = scmp.eq.s32.totalorder %s115_s23, 0  ;;  %p129_p2 = scmp.eq.s32.totalorder %s606_s19, 3 }
   0x7   : > { %p134_p3 = scmp.ne.s32.totalorder %s547_s16, %s543_s15  ;;  %p135_p4 = scmp.eq.s32.totalorder %s435_s20, 3 }
   0x8   : > { %s621_s24 = scalar_select %p116_p1, %s551_s17, %s118_s22  }
   0x9   : > { %p623_p5 = por %p129_p2, %p128_p0  ;;  %p627_p6 = por %p135_p4, %p134_p3 }
   0xa   : > { %p438_p7 = scmp.ge.s32.totalorder %s555_s18, 1  ;;  %p177_p8 = scmp.lt.s32.totalorder %s555_s18, 5 }
   0xc   : > { %p178_p9 = pnand %p438_p7, %p177_p8 }
   0xd   : > { %s440_s27 = sshll.u32 (!%p178_p9), %s606_s19, 4  ;;  %v637_v0 = vld [vmem:[%s795_s1] ss:$0 sm:$0xff] (!%p178_p9)  ;;  %s205_s11 = sand.u32 (!%p178_p9), 1, %s547_s16  }
   0xe   : > { %181 = sbr.rel (%p178_p9) target bundleno = 61 (0x3d), region = 36  ;;  %p209_p10 = scmp.lt.s32.totalorder (!%p178_p9), %s440_s27, 63  ;;  %v654_v2 = vld [vmem:[%s796_s2] ss:$0 sm:$0xff] (!%p178_p9) }
   0xf   : > { %s667_s14 = sshll.u32 (!%p178_p9), %s205_s11, 7  ;;  %s451_s22 = sshll.u32 (!%p178_p9), %s606_s19, 11 }
  0x10   : > { %s697_s20 = scalar_lea.vmem (!%p178_p9), [#allocation2], %s667_s14  ;;  %s744_s29 = scalar_lea.hbm (!%p178_p9), %s798_s4, %s451_s22 }
  0x11   : > { %s361_s23 = sshll.u32 (!%p178_p9), %s697_s20, 4  ;;  %s753_s19 = scalar_lea.sflag (!%p178_p9), [#allocation3], %s205_s11  ;;  %s746_s23 = int_to_ptr.vmem [resolvable:$true] %s361_s23 }
  0x12   : > { %s493_s30 = scalar_lea.vmem (!%p178_p9), %s746_s23, 2048  ;;  %s557_s5 = smov (!%p178_p9), [#allocation2]  }
  0x13   : > { %p494_p11 = scmp.ne.s32.totalorder (!%p178_p9), %s746_s23, %s493_s30  ;;  %s497_s6 = sshll.u32 (!%p178_p9), %s557_s5, 4  ;;  %s498_s6 = int_to_ptr.vmem [resolvable:$false] %s497_s6 }
  0x14   : > { %p500_p0 = scmp.lt.s32.totalorder (!%p178_p9), %s746_s23, %s498_s6 }
  0x15   : > { %s806_s27 = smov (!%p209_p10, %s440_s27), 63  ;;  %p495_p12 = pnand %p494_p11, %p623_p5 }
  0x16   : > { %s441_s28 = sshll.u32 %s806_s27, 3 }
  0x17   : > { %s642_s7 = scalar_lea.vmem %s794_s0, %s441_s28  ;;  %s647_s10 = scalar_lea.vmem %s797_s3, %s441_s28 }
  0x18   : > { %v221_v1 = vld [vmem:[%s642_s7] sm:$0xff]  ;;  %v222_v3 = vld [vmem:[%s642_s7 + $0x8] sm:$0xff]  ;;  %v223_v7 = vld [vmem:[%s642_s7 + $0x10] sm:$0xff]  ;;  %p496_p13 = pneg %p495_p12 }
  0x19   : > { %v244_v4 = vmul.f32 %v637_v0, %v221_v1  ;;  %v283_v5 = vld [vmem:[%s647_s10] sm:$0xff]  ;;  %v245_v6 = vmul.f32 %v637_v0, %v222_v3  ;;  %v284_v8 = vld [vmem:[%s647_s10 + $0x8] sm:$0xff]  ;;  %v246_v9 = vmul.f32 %v637_v0, %v223_v7  ;;  %v224_v10 = vld [vmem:[%s642_s7 + $0x18] sm:$0xff] }
  0x1a   : > { %v225_v11 = vld [vmem:[%s642_s7 + $0x20] sm:$0xff]  ;;  %v285_v14 = vld [vmem:[%s647_s10 + $0x10] sm:$0xff]  ;;  %v247_v15 = vmul.f32 %v637_v0, %v224_v10  ;;  %v286_v16 = vld [vmem:[%s647_s10 + $0x18] sm:$0xff] }
  0x1b   : > { %v267_v12 = vadd.f32 %v654_v2, %v244_v4  ;;  %v268_v13 = vadd.f32 %v654_v2, %v245_v6  ;;  %v248_v17 = vmul.f32 %v637_v0, %v225_v11  ;;  %v226_v18 = vld [vmem:[%s642_s7 + $0x28] sm:$0xff]  ;;  %v269_v19 = vadd.f32 %v654_v2, %v246_v9  ;;  %v287_v20 = vld [vmem:[%s647_s10 + $0x20] sm:$0xff]  ;;  %v227_v22 = vld [vmem:[%s642_s7 + $0x30] sm:$0xff] }
  0x1c   : > { %v249_v21 = vmul.f32 %v637_v0, %v226_v18  ;;  %v228_v23 = vld [vmem:[%s642_s7 + $0x38] sm:$0xff]  ;;  %v270_v26 = vadd.f32 %v654_v2, %v247_v15  ;;  %v288_v28 = vld [vmem:[%s647_s10 + $0x28] sm:$0xff]  ;;  %v250_v31 = vmul.f32 %v637_v0, %v227_v22  ;;  %v229_v33 = vld [vmem:[%s642_s7 + $0x40] sm:$0xff] }
  0x1d   : > { %v299_v24 = vadd.f32 %v283_v5, %v267_v12  ;;  %v300_v25 = vadd.f32 %v284_v8, %v268_v13  ;;  %v271_v27 = vadd.f32 %v654_v2, %v248_v17  ;;  %v301_v29 = vadd.f32 %v285_v14, %v269_v19  ;;  %v230_v34 = vld [vmem:[%s642_s7 + $0x48] sm:$0xff]  ;;  %v289_v39 = vld [vmem:[%s647_s10 + $0x30] sm:$0xff]  ;;  %v290_v40 = vld [vmem:[%s647_s10 + $0x38] sm:$0xff] }
  0x1e   : > { %v272_v30 = vadd.f32 %v654_v2, %v249_v21  ;;  %v251_v32 = vmul.f32 %v637_v0, %v228_v23  ;;  %v302_v37 = vadd.f32 %v286_v16, %v270_v26  ;;  %v231_v41 = vld [vmem:[%s642_s7 + $0x50] sm:$0xff]  ;;  %v273_v44 = vadd.f32 %v654_v2, %v250_v31  ;;  %v232_v46 = vld [vmem:[%s642_s7 + $0x58] sm:$0xff]  ;;  %v233_v47 = vld [vmem:[%s642_s7 + $0x60] sm:$0xff] }
  0x1f   : > { %v315_v35 = vmax.f32 %v299_v24, 0.0  ;;  %v316_v36 = vmax.f32 %v300_v25, 0.0  ;;  %v303_v38 = vadd.f32 %v287_v20, %v271_v27  ;;  %v317_v42 = vmax.f32 %v301_v29, 0.0  ;;  %v234_v52 = vld [vmem:[%s642_s7 + $0x68] sm:$0xff]  ;;  %v291_v56 = vld [vmem:[%s647_s10 + $0x40] sm:$0xff]  ;;  %v293_v61 = vld [vmem:[%s647_s10 + $0x50] sm:$0xff] }
  0x20   : > { %v304_v43 = vadd.f32 %v288_v28, %v272_v30  ;;  %v274_v45 = vadd.f32 %v654_v2, %v251_v32  ;;  %v318_v48 = vmax.f32 %v302_v37, 0.0  ;;  %v252_v50 = vmul.f32 %v637_v0, %v229_v33  ;;  %v292_v57 = vld [vmem:[%s647_s10 + $0x48] sm:$0xff]  ;;  %v235_v1 = vld [vmem:[%s642_s7 + $0x70] sm:$0xff]  ;;  %v236_v3 = vld [vmem:[%s642_s7 + $0x78] sm:$0xff]  ;;  %s499_s7 = scalar_lea.vmem %s498_s6, 4096 }
  0x21   : > { %331 = vst [vmem:[%s697_s20] sm:$0xff] %v315_v35  ;;  %332 = vst [vmem:[%s697_s20 + $0x8] sm:$0xff] %v316_v36  ;;  %v319_v49 = vmax.f32 %v303_v38, 0.0  ;;  %v253_v51 = vmul.f32 %v637_v0, %v230_v34  ;;  %v305_v54 = vadd.f32 %v289_v39, %v273_v44  ;;  %v254_v58 = vmul.f32 %v637_v0, %v231_v41  ;;  %v294_v7 = vld [vmem:[%s647_s10 + $0x58] sm:$0xff]  ;;  %v295_v8 = vld [vmem:[%s647_s10 + $0x60] sm:$0xff]  ;;  %p501_p1 = scmp.lt.s32.totalorder %s499_s7, %s493_s30 }
  0x22   : > { %333 = vst [vmem:[%s697_s20 + $0x10] sm:$0xff] %v317_v42  ;;  %v320_v53 = vmax.f32 %v304_v43, 0.0  ;;  %v306_v55 = vadd.f32 %v290_v40, %v274_v45  ;;  %334 = vst [vmem:[%s697_s20 + $0x18] sm:$0xff] %v318_v48  ;;  %v275_v59 = vadd.f32 %v654_v2, %v252_v50  ;;  %v255_v62 = vmul.f32 %v637_v0, %v232_v46  ;;  %v296_v14 = vld [vmem:[%s647_s10 + $0x68] sm:$0xff]  ;;  %v297_v23 = vld [vmem:[%s647_s10 + $0x70] sm:$0xff] }
  0x23   : > { %335 = vst [vmem:[%s697_s20 + $0x20] sm:$0xff] %v319_v49  ;;  %v276_v60 = vadd.f32 %v654_v2, %v253_v51  ;;  %v256_v63 = vmul.f32 %v637_v0, %v233_v47  ;;  %v321_v4 = vmax.f32 %v305_v54, 0.0  ;;  %v277_v6 = vadd.f32 %v654_v2, %v254_v58  ;;  %v298_v24 = vld [vmem:[%s647_s10 + $0x78] sm:$0xff]  ;;  %p502_p2 = por %p501_p1, %p500_p0 }
  0x24   : > { %336 = vst [vmem:[%s697_s20 + $0x28] sm:$0xff] %v320_v53  ;;  %v322_v5 = vmax.f32 %v306_v55, 0.0  ;;  %v257_v9 = vmul.f32 %v637_v0, %v234_v52  ;;  %v307_v10 = vadd.f32 %v291_v56, %v275_v59  ;;  %v278_v12 = vadd.f32 %v654_v2, %v255_v62 }
  0x25   : > { %v308_v11 = vadd.f32 %v292_v57, %v276_v60  ;;  %v279_v13 = vadd.f32 %v654_v2, %v256_v63  ;;  %337 = vst [vmem:[%s697_s20 + $0x30] sm:$0xff] %v321_v4  ;;  %v309_v15 = vadd.f32 %v293_v61, %v277_v6  ;;  %v258_v17 = vmul.f32 %v637_v0, %v235_v1  ;;  %p503_p3 = pnand %p502_p2, %p496_p13 }
  0x26   : > { %338 = vst [vmem:[%s697_s20 + $0x38] sm:$0xff] %v322_v5  ;;  %v280_v16 = vadd.f32 %v654_v2, %v257_v9  ;;  %v259_v18 = vmul.f32 %v637_v0, %v236_v3  ;;  %v323_v19 = vmax.f32 %v307_v10, 0.0  ;;  %v310_v21 = vadd.f32 %v294_v7, %v278_v12 }
  0x27   : > { %v324_v20 = vmax.f32 %v308_v11, 0.0  ;;  %v311_v22 = vadd.f32 %v295_v8, %v279_v13  ;;  %v325_v25 = vmax.f32 %v309_v15, 0.0  ;;  %v281_v27 = vadd.f32 %v654_v2, %v258_v17 }
  0x28   : > { %v312_v26 = vadd.f32 %v296_v14, %v280_v16  ;;  %v282_v28 = vadd.f32 %v654_v2, %v259_v18  ;;  %339 = vst [vmem:[%s697_s20 + $0x40] sm:$0xff] %v323_v19  ;;  %v326_v0 = vmax.f32 %v310_v21, 0.0 }
  0x29   : > { %340 = vst [vmem:[%s697_s20 + $0x48] sm:$0xff] %v324_v20  ;;  %v327_v29 = vmax.f32 %v311_v22, 0.0  ;;  %341 = vst [vmem:[%s697_s20 + $0x50] sm:$0xff] %v325_v25  ;;  %v313_v31 = vadd.f32 %v297_v23, %v281_v27 }
  0x2a   : > { %v328_v30 = vmax.f32 %v312_v26, 0.0  ;;  %v314_v32 = vadd.f32 %v298_v24, %v282_v28  ;;  %342 = vst [vmem:[%s697_s20 + $0x58] sm:$0xff] %v326_v0 }
  0x2b   : > { %343 = vst [vmem:[%s697_s20 + $0x60] sm:$0xff] %v327_v29  ;;  %v329_v2 = vmax.f32 %v313_v31, 0.0 }
  0x2c   : > { %344 = vst [vmem:[%s697_s20 + $0x68] sm:$0xff] %v328_v30  ;;  %v330_v33 = vmax.f32 %v314_v32, 0.0 }
  0x2d   : > { %345 = vst [vmem:[%s697_s20 + $0x70] sm:$0xff] %v329_v2 }
  0x2e   : > { %346 = vst [vmem:[%s697_s20 + $0x78] sm:$0xff] %v330_v33 }
  0x2f   : > { %506 = shalt.err (!%p503_p3)
}
  0x30   : > { %s507_s8 = scalar_lea.hbm %s744_s29, 2048  ;;  %s511_s11 = scalar_lea.hbm %s798_s4, 8192 }
  0x31   : > { %p508_p4 = scmp.ne.s32.totalorder %s744_s29, %s507_s8  ;;  %p512_p9 = scmp.lt.u32.totalorder %s744_s29, %s798_s4 }
  0x32   : > { %p513_p10 = scmp.lt.u32.totalorder %s511_s11, %s507_s8  ;;  %p515_p12 = scmp.lt.u32.totalorder %s507_s8, %s744_s29 }
  0x33   : > { %p509_p7 = pnand %p508_p4, %p623_p5 }
  0x34   : > { %p514_p11 = por %p513_p10, %p512_p9 }
  0x35   : > { %p510_p8 = pneg %p509_p7 }
  0x36   : > { %p516_p13 = por %p515_p12, %p514_p11 }
  0x38   : > { %p517_p0 = pnand %p516_p13, %p510_p8 }
  0x3a   : > { %520 = shalt.err (!%p517_p0)
}
  0x3b   : > { %s558_s14 = smov 128   ;;  %s559_s20 = smov 8  }
  0x3c   : > { %452 = dma.vmem_to_hbm [thread:$0]  (%p623_p5), %s746_s23, 2048, %s744_s29, %s753_s19, %s558_s14, %s558_s14, %s559_s20  }
  0x3d PF: > { %p458_p1 = scmp.ge.s32.totalorder %s555_s18, 2  ;;  %s376_s22 = sand.u32 1, %s543_s15  }
  0x3e   : > { %s377_s27 = scalar_lea.sflag [#allocation3], %s376_s22 }
  0x3f   : > { %p455_p2 = pnand %p458_p1, %p627_p6 }
  0x41   : > { %538 = dma.done.wait (!%p455_p2), %s377_s27, 2048  }
  0x42   : > { %540 = vsyncadd (!%p455_p2), %s377_s27, 4294965248  ;;  %p14_p3 = scmp.ge.s32.totalorder %s610_s21, 6   ;;  %s801_s15 = smov %s547_s16 }
  0x43   : > { %s802_s16 = smov %s551_s17  ;;  %s803_s17 = smov %s621_s24 }
  0x44   : > { %s804_s18 = smov %s610_s21  ;;  %16 = sbr.rel (!%p14_p3) target bundleno = 3 (0x3), region = 74 }
  0x4b   :  { %382 = vsyncpa [#allocation3], 1 }
  0x4c   :  { %384 = vsyncpa [#allocation3 + $0x1], 1 }

// kernel: bottleneck_forward.7
= control target key start
LH: loop header
LB: loop body
LE: loop exit
PB: predicated region body
PF: predicated region fallthrough
CT: control target
= control target key end

     0   :  { %s7017_s15 = smov 0   ;;  %s8853_s0 = inlined_call_operand.vmem [shape: bf16[2,18,18,128], index: 0, kind: input, shape index: {}]   ;;  %s8854_s1 = inlined_call_operand.vmem [shape: bf16[9,128,128], index: 1, kind: input, shape index: {}]   ;;  %s8855_s2 = inlined_call_operand.vmem [shape: f32[2,16,16,128], index: 2, kind: output, shape index: {0}]   ;;  %s8856_s3 = inlined_call_operand.vmem [shape: f32[2,1,128], index: 3, kind: output, shape index: {1}]   ;;  %s8857_s4 = inlined_call_operand.vmem [shape: f32[2,1,128], index: 4, kind: output, shape index: {2}]  }
   0x1 LB: > { %s5270_s16 = sadd.s32 4294967295, %s6990_s15   ;;  %p5274_p0 = scmp.ge.s32.totalorder %s6990_s15, 1  ;;  %s6990_s15 = sphi %s7017_s15, %s15_s15  }
   0x2   : > { %p167_p1 = scmp.lt.s32.totalorder %s6990_s15, 3 }
   0x4   : > { %p168_p2 = pnand %p5274_p0, %p167_p1 }
   0x6   : > { %171 = sbr.rel (%p168_p2) target bundleno = 603 (0x25b), region = 28 }
   0xd   : > { %v6794_v0 = vld [vmem:[%s8854_s1 + $0x40] sm:$0xff]   ;;  %p199_p3 = scmp.lt.s32.totalorder %s5270_s16, 1  ;;  %v6796_v2 = vld [vmem:[%s8854_s1 + $0x48] sm:$0xff]   ;;  %v6798_v4 = vld [vmem:[%s8854_s1 + $0x50] sm:$0xff]   ;;  %vm280_vm0 = vsmask.f32 3328 }
   0xe   : > { %v6795_v1 = vld [vmem:[%s8854_s1 + $0x100] sm:$0xff]   ;;  %6081 = vmatprep.subr.bf16.mxu1 %v6794_v0  ;;  %v6797_v3 = vld [vmem:[%s8854_s1 + $0x108] sm:$0xff]   ;;  %v6799_v5 = vld [vmem:[%s8854_s1 + $0x110] sm:$0xff]   ;;  %vm281_vm1 = vsmask.f32 7440  ;;  %vm1310_vm3 = vcmask 1042432  }
   0xf   : > { %6273 = vmatprep.subr.bf16.mxu0 %v6795_v1  ;;  %6082 = vmatpush3.bf16.msra.mxu1 %v6794_v0  ;;  %s8925_s16 = smov (!%p199_p3, %s5270_s16), 1  ;;  %v6800_v6 = vld [vmem:[%s8854_s1 + $0x58] sm:$0xff]   ;;  %v6802_v8 = vld [vmem:[%s8854_s1 + $0x60] sm:$0xff]   ;;  %v6804_v10 = vld [vmem:[%s8854_s1 + $0x68] sm:$0xff]   ;;  %vm1311_vm4 = vcmask 1046532  }
  0x10   : > { %6274 = vmatpush3.bf16.msra.mxu0 %v6795_v1  ;;  %6083 = vmatprep.subr.bf16.mxu1 %v6796_v2  ;;  %v6801_v7 = vld [vmem:[%s8854_s1 + $0x118] sm:$0xff]   ;;  %s6785_s7 = smul.u32 216, %s8925_s16  ;;  %v6803_v9 = vld [vmem:[%s8854_s1 + $0x120] sm:$0xff]   ;;  %v6805_v11 = vld [vmem:[%s8854_s1 + $0x128] sm:$0xff]   ;;  %s211_s24 = scalar_lea.vmem %s8856_s3, %s8925_s16 }
  0x11   : > { %6275 = vmatprep.subr.bf16.mxu0 %v6797_v3  ;;  %v6806_v25 = vld [vmem:[%s8854_s1 + $0x70] sm:$0xff]   ;;  %v6808_v36 = vld [vmem:[%s8854_s1 + $0x78] sm:$0xff]   ;;  %vm7093_vm2 = vmor %vm280_vm0, %vm281_vm1  ;;  %s214_s27 = scalar_lea.vmem %s8857_s4, %s8925_s16 }
  0x12   : > { %s7061_s14 = scalar_lea.vmem %s8853_s0, %s6785_s7  ;;  %v6807_v30 = vld [vmem:[%s8854_s1 + $0x130] sm:$0xff]   ;;  %v6809_v51 = vld [vmem:[%s8854_s1 + $0x138] sm:$0xff]   ;;  %vm7339_vm5 = vmor %vm1310_vm3, %vm1311_vm4 }
  0x13   : > { %6084 = vmatpush3.bf16.msra.mxu1 %v6796_v2  ;;  %v216_v12 = vld [vmem:[%s7061_s14] sm:$0xf]  ;;  %v217_v13 = vld [vmem:[%s7061_s14 + $0x4] sm:$0xf]  ;;  %v264_v14 = vld [vmem:[%s7061_s14 + $0x8] sm:$0x1] }
  0x14   : > { %6276 = vmatpush3.bf16.msra.mxu0 %v6797_v3  ;;  %6085 = vmatprep.subr.bf16.mxu1 %v6798_v4  ;;  %v284_v15 = vshrl.u32 %v216_v12, 16  ;;  %v287_v16 = vshll.u32 %v216_v12, 16  ;;  %v293_v17 = vshll.u32 %v217_v13, 16  ;;  %v297_v18 = vshrl.u32 %v217_v13, 16  ;;  %v5470_v20 = vld [vmem:[%s7061_s14 + $0xc] sm:$0xf] }
  0x15   : > { %6277 = vmatprep.subr.bf16.mxu0 %v6799_v5  ;;  %v303_v19 = vshll.u32 %v264_v14, 16  ;;  %v7074_v23 = vld [vmem:[%s7061_s14 + $0x10] sm:$0xf]  ;;  %v7077_v24 = vld [vmem:[%s7061_s14 + $0x14] sm:$0x1]  ;;  %v2183_v29 = vshrl.u32 %v5470_v20, 16 }
  0x16   : > { %v286_v21 = vrot.slane %v284_v15, 4  ;;  %v289_v22 = vrot.slane %v287_v16, 5  ;;  %v295_v26 = vrot.slane %v293_v17, 5  ;;  %v299_v27 = vrot.slane %v297_v18, 4  ;;  %v218_v35 = vld [vmem:[%s7061_s14 + $0xc] sm:$0xf] }
  0x17   : > { %6086 = vmatpush3.bf16.msra.mxu1 %v6798_v4  ;;  %v305_v28 = vrot.slane %v303_v19, 5  ;;  %v2186_v32 = vshll.u32 %v5470_v20, 16  ;;  %v2192_v33 = vshll.u32 %v7074_v23, 16  ;;  %v2196_v34 = vshrl.u32 %v7074_v23, 16  ;;  %v219_v42 = vld [vmem:[%s7061_s14 + $0x10] sm:$0xf] }
  0x18   : > { %6278 = vmatpush3.bf16.msra.mxu0 %v6799_v5  ;;  %6087 = vmatprep.subr.bf16.mxu1 %v6800_v6  ;;  %v290_v31 = vor.u32 %v289_v22, %v286_v21  ;;  %v300_v38 = vor.u32 %v299_v27, %v295_v26  ;;  %v2185_v39 = vrot.slane %v2183_v29, 4  ;;  %v2202_v40 = vshll.u32 %v7077_v24, 16  ;;  %v265_v55 = vld [vmem:[%s7061_s14 + $0x14] sm:$0x1]  ;;  %v5473_v57 = vld [vmem:[%s7061_s14 + $0x18] sm:$0xf] }
  0x19   : > { %6279 = vmatprep.subr.bf16.mxu0 %v6801_v7  ;;  %v2957_v41 = vrot.slane %v7077_v24, 5  ;;  %v2188_v44 = vrot.slane %v2186_v32, 5  ;;  %v2194_v45 = vrot.slane %v2192_v33, 5  ;;  %v2198_v46 = vrot.slane %v2196_v34, 4  ;;  %v7110_v62 = vld [vmem:[%s7061_s14 + $0x1c] sm:$0xf] }
  0x1a   : > { %v291_v43 = vrot.slane %v290_v31, 4  ;;  %v301_v47 = vrot.slane %v300_v38, 4  ;;  %v2204_v48 = vrot.slane %v2202_v40, 5  ;;  %v308_v49 = vshrl.u32 %v218_v35, 16  ;;  %v6810_v3 = vld [vmem:[%s8854_s1] sm:$0xff]  }
  0x1b   : > { %6088 = vmatpush3.bf16.msra.mxu1 %v6800_v6  ;;  %v311_v50 = vshll.u32 %v218_v35, 16  ;;  %v2189_v53 = vor.u32 %v2188_v44, %v2185_v39  ;;  %v2199_v54 = vor.u32 %v2198_v46, %v2194_v45  ;;  %v317_v56 = vshll.u32 %v219_v42, 16  ;;  %v7118_v4 = vld [vmem:[%s8854_s1 + $0x140] sm:$0xff]   ;;  %v220_v21 = vld [vmem:[%s7061_s14 + $0x18] sm:$0xf]  ;;  %v6813_v46 = vld [vmem:[%s8854_s1 + $0x8] sm:$0xff]  }
  0x1c   : > { %6280 = vmatpush3.bf16.msra.mxu0 %v6801_v7  ;;  %6089 = vmatprep.subr.bf16.mxu1 %v6802_v8  ;;  %v296_v52 = vsel %vm7093_vm2, %v291_v43, %v295_v26  ;;  %v306_v58 = vsel %vm7093_vm2, %v301_v47, %v305_v28  ;;  %v310_v59 = vrot.slane %v308_v49, 4  ;;  %v321_v61 = vshrl.u32 %v219_v42, 16  ;;  %v221_v28 = vld [vmem:[%s7061_s14 + $0x1c] sm:$0xf]  ;;  %v266_v33 = vld [vmem:[%s7061_s14 + $0x20] sm:$0x1] }
  0x1d   : > { %6281 = vmatprep.subr.bf16.mxu0 %v6803_v9  ;;  %v313_v60 = vrot.slane %v311_v50, 5  ;;  %v5294_v63 = vcombine.low %v296_v52, %v306_v58  ;;  %v2190_v0 = vrot.slane %v2189_v53, 4  ;;  %v2200_v1 = vrot.slane %v2199_v54, 4  ;;  %v5476_v39 = vld [vmem:[%s7061_s14 + $0x24] sm:$0xf] }
  0x1e   : > { %v319_v2 = vrot.slane %v317_v56, 5  ;;  %v323_v6 = vrot.slane %v321_v61, 4  ;;  %v327_v7 = vshll.u32 %v265_v55, 16  ;;  %v2210_v12 = vshll.u32 %v5473_v57, 16  ;;  %v222_v52 = vld [vmem:[%s7061_s14 + $0x24] sm:$0xf] }
  0x1f   : > { %6090 = vmatpush3.bf16.msra.mxu1 %v6802_v8  ;;  %v314_v5 = vor.u32 %v313_v60, %v310_v59  ;;  %v7121_v8 = vld [vmem:[%s7061_s14 + $0x20] sm:$0x1]  ;;  %6097 = vmatprep.mubr.bf16.mxu1 %v5294_v63  ;;  %v2216_v19 = vshll.u32 %v7110_v62, 16  ;;  %v2220_v20 = vshrl.u32 %v7110_v62, 16  ;;  %v2961_v27 = vrot.slane %v7110_v62, 5  ;;  %v6812_v63 = vld [vmem:[%s8854_s1 + $0x148] sm:$0xff]  }
  0x20   : > { %6282 = vmatpush3.bf16.msra.mxu0 %v6803_v9  ;;  %6091 = vmatprep.subr.bf16.mxu1 %v6804_v10  ;;  %v2195_v9 = vsel %vm7093_vm2, %v2190_v0, %v2194_v45  ;;  %v324_v15 = vor.u32 %v323_v6, %v319_v2  ;;  %v329_v16 = vrot.slane %v327_v7, 5  ;;  %v2212_v18 = vrot.slane %v2210_v12, 5  ;;  %v7146_v45 = vld [vmem:[%s7061_s14 + $0x28] sm:$0xf] }
  0x21   : > { %6283 = vmatprep.subr.bf16.mxu0 %v6805_v11  ;;  %v315_v14 = vrot.slane %v314_v5, 4  ;;  %v2226_v26 = vshll.u32 %v7121_v8, 16  ;;  %v2222_v31 = vrot.slane %v2220_v20, 4  ;;  %v2964_v32 = vrot.slane %v7121_v8, 5  ;;  %v223_v5 = vld [vmem:[%s7061_s14 + $0x28] sm:$0xf] }
  0x22   : > { %v332_v38 = vshrl.u32 %v220_v21, 16  ;;  %v335_v44 = vshll.u32 %v220_v21, 16  ;;  %v345_v49 = vshrl.u32 %v221_v28, 16  ;;  %v351_v50 = vshll.u32 %v266_v33, 16  ;;  %v7177_v33 = vld [vmem:[%s7061_s14 + $0x34] sm:$0xf] }
  0x23   : > { %6092 = vmatpush3.bf16.msra.mxu1 %v6804_v10  ;;  %v2205_v10 = vsel %vm7093_vm2, %v2200_v1, %v2204_v48  ;;  %v320_v22 = vsel %vm7093_vm2, %v315_v14, %v319_v2  ;;  %v2228_v35 = vrot.slane %v2226_v26, 5  ;;  %v341_v48 = vshll.u32 %v221_v28, 16 }
  0x24   : > { %6284 = vmatpush3.bf16.msra.mxu0 %v6805_v11  ;;  %6093 = vmatprep.subr.bf16.mxu1 %v6806_v25  ;;  %v2207_v11 = vshrl.u32 %v5473_v57, 16  ;;  %v5534_v13 = vcombine.low %v2195_v9, %v2205_v10  ;;  %v334_v47 = vrot.slane %v332_v38, 4  ;;  %v337_v55 = vrot.slane %v335_v44, 5 }
  0x25   : > { %6285 = vmatprep.subr.bf16.mxu0 %v6807_v30  ;;  %v2231_v56 = vshrl.u32 %v5476_v39, 16  ;;  %v343_v57 = vrot.slane %v341_v48, 5  ;;  %v347_v58 = vrot.slane %v345_v49, 4  ;;  %v353_v59 = vrot.slane %v351_v50, 5  ;;  %v6815_v48 = vld [vmem:[%s8854_s1 + $0x158] sm:$0xff]  }
  0x26   : > { %v2209_v17 = vrot.slane %v2207_v11, 4  ;;  %6289 = vmatprep.mubr.bf16.mxu0 %v5534_v13  ;;  %v2234_v60 = vshll.u32 %v5476_v39, 16  ;;  %v338_v0 = vor.u32 %v337_v55, %v334_v47  ;;  %v2240_v2 = vshll.u32 %v7146_v45, 16  ;;  %v267_v11 = vld [vmem:[%s7061_s14 + $0x2c] sm:$0x1] }
  0x27   : > { %6094 = vmatpush3.bf16.msra.mxu1 %v6806_v25  ;;  %v325_v25 = vrot.slane %v324_v15, 4  ;;  %v2233_v1 = vrot.slane %v2231_v56, 4  ;;  %v348_v7 = vor.u32 %v347_v58, %v343_v57  ;;  %v2244_v10 = vshrl.u32 %v7146_v45, 16 }
  0x28   : > { %6286 = vmatpush3.bf16.msra.mxu0 %v6807_v30  ;;  %6095 = vmatprep.subr.bf16.mxu1 %v6808_v36  ;;  %v2213_v29 = vor.u32 %v2212_v18, %v2209_v17  ;;  %v2218_v30 = vrot.slane %v2216_v19, 5  ;;  %v2236_v9 = vrot.slane %v2234_v60, 5  ;;  %v339_v12 = vrot.slane %v338_v0, 4  ;;  %v6822_v60 = vld [vmem:[%s8854_s1 + $0x20] sm:$0xff]  }
  0x29   : > { %6287 = vmatprep.subr.bf16.mxu0 %v6809_v51  ;;  %v330_v34 = vsel %vm7093_vm2, %v325_v25, %v329_v16  ;;  %v2242_v13 = vrot.slane %v2240_v2, 5  ;;  %v356_v15 = vshrl.u32 %v222_v52, 16  ;;  %v5479_v16 = vld [vmem:[%s7061_s14 + $0x30] sm:$0xf]  ;;  %v349_v17 = vrot.slane %v348_v7, 4 }
  0x2a   : > { %v5295_v40 = vcombine.low %v320_v22, %v330_v34  ;;  %v2214_v42 = vrot.slane %v2213_v29, 4  ;;  %v2223_v43 = vor.u32 %v2222_v31, %v2218_v30  ;;  %v2237_v18 = vor.u32 %v2236_v9, %v2233_v1  ;;  %v6819_v34 = vld [vmem:[%s8854_s1 + $0x18] sm:$0xff]  }
  0x2b   : > { %6096 = vmatpush3.bf16.msra.mxu1 %v6808_v36  ;;  %v7142_v36 = vrot.slane %v2961_v27, 4  ;;  %v2246_v19 = vrot.slane %v2244_v10, 4  ;;  %v359_v20 = vshll.u32 %v222_v52, 16  ;;  %v344_v21 = vsel %vm7093_vm2, %v339_v12, %v343_v57  ;;  %v268_v2 = vld [vmem:[%s7061_s14 + $0x38] sm:$0x1] }
  0x2c   : > { %6288 = vmatpush3.bf16.msra.mxu0 %v6809_v51  ;;  %6129 = vmatprep.subr.bf16.mxu1 %v6810_v3  ;;  %v7152_v51 = vld [vmem:[%s7061_s14 + $0x2c] sm:$0x1]  ;;  %v2219_v53 = vsel %vm7093_vm2, %v2214_v42, %v2218_v30  ;;  %v2224_v54 = vrot.slane %v2223_v43, 4  ;;  %v358_v25 = vrot.slane %v356_v15, 4  ;;  %v365_v26 = vshll.u32 %v223_v5, 16 }
  0x2d   : > { %6321 = vmatprep.subr.bf16.mxu0 %v7118_v4  ;;  %v2250_v14 = vshll.u32 %v7152_v51, 16  ;;  %v354_v28 = vsel %vm7093_vm2, %v349_v17, %v353_v59  ;;  %v2238_v29 = vrot.slane %v2237_v18, 4  ;;  %v2247_v30 = vor.u32 %v2246_v19, %v2242_v13  ;;  %v225_v59 = vld [vmem:[%s7061_s14 + $0x34] sm:$0xf]  ;;  %v5482_v9 = vld [vmem:[%s7061_s14 + $0x3c] sm:$0xf] }
  0x2e   : > { %6098 = vmatmul.mubr.bf16.vlgmr.msra.gmra.mrb[0].mxu1 %v5295_v40  ;;  %v2229_v61 = vsel %vm7093_vm2, %v2224_v54, %v2228_v35  ;;  %v361_v31 = vrot.slane %v359_v20, 5  ;;  %v5296_v35 = vcombine.low %v344_v21, %v354_v28  ;;  %v367_v38 = vrot.slane %v365_v26, 5  ;;  %v224_v54 = vld [vmem:[%s7061_s14 + $0x30] sm:$0xf]  ;;  %v7211_v19 = vld [vmem:[%s7061_s14 + $0x40] sm:$0xf] }
  0x2f   : > { %6130 = vmatpush3.bf16.msra.mxu1 %v6810_v3  ;;  %v6816_v3 = vld [vmem:[%s8854_s1 + $0x10] sm:$0xff]   ;;  %v5535_v6 = vcombine.low %v2219_v53, %v2229_v61  ;;  %v2252_v22 = vrot.slane %v2250_v14, 5  ;;  %v369_v39 = vshrl.u32 %v223_v5, 16  ;;  %v375_v40 = vshll.u32 %v267_v11, 16  ;;  %v6824_v14 = vld [vmem:[%s8854_s1 + $0x28] sm:$0xff]   ;;  %v6817_v20 = vld [vmem:[%s8854_s1 + $0x160] sm:$0xff]  }
  0x30   : > { %6131 = vmatprep.subr.bf16.mxu1 %v6813_v46  ;;  %v2243_v42 = vsel %vm7093_vm2, %v2238_v29, %v2242_v13  ;;  %v2248_v43 = vrot.slane %v2247_v30, 4  ;;  %v362_v44 = vor.u32 %v361_v31, %v358_v25  ;;  %v2255_v47 = vshrl.u32 %v5479_v16, 16  ;;  %6101 = vmatprep.mubr.bf16.mxu1 %v5296_v35  ;;  %v7219_v28 = vld [vmem:[%s7061_s14 + $0x44] sm:$0x1]  ;;  %v6826_v35 = vld [vmem:[%s8854_s1 + $0x30] sm:$0xff]  }
  0x31   : > { %6290 = vmatmul.mubr.bf16.vlgmr.msra.gmra.mrb[0].mxu0 %v5535_v6  ;;  %v371_v49 = vrot.slane %v369_v39, 4  ;;  %v377_v50 = vrot.slane %v375_v40, 5  ;;  %v2258_v52 = vshll.u32 %v5479_v16, 16  ;;  %v2264_v53 = vshll.u32 %v7177_v33, 16 }
  0x32   : > { %6322 = vmatpush3.bf16.msra.mxu0 %v7118_v4  ;;  %v6814_v4 = vld [vmem:[%s8854_s1 + $0x150] sm:$0xff]   ;;  %v2253_v55 = vsel %vm7093_vm2, %v2248_v43, %v2252_v22  ;;  %v363_v56 = vrot.slane %v362_v44, 4  ;;  %v2257_v57 = vrot.slane %v2255_v47, 4  ;;  %v2268_v58 = vshrl.u32 %v7177_v33, 16 }
  0x33   : > { %6132 = vmatpush3.bf16.msra.mxu1 %v6813_v46  ;;  %6323 = vmatprep.subr.bf16.mxu0 %v6812_v63  ;;  %v7188_v46 = vld [vmem:[%s7061_s14 + $0x38] sm:$0x1]  ;;  %v5536_v61 = vcombine.low %v2243_v42, %v2253_v55  ;;  %v2260_v0 = vrot.slane %v2258_v52, 5  ;;  %v2266_v1 = vrot.slane %v2264_v53, 5  ;;  %v380_v7 = vshrl.u32 %v224_v54, 16 }
  0x34   : > { %6133 = vmatprep.subr.bf16.mxu1 %v6816_v3  ;;  %v368_v5 = vsel %vm7093_vm2, %v363_v56, %v367_v38  ;;  %v2274_v6 = vshll.u32 %v7188_v46, 16  ;;  %v383_v12 = vshll.u32 %v224_v54, 16  ;;  %v389_v13 = vshll.u32 %v225_v59, 16  ;;  %v227_v55 = vld [vmem:[%s7061_s14 + $0x40] sm:$0xf] }
  0x35   : > { %6293 = vmatprep.mubr.bf16.mxu0 %v5536_v61  ;;  %v2261_v11 = vor.u32 %v2260_v0, %v2257_v57  ;;  %v382_v17 = vrot.slane %v380_v7, 4  ;;  %v393_v18 = vshrl.u32 %v225_v59, 16  ;;  %v2279_v40 = vshrl.u32 %v5482_v9, 16 }
  0x36   : > { %6324 = vmatpush3.bf16.msra.mxu0 %v6812_v63  ;;  %v372_v63 = vor.u32 %v371_v49, %v367_v38  ;;  %v2276_v16 = vrot.slane %v2274_v6, 5  ;;  %v385_v25 = vrot.slane %v383_v12, 5  ;;  %v391_v26 = vrot.slane %v389_v13, 5 }
  0x37   : > { %6134 = vmatpush3.bf16.msra.mxu1 %v6816_v3  ;;  %6325 = vmatprep.subr.bf16.mxu0 %v6814_v4  ;;  %v2270_v3 = vrot.slane %v2268_v58, 4  ;;  %v2262_v22 = vrot.slane %v2261_v11, 4  ;;  %v395_v31 = vrot.slane %v393_v18, 4  ;;  %v2282_v42 = vshll.u32 %v5482_v9, 16  ;;  %v5485_v9 = vld [vmem:[%s7061_s14 + $0x48] sm:$0xf] }
  0x38   : > { %6135 = vmatprep.subr.bf16.mxu1 %v6819_v34  ;;  %v373_v10 = vrot.slane %v372_v63, 4  ;;  %v386_v39 = vor.u32 %v385_v25, %v382_v17  ;;  %v2288_v49 = vshll.u32 %v7211_v19, 16  ;;  %v2281_v53 = vrot.slane %v2279_v40, 4  ;;  %v269_v63 = vld [vmem:[%s7061_s14 + $0x44] sm:$0x1] }
  0x39   : > { %v2271_v15 = vor.u32 %v2270_v3, %v2266_v1  ;;  %v2267_v38 = vsel %vm7093_vm2, %v2262_v22, %v2266_v1  ;;  %v396_v44 = vor.u32 %v395_v31, %v391_v26  ;;  %v2284_v54 = vrot.slane %v2282_v42, 5  ;;  %v7252_v22 = vld [vmem:[%s7061_s14 + $0x50] sm:$0x1]  ;;  %v6821_v31 = vld [vmem:[%s8854_s1 + $0x178] sm:$0xff]  }
  0x3a   : > { %6326 = vmatpush3.bf16.msra.mxu0 %v6814_v4  ;;  %v378_v21 = vsel %vm7093_vm2, %v373_v10, %v377_v50  ;;  %v399_v4 = vshll.u32 %v268_v2, 16  ;;  %v387_v52 = vrot.slane %v386_v39, 4  ;;  %v2290_v57 = vrot.slane %v2288_v49, 5  ;;  %v6828_v2 = vld [vmem:[%s8854_s1 + $0x38] sm:$0xff]  }
  0x3b   : > { %6136 = vmatpush3.bf16.msra.mxu1 %v6819_v34  ;;  %6327 = vmatprep.subr.bf16.mxu0 %v6815_v48  ;;  %v5297_v29 = vcombine.low %v368_v5, %v378_v21  ;;  %v2272_v30 = vrot.slane %v2271_v15, 4  ;;  %v226_v34 = vld [vmem:[%s7061_s14 + $0x3c] sm:$0xf]  ;;  %v397_v56 = vrot.slane %v396_v44, 4  ;;  %v2292_v58 = vshrl.u32 %v7211_v19, 16  ;;  %v6820_v15 = vld [vmem:[%s8854_s1 + $0x170] sm:$0xff]  }
  0x3c   : > { %6137 = vmatprep.subr.bf16.mxu1 %v6822_v60  ;;  %v401_v47 = vrot.slane %v399_v4, 5  ;;  %v2298_v59 = vshll.u32 %v7219_v28, 16  ;;  %v2285_v61 = vor.u32 %v2284_v54, %v2281_v53  ;;  %v404_v0 = vshrl.u32 %v226_v34, 16  ;;  %v7263_v4 = vld [vmem:[%s8854_s1 + $0x80] sm:$0xff]   ;;  %v229_v53 = vld [vmem:[%s7061_s14 + $0x4c] sm:$0xf] }
  0x3d   : > { %6102 = vmatmul.mubr.bf16.gmra.mrb[4].mxu1 %v5297_v29  ;;  %v2277_v43 = vsel %vm7093_vm2, %v2272_v30, %v2276_v16  ;;  %v407_v1 = vshll.u32 %v226_v34, 16  ;;  %v2294_v3 = vrot.slane %v2292_v58, 4  ;;  %v413_v7 = vshll.u32 %v227_v55, 16  ;;  %v228_v30 = vld [vmem:[%s7061_s14 + $0x48] sm:$0xf] }
  0x3e   : > { %6328 = vmatpush3.bf16.msra.mxu0 %v6815_v48  ;;  %v5537_v50 = vcombine.low %v2267_v38, %v2277_v43  ;;  %v6818_v48 = vld [vmem:[%s8854_s1 + $0x168] sm:$0xff]   ;;  %v402_v5 = vsel %vm7093_vm2, %v397_v56, %v401_v47  ;;  %v2300_v6 = vrot.slane %v2298_v59, 5  ;;  %v2286_v11 = vrot.slane %v2285_v61, 4  ;;  %v270_v54 = vld [vmem:[%s7061_s14 + $0x50] sm:$0x1] }
  0x3f   : > { %6138 = vmatpush3.bf16.msra.mxu1 %v6822_v60  ;;  %6329 = vmatprep.subr.bf16.mxu0 %v6817_v20  ;;  %v392_v60 = vsel %vm7093_vm2, %v387_v52, %v391_v26  ;;  %v406_v12 = vrot.slane %v404_v0, 4  ;;  %v409_v13 = vrot.slane %v407_v1, 5  ;;  %v2295_v16 = vor.u32 %v2294_v3, %v2290_v57  ;;  %v5488_v58 = vld [vmem:[%s7061_s14 + $0x54] sm:$0xf]  ;;  %v7277_v0 = vld [vmem:[%s7061_s14 + $0x58] sm:$0xf] }
  0x40   : > { %6139 = vmatprep.subr.bf16.mxu1 %v6824_v14  ;;  %6294 = vmatmul.mubr.bf16.gmra.mrb[4].mxu0 %v5537_v50  ;;  %v5298_v10 = vcombine.low %v392_v60, %v402_v5  ;;  %v415_v17 = vrot.slane %v413_v7, 5  ;;  %v417_v18 = vshrl.u32 %v227_v55, 16  ;;  %v423_v21 = vshll.u32 %v269_v63, 16 }
  0x41   : > { %v410_v25 = vor.u32 %v409_v13, %v406_v12  ;;  %v2303_v26 = vshrl.u32 %v5485_v9, 16  ;;  %v2306_v29 = vshll.u32 %v5485_v9, 16  ;;  %v2296_v34 = vrot.slane %v2295_v16, 4 }
  0x42   : > { %6330 = vmatpush3.bf16.msra.mxu0 %v6817_v20  ;;  %6105 = vmatprep.mubr.bf16.mxu1 %v5298_v10  ;;  %v2291_v20 = vsel %vm7093_vm2, %v2286_v11, %v2290_v57  ;;  %v425_v38 = vrot.slane %v423_v21, 5  ;;  %v2322_v52 = vshll.u32 %v7252_v22, 16  ;;  %v428_v61 = vshrl.u32 %v228_v30, 16 }
  0x43   : > { %6140 = vmatpush3.bf16.msra.mxu1 %v6824_v14  ;;  %v7246_v14 = vld [vmem:[%s7061_s14 + $0x4c] sm:$0xf]  ;;  %6331 = vmatprep.subr.bf16.mxu0 %v6818_v48  ;;  %v411_v40 = vrot.slane %v410_v25, 4  ;;  %v2305_v42 = vrot.slane %v2303_v26, 4  ;;  %v2308_v43 = vrot.slane %v2306_v29, 5  ;;  %v2301_v47 = vsel %vm7093_vm2, %v2296_v34, %v2300_v6  ;;  %v7282_v6 = vld [vmem:[%s8854_s1 + $0x180] sm:$0xff]  }
  0x44   : > { %6141 = vmatprep.subr.bf16.mxu1 %v6826_v35  ;;  %v2312_v39 = vshll.u32 %v7246_v14, 16  ;;  %v2316_v44 = vshrl.u32 %v7246_v14, 16  ;;  %v5538_v55 = vcombine.low %v2291_v20, %v2301_v47  ;;  %v2324_v60 = vrot.slane %v2322_v52, 5  ;;  %v7289_v20 = vld [vmem:[%s7061_s14 + $0x5c] sm:$0x1] }
  0x45   : > { %v2309_v56 = vor.u32 %v2308_v43, %v2305_v42  ;;  %v431_v63 = vshll.u32 %v228_v30, 16  ;;  %v441_v3 = vshrl.u32 %v229_v53, 16  ;;  %v430_v9 = vrot.slane %v428_v61, 4  ;;  %v231_v43 = vld [vmem:[%s7061_s14 + $0x58] sm:$0xf] }
  0x46   : > { %6332 = vmatpush3.bf16.msra.mxu0 %v6818_v48  ;;  %v2314_v50 = vrot.slane %v2312_v39, 5  ;;  %v416_v48 = vsel %vm7093_vm2, %v411_v40, %v415_v17  ;;  %v2318_v57 = vrot.slane %v2316_v44, 4  ;;  %6297 = vmatprep.mubr.bf16.mxu0 %v5538_v55  ;;  %v447_v11 = vshll.u32 %v270_v54, 16  ;;  %v5491_v52 = vld [vmem:[%s7061_s14 + $0x60] sm:$0xf] }
  0x47   : > { %6142 = vmatpush3.bf16.msra.mxu1 %v6826_v35  ;;  %v419_v35 = vrot.slane %v417_v18, 4  ;;  %6333 = vmatprep.subr.bf16.mxu0 %v6820_v15  ;;  %v2310_v1 = vrot.slane %v2309_v56, 4  ;;  %v433_v10 = vrot.slane %v431_v63, 5  ;;  %v443_v18 = vrot.slane %v441_v3, 4 }
  0x48   : > { %6143 = vmatprep.subr.bf16.mxu1 %v6828_v2  ;;  %v2319_v5 = vor.u32 %v2318_v57, %v2314_v50  ;;  %v449_v21 = vrot.slane %v447_v11, 5  ;;  %v2327_v25 = vshrl.u32 %v5488_v58, 16  ;;  %v2330_v29 = vshll.u32 %v5488_v58, 16 }
  0x49   : > { %v420_v49 = vor.u32 %v419_v35, %v415_v17  ;;  %v2315_v13 = vsel %vm7093_vm2, %v2310_v1, %v2314_v50  ;;  %v434_v17 = vor.u32 %v433_v10, %v430_v9  ;;  %v2336_v30 = vshll.u32 %v7277_v0, 16  ;;  %v230_v35 = vld [vmem:[%s7061_s14 + $0x54] sm:$0xf]  ;;  %v271_v50 = vld [vmem:[%s7061_s14 + $0x5c] sm:$0x1] }
  0x4a   : > { %6334 = vmatpush3.bf16.msra.mxu0 %v6820_v15  ;;  %v2320_v15 = vrot.slane %v2319_v5, 4  ;;  %v2340_v34 = vshrl.u32 %v7277_v0, 16  ;;  %v2329_v42 = vrot.slane %v2327_v25, 4  ;;  %v452_v55 = vshrl.u32 %v230_v35, 16  ;;  %v7317_v25 = vld [vmem:[%s7061_s14 + $0x60] sm:$0xf] }
  0x4b   : > { %6144 = vmatpush3.bf16.msra.mxu1 %v6828_v2  ;;  %v421_v59 = vrot.slane %v420_v49, 4  ;;  %v437_v2 = vshll.u32 %v229_v53, 16  ;;  %6335 = vmatprep.subr.bf16.mxu0 %v6821_v31  ;;  %v435_v39 = vrot.slane %v434_v17, 4  ;;  %v2338_v44 = vrot.slane %v2336_v30, 5  ;;  %v7313_v17 = vld [vmem:[%s7061_s14 + $0x68] sm:$0x1] }
  0x4c   : > { %6177 = vmatprep.subr.bf16.mxu1 %v7263_v4  ;;  %v2325_v26 = vsel %vm7093_vm2, %v2320_v15, %v2324_v60  ;;  %v2342_v47 = vrot.slane %v2340_v34, 4  ;;  %v2346_v49 = vshll.u32 %v7289_v20, 16  ;;  %v7304_v60 = vld [vmem:[%s7061_s14 + $0x64] sm:$0xf]  ;;  %v454_v63 = vrot.slane %v452_v55, 4 }
  0x4d   : > { %v426_v7 = vsel %vm7093_vm2, %v421_v59, %v425_v38  ;;  %v439_v16 = vrot.slane %v437_v2, 5  ;;  %v5539_v38 = vcombine.low %v2315_v13, %v2325_v26  ;;  %v461_v59 = vshll.u32 %v231_v43, 16 }
  0x4e   : > { %v5299_v12 = vcombine.low %v416_v48, %v426_v7  ;;  %6336 = vmatpush3.bf16.msra.mxu0 %v6821_v31  ;;  %v2332_v31 = vrot.slane %v2330_v29, 5  ;;  %v455_v48 = vshll.u32 %v230_v35, 16  ;;  %v2343_v57 = vor.u32 %v2342_v47, %v2338_v44  ;;  %v7320_v35 = vld [vmem:[%s7061_s14 + $0x64] sm:$0xf] }
  0x4f   : > { %6369 = vmatprep.subr.bf16.mxu0 %v7282_v6  ;;  %v444_v40 = vor.u32 %v443_v18, %v439_v16  ;;  %6298 = vmatmul.mubr.bf16.gmra.mrb[8].mxu0 %v5539_v38  ;;  %v440_v53 = vsel %vm7093_vm2, %v435_v39, %v439_v16  ;;  %v2348_v58 = vrot.slane %v2346_v49, 5  ;;  %v465_v5 = vshrl.u32 %v231_v43, 16  ;;  %v272_v43 = vld [vmem:[%s7061_s14 + $0x68] sm:$0x1] }
  0x50   : > { %6106 = vmatmul.mubr.bf16.gmra.mrb[8].mxu1 %v5299_v12  ;;  %v2333_v56 = vor.u32 %v2332_v31, %v2329_v42  ;;  %v457_v1 = vrot.slane %v455_v48, 5  ;;  %v2344_v7 = vrot.slane %v2343_v57, 4  ;;  %v463_v9 = vrot.slane %v461_v59, 5 }
  0x51   : > { %v445_v54 = vrot.slane %v444_v40, 4  ;;  %v467_v11 = vrot.slane %v465_v5, 4  ;;  %v471_v12 = vshll.u32 %v271_v50, 16  ;;  %v2351_v13 = vshrl.u32 %v5491_v52, 16  ;;  %v5558_v50 = vld [vmem:[%s7061_s14 + $0xc] sm:$0xe] }
  0x52   : > { %v2334_v3 = vrot.slane %v2333_v56, 4  ;;  %v458_v10 = vor.u32 %v457_v1, %v454_v63  ;;  %v2349_v16 = vsel %vm7093_vm2, %v2344_v7, %v2348_v58  ;;  %v2354_v18 = vshll.u32 %v5491_v52, 16  ;;  %v7335_v5 = vld [vmem:[%s7061_s14 + $0x6c] sm:$0xf] }
  0x53   : > { %v450_v61 = vsel %vm7093_vm2, %v445_v54, %v449_v21  ;;  %v2360_v21 = vshll.u32 %v7304_v60, 16  ;;  %v468_v30 = vor.u32 %v467_v11, %v463_v9  ;;  %v473_v34 = vrot.slane %v471_v12, 5 }
  0x54   : > { %v5300_v2 = vcombine.low %v440_v53, %v450_v61  ;;  %v2339_v15 = vsel %vm7093_vm2, %v2334_v3, %v2338_v44  ;;  %v459_v29 = vrot.slane %v458_v10, 4  ;;  %v2353_v38 = vrot.slane %v2351_v13, 4 }
  0x55   : > { %v5540_v26 = vcombine.low %v2339_v15, %v2349_v16  ;;  %v2356_v39 = vrot.slane %v2354_v18, 5  ;;  %v2362_v40 = vrot.slane %v2360_v21, 5  ;;  %v2364_v42 = vshrl.u32 %v7304_v60, 16  ;;  %v7347_v21 = vld [vmem:[%s7061_s14 + $0x70] sm:$0xf] }
  0x56   : > { %6109 = vmatprep.mubr.bf16.mxu1 %v5300_v2  ;;  %v464_v31 = vsel %vm7093_vm2, %v459_v29, %v463_v9  ;;  %v469_v44 = vrot.slane %v468_v30, 4  ;;  %v2370_v47 = vshll.u32 %v7313_v17, 16  ;;  %v476_v49 = vshrl.u32 %v7317_v25, 16  ;;  %v6912_v9 = vld [vmem:[%s7061_s14 + $0xb4] sm:$0xff]  }
  0x57   : > { %6301 = vmatprep.mubr.bf16.mxu0 %v5540_v26  ;;  %v2357_v52 = vor.u32 %v2356_v39, %v2353_v38  ;;  %v2366_v53 = vrot.slane %v2364_v42, 4  ;;  %v479_v54 = vshll.u32 %v7317_v25, 16  ;;  %v485_v55 = vshll.u32 %v7320_v35, 16 }
  0x58   : > { %v474_v48 = vsel %vm7093_vm2, %v469_v44, %v473_v34  ;;  %v2372_v56 = vrot.slane %v2370_v47, 5  ;;  %v478_v57 = vrot.slane %v476_v49, 4  ;;  %v489_v58 = vshrl.u32 %v7320_v35, 16  ;;  %v7358_v47 = vld [vmem:[%s7061_s14 + $0x78] sm:$0xf] }
  0x59   : > { %v5301_v59 = vcombine.low %v464_v31, %v474_v48  ;;  %v2358_v61 = vrot.slane %v2357_v52, 4  ;;  %v2367_v63 = vor.u32 %v2366_v53, %v2362_v40  ;;  %v481_v1 = vrot.slane %v479_v54, 5  ;;  %v7369_v54 = vld [vmem:[%s7061_s14 + $0x7c] sm:$0xf] }
  0x5a   : > { %v487_v2 = vrot.slane %v485_v55, 5  ;;  %v491_v3 = vrot.slane %v489_v58, 4  ;;  %v495_v7 = vshll.u32 %v272_v43, 16  ;;  %v5574_v10 = vrot.slane %v5558_v50, 9  ;;  %v274_v58 = vld [vmem:[%s7061_s14 + $0x80] sm:$0x1] }
  0x5b   : > { %6110 = vmatmul.mubr.bf16.gmra.mrb[12].mxu1 %v5301_v59  ;;  %v2363_v11 = vsel %vm7093_vm2, %v2358_v61, %v2362_v40  ;;  %v2368_v12 = vrot.slane %v2367_v63, 4  ;;  %v482_v13 = vor.u32 %v481_v1, %v478_v57  ;;  %v2954_v15 = vrot.slane %v7074_v23, 5  ;;  %v273_v40 = vld [vmem:[%s7061_s14 + $0x74] sm:$0x1]  ;;  %v5559_v23 = vld [vmem:[%s7061_s14 + $0x18] sm:$0xe] }
  0x5c   : > { %v492_v16 = vor.u32 %v491_v3, %v487_v2  ;;  %v497_v18 = vrot.slane %v495_v7, 5  ;;  %v500_v26 = vshrl.u32 %v7335_v5, 16  ;;  %v503_v29 = vshll.u32 %v7335_v5, 16 }
  0x5d   : > { %v2373_v30 = vsel %vm7093_vm2, %v2368_v12, %v2372_v56  ;;  %v483_v34 = vrot.slane %v482_v13, 4  ;;  %v2955_v38 = vsel %vm7339_vm5, %v5574_v10, %v2954_v15  ;;  %v2956_v39 = vrot.slane %v2954_v15, 4  ;;  %v5560_v13 = vld [vmem:[%s7061_s14 + $0x24] sm:$0xe] }
  0x5e   : > { %v5541_v42 = vcombine.low %v2363_v11, %v2373_v30  ;;  %v493_v43 = vrot.slane %v492_v16, 4  ;;  %v502_v31 = vrot.slane %v500_v26, 4  ;;  %v505_v44 = vrot.slane %v503_v29, 5  ;;  %v7391_v16 = vld [vmem:[%s7061_s14 + $0x84] sm:$0xf]  ;;  %v6825_v29 = vld [vmem:[%s8854_s1 + $0x188] sm:$0xff]  }
  0x5f   : > { %v488_v49 = vsel %vm7093_vm2, %v483_v34, %v487_v2  ;;  %v2958_v50 = vsel %vm7339_vm5, %v2956_v39, %v2957_v41  ;;  %v509_v52 = vshll.u32 %v7347_v21, 16  ;;  %v513_v53 = vshrl.u32 %v7347_v21, 16 }
  0x60   : > { %6302 = vmatmul.mubr.bf16.gmra.mrb[12].mxu0 %v5541_v42  ;;  %v498_v55 = vsel %vm7093_vm2, %v493_v43, %v497_v18  ;;  %v5606_v48 = vcombine.low %v2955_v38, %v2958_v50  ;;  %v506_v56 = vor.u32 %v505_v44, %v502_v31  ;;  %v519_v57 = vshll.u32 %v273_v40, 16  ;;  %v7399_v40 = vld [vmem:[%s7061_s14 + $0x88] sm:$0xf]  ;;  %v275_v31 = vld [vmem:[%s7061_s14 + $0x8c] sm:$0x1] }
  0x61   : > { %v5302_v59 = vcombine.low %v488_v49, %v498_v55  ;;  %v511_v24 = vrot.slane %v509_v52, 5  ;;  %v515_v61 = vrot.slane %v513_v53, 4  ;;  %v5575_v63 = vrot.slane %v5559_v23, 9 }
  0x62   : > { %6337 = vmatprep.mubr.bf16.mxu0 %v5606_v48  ;;  %v507_v41 = vrot.slane %v506_v56, 4  ;;  %v521_v1 = vrot.slane %v519_v57, 5  ;;  %v2965_v2 = vsel %vm7339_vm5, %v7142_v36, %v2964_v32  ;;  %v524_v3 = vshrl.u32 %v7358_v47, 16 }
  0x63   : > { %6113 = vmatprep.mubr.bf16.mxu1 %v5302_v59  ;;  %v516_v7 = vor.u32 %v515_v61, %v511_v24  ;;  %v2962_v10 = vsel %vm7339_vm5, %v5575_v63, %v2961_v27  ;;  %v527_v11 = vshll.u32 %v7358_v47, 16  ;;  %v533_v12 = vshll.u32 %v7369_v54, 16 }
  0x64   : > { %v512_v8 = vsel %vm7093_vm2, %v507_v41, %v511_v24  ;;  %v5607_v15 = vcombine.low %v2962_v10, %v2965_v2  ;;  %v526_v32 = vrot.slane %v524_v3, 4  ;;  %v537_v36 = vshrl.u32 %v7369_v54, 16  ;;  %v7420_v2 = vld [vmem:[%s7061_s14 + $0x90] sm:$0xf]  ;;  %v7423_v3 = vld [vmem:[%s7061_s14 + $0x94] sm:$0xf] }
  0x65   : > { %v517_v62 = vrot.slane %v516_v7, 4  ;;  %v529_v18 = vrot.slane %v527_v11, 5  ;;  %v535_v26 = vrot.slane %v533_v12, 5  ;;  %v543_v27 = vshll.u32 %v274_v58, 16 }
  0x66   : > { %v539_v30 = vrot.slane %v537_v36, 4  ;;  %v5576_v34 = vrot.slane %v5560_v13, 9  ;;  %v2968_v38 = vrot.slane %v7146_v45, 5  ;;  %v2971_v39 = vrot.slane %v7152_v51, 5  ;;  %v5561_v45 = vld [vmem:[%s7061_s14 + $0x30] sm:$0xe] }
  0x67   : > { %v522_v23 = vsel %vm7093_vm2, %v517_v62, %v521_v1  ;;  %v530_v42 = vor.u32 %v529_v18, %v526_v32  ;;  %v545_v43 = vrot.slane %v543_v27, 5  ;;  %v548_v44 = vshrl.u32 %v7391_v16, 16  ;;  %v276_v62 = vld [vmem:[%s7061_s14 + $0x98] sm:$0x1] }
  0x68   : > { %v5303_v49 = vcombine.low %v512_v8, %v522_v23  ;;  %6338 = vmatmul.mubr.bf16.vlgmr.msra.gmra.mrb[0].mxu0 %v5607_v15  ;;  %v540_v50 = vor.u32 %v539_v30, %v535_v26  ;;  %v2969_v52 = vsel %vm7339_vm5, %v5576_v34, %v2968_v38  ;;  %v2970_v53 = vrot.slane %v2968_v38, 4  ;;  %v6829_v30 = vld [vmem:[%s8854_s1 + $0x198] sm:$0xff]  }
  0x69   : > { %6370 = vmatpush3.bf16.msra.mxu0 %v7282_v6  ;;  %v531_v51 = vrot.slane %v530_v42, 4  ;;  %v550_v55 = vrot.slane %v548_v44, 4  ;;  %v551_v48 = vshll.u32 %v7391_v16, 16  ;;  %v557_v56 = vshll.u32 %v7399_v40, 16  ;;  %v6827_v6 = vld [vmem:[%s8854_s1 + $0x190] sm:$0xff]  }
  0x6a   : > { %6114 = vmatmul.mubr.bf16.gmra.mrb[16].mxu1 %v5303_v49  ;;  %v541_v57 = vrot.slane %v540_v50, 4  ;;  %v2972_v58 = vsel %vm7339_vm5, %v2970_v53, %v2971_v39  ;;  %v561_v59 = vshrl.u32 %v7399_v40, 16  ;;  %v567_v24 = vshll.u32 %v275_v31, 16  ;;  %6371 = vmatprep.subr.bf16.mxu0 %v6825_v29  ;;  %v5562_v38 = vld [vmem:[%s7061_s14 + $0x3c] sm:$0xe] }
  0x6b   : > { %v536_v61 = vsel %vm7093_vm2, %v531_v51, %v535_v26  ;;  %v5608_v63 = vcombine.low %v2969_v52, %v2972_v58  ;;  %v553_v41 = vrot.slane %v551_v48, 5  ;;  %v559_v1 = vrot.slane %v557_v56, 5  ;;  %v7441_v31 = vld [vmem:[%s7061_s14 + $0x9c] sm:$0xf]  ;;  %v7450_v48 = vld [vmem:[%s7061_s14 + $0xa0] sm:$0xf] }
  0x6c   : > { %v546_v7 = vsel %vm7093_vm2, %v541_v57, %v545_v43  ;;  %v563_v10 = vrot.slane %v561_v59, 4  ;;  %v569_v11 = vrot.slane %v567_v24, 5  ;;  %v5577_v12 = vrot.slane %v5561_v45, 9  ;;  %v6833_v56 = vld [vmem:[%s8854_s1 + $0x1a0] sm:$0xff]  }
  0x6d   : > { %v5304_v13 = vcombine.low %v536_v61, %v546_v7  ;;  %6341 = vmatprep.mubr.bf16.mxu0 %v5608_v63  ;;  %v554_v8 = vor.u32 %v553_v41, %v550_v55  ;;  %v2975_v15 = vrot.slane %v7177_v33, 5  ;;  %v2978_v32 = vrot.slane %v7188_v46, 5  ;;  %6372 = vmatpush3.bf16.msra.mxu0 %v6825_v29  ;;  %v277_v61 = vld [vmem:[%s7061_s14 + $0xa4] sm:$0x1] }
  0x6e   : > { %v564_v36 = vor.u32 %v563_v10, %v559_v1  ;;  %v572_v18 = vshrl.u32 %v7420_v2, 16  ;;  %v575_v26 = vshll.u32 %v7420_v2, 16  ;;  %v581_v27 = vshll.u32 %v7423_v3, 16  ;;  %6373 = vmatprep.subr.bf16.mxu0 %v6827_v6 }
  0x6f   : > { %6117 = vmatprep.mubr.bf16.mxu1 %v5304_v13  ;;  %v555_v34 = vrot.slane %v554_v8, 4  ;;  %v2976_v33 = vsel %vm7339_vm5, %v5577_v12, %v2975_v15  ;;  %v2977_v46 = vrot.slane %v2975_v15, 4  ;;  %v585_v29 = vshrl.u32 %v7423_v3, 16  ;;  %v5563_v15 = vld [vmem:[%s7061_s14 + $0x48] sm:$0xe] }
  0x70   : > { %v565_v39 = vrot.slane %v564_v36, 4  ;;  %v574_v23 = vrot.slane %v572_v18, 4  ;;  %v577_v42 = vrot.slane %v575_v26, 5  ;;  %v583_v43 = vrot.slane %v581_v27, 5  ;;  %v7475_v27 = vld [vmem:[%s7061_s14 + $0xa8] sm:$0xf] }
  0x71   : > { %v560_v44 = vsel %vm7093_vm2, %v555_v34, %v559_v1  ;;  %v2979_v49 = vsel %vm7339_vm5, %v2977_v46, %v2978_v32  ;;  %v587_v50 = vrot.slane %v585_v29, 4  ;;  %v591_v52 = vshll.u32 %v276_v62, 16  ;;  %6374 = vmatpush3.bf16.msra.mxu0 %v6827_v6  ;;  %v6837_v32 = vld [vmem:[%s8854_s1 + $0x1a8] sm:$0xff]  }
  0x72   : > { %v570_v53 = vsel %vm7093_vm2, %v565_v39, %v569_v11  ;;  %v5609_v45 = vcombine.low %v2976_v33, %v2979_v49  ;;  %v578_v51 = vor.u32 %v577_v42, %v574_v23  ;;  %v5578_v55 = vrot.slane %v5562_v38, 9  ;;  %6375 = vmatprep.subr.bf16.mxu0 %v6829_v30  ;;  %v7478_v29 = vld [vmem:[%s7061_s14 + $0xac] sm:$0xf] }
  0x73   : > { %v5305_v57 = vcombine.low %v560_v44, %v570_v53  ;;  %v588_v58 = vor.u32 %v587_v50, %v583_v43  ;;  %v593_v59 = vrot.slane %v591_v52, 5  ;;  %v2982_v24 = vrot.slane %v7211_v19, 5  ;;  %v5564_v53 = vld [vmem:[%s7061_s14 + $0x54] sm:$0xe] }
  0x74   : > { %6342 = vmatmul.mubr.bf16.gmra.mrb[4].mxu0 %v5609_v45  ;;  %v579_v6 = vrot.slane %v578_v51, 4  ;;  %v2985_v63 = vrot.slane %v7219_v28, 5  ;;  %v596_v41 = vshrl.u32 %v7441_v31, 16  ;;  %v599_v1 = vshll.u32 %v7441_v31, 16  ;;  %v6841_v45 = vld [vmem:[%s8854_s1 + $0x1b0] sm:$0xff]  }
  0x75   : > { %6118 = vmatmul.mubr.bf16.gmra.mrb[20].mxu1 %v5305_v57  ;;  %v589_v7 = vrot.slane %v588_v58, 4  ;;  %v2983_v10 = vsel %vm7339_vm5, %v5578_v55, %v2982_v24  ;;  %v2984_v11 = vrot.slane %v2982_v24, 4  ;;  %v605_v12 = vshll.u32 %v7450_v48, 16  ;;  %6376 = vmatpush3.bf16.msra.mxu0 %v6829_v30 }
  0x76   : > { %v584_v19 = vsel %vm7093_vm2, %v579_v6, %v583_v43  ;;  %v598_v13 = vrot.slane %v596_v41, 4  ;;  %v601_v28 = vrot.slane %v599_v1, 5  ;;  %v609_v8 = vshrl.u32 %v7450_v48, 16  ;;  %6377 = vmatprep.subr.bf16.mxu0 %v6833_v56  ;;  %v278_v43 = vld [vmem:[%s7061_s14 + $0xb0] sm:$0x1] }
  0x77   : > { %v594_v36 = vsel %vm7093_vm2, %v589_v7, %v593_v59  ;;  %v2986_v62 = vsel %vm7339_vm5, %v2984_v11, %v2985_v63  ;;  %v607_v18 = vrot.slane %v605_v12, 5  ;;  %v615_v26 = vshll.u32 %v277_v61, 16  ;;  %v7498_v41 = vld [vmem:[%s7061_s14 + $0xb4] sm:$0xf]  ;;  %v7503_v12 = vld [vmem:[%s7061_s14 + $0xb8] sm:$0xf] }
  0x78   : > { %v5306_v30 = vcombine.low %v584_v19, %v594_v36  ;;  %v5610_v34 = vcombine.low %v2983_v10, %v2986_v62  ;;  %v602_v33 = vor.u32 %v601_v28, %v598_v13  ;;  %v611_v46 = vrot.slane %v609_v8, 4  ;;  %v279_v19 = vld [vmem:[%s7061_s14 + $0xbc] sm:$0x1] }
  0x79   : > { %v617_v38 = vrot.slane %v615_v26, 5  ;;  %v5579_v39 = vrot.slane %v5563_v15, 9  ;;  %v2989_v23 = vrot.slane %v7246_v14, 5  ;;  %v2992_v42 = vrot.slane %v7252_v22, 5  ;;  %6378 = vmatpush3.bf16.msra.mxu0 %v6833_v56  ;;  %v6845_v13 = vld [vmem:[%s8854_s1 + $0x1b8] sm:$0xff]  }
  0x7a   : > { %6121 = vmatprep.mubr.bf16.mxu1 %v5306_v30  ;;  %6345 = vmatprep.mubr.bf16.mxu0 %v5610_v34  ;;  %v603_v44 = vrot.slane %v602_v33, 4  ;;  %v612_v49 = vor.u32 %v611_v46, %v607_v18  ;;  %v620_v50 = vshrl.u32 %v7475_v27, 16  ;;  %v623_v52 = vshll.u32 %v7475_v27, 16  ;;  %v5565_v30 = vld [vmem:[%s7061_s14 + $0x60] sm:$0xe] }
  0x7b   : > { %v2990_v14 = vsel %vm7339_vm5, %v5579_v39, %v2989_v23  ;;  %v2991_v22 = vrot.slane %v2989_v23, 4  ;;  %v629_v51 = vshll.u32 %v7478_v29, 16  ;;  %v633_v55 = vshrl.u32 %v7478_v29, 16  ;;  %6379 = vmatprep.subr.bf16.mxu0 %v6837_v32  ;;  %v5495_v39 = vld [vmem:[%s7061_s14 + $0x70] sm:$0xf] }
  0x7c   : > { %v608_v56 = vsel %vm7093_vm2, %v603_v44, %v607_v18  ;;  %v613_v57 = vrot.slane %v612_v49, 4  ;;  %v622_v58 = vrot.slane %v620_v50, 4  ;;  %v625_v59 = vrot.slane %v623_v52, 5  ;;  %v7525_v44 = vld [vmem:[%s8854_s1 + $0x1c0] sm:$0xff]  }
  0x7d   : > { %v2993_v24 = vsel %vm7339_vm5, %v2991_v22, %v2992_v42  ;;  %v631_v61 = vrot.slane %v629_v51, 5  ;;  %v635_v6 = vrot.slane %v633_v55, 4  ;;  %v639_v63 = vshll.u32 %v278_v43, 16  ;;  %6380 = vmatpush3.bf16.msra.mxu0 %v6837_v32  ;;  %v5566_v43 = vld [vmem:[%s7061_s14 + $0x6c] sm:$0xe] }
  0x7e   : > { %v618_v1 = vsel %vm7093_vm2, %v613_v57, %v617_v38  ;;  %v5611_v7 = vcombine.low %v2990_v14, %v2993_v24  ;;  %v626_v10 = vor.u32 %v625_v59, %v622_v58  ;;  %v5580_v11 = vrot.slane %v5564_v53, 9  ;;  %6381 = vmatprep.subr.bf16.mxu0 %v6841_v45  ;;  %v5496_v55 = vld [vmem:[%s7061_s14 + $0x74] sm:$0x1]  ;;  %v5567_v24 = vld [vmem:[%s7061_s14 + $0x78] sm:$0xe] }
  0x7f   : > { %v5307_v28 = vcombine.low %v608_v56, %v618_v1  ;;  %v636_v8 = vor.u32 %v635_v6, %v631_v61  ;;  %v641_v15 = vrot.slane %v639_v63, 5  ;;  %v2996_v32 = vrot.slane %v7277_v0, 5 }
  0x80   : > { %6346 = vmatmul.mubr.bf16.gmra.mrb[8].mxu0 %v5611_v7  ;;  %v627_v36 = vrot.slane %v626_v10, 4  ;;  %v2999_v62 = vrot.slane %v7289_v20, 5  ;;  %v644_v18 = vshrl.u32 %v7498_v41, 16  ;;  %v647_v26 = vshll.u32 %v7498_v41, 16 }
  0x81   : > { %6122 = vmatmul.mubr.bf16.gmra.mrb[24].mxu1 %v5307_v28  ;;  %v637_v34 = vrot.slane %v636_v8, 4  ;;  %v2997_v33 = vsel %vm7339_vm5, %v5580_v11, %v2996_v32  ;;  %v2998_v46 = vrot.slane %v2996_v32, 4  ;;  %v653_v38 = vshll.u32 %v7503_v12, 16  ;;  %6382 = vmatpush3.bf16.msra.mxu0 %v6841_v45  ;;  %v7538_v11 = vld [vmem:[%s7061_s14 + $0x7c] sm:$0xf] }
  0x82   : > { %v632_v0 = vsel %vm7093_vm2, %v627_v36, %v631_v61  ;;  %v646_v20 = vrot.slane %v644_v18, 4  ;;  %v649_v23 = vrot.slane %v647_v26, 5  ;;  %v657_v42 = vshrl.u32 %v7503_v12, 16  ;;  %6383 = vmatprep.subr.bf16.mxu0 %v6845_v13  ;;  %v6914_v36 = vld [vmem:[%s7061_s14] sm:$0xf] }
  0x83   : > { %v642_v49 = vsel %vm7093_vm2, %v637_v34, %v641_v15  ;;  %v3000_v50 = vsel %vm7339_vm5, %v2998_v46, %v2999_v62  ;;  %v655_v52 = vrot.slane %v653_v38, 5  ;;  %v663_v53 = vshll.u32 %v279_v19, 16  ;;  %v5501_v15 = vld [vmem:[%s7061_s14 + $0x88] sm:$0xf]  ;;  %v7553_v62 = vld [vmem:[%s7061_s14 + $0x4] sm:$0xf] }
  0x84   : > { %v5308_v45 = vcombine.low %v632_v0, %v642_v49  ;;  %v5612_v14 = vcombine.low %v2997_v33, %v3000_v50  ;;  %v650_v22 = vor.u32 %v649_v23, %v646_v20  ;;  %v659_v51 = vrot.slane %v657_v42, 4  ;;  %v5502_v26 = vld [vmem:[%s7061_s14 + $0x8c] sm:$0x1]  ;;  %v5505_v23 = vld [vmem:[%s7061_s14 + $0x98] sm:$0x1] }
  0x85   : > { %v665_v56 = vrot.slane %v663_v53, 5  ;;  %v5581_v57 = vrot.slane %v5565_v30, 9  ;;  %v3003_v58 = vrot.slane %v7304_v60, 5  ;;  %v3006_v59 = vrot.slane %v7313_v17, 5  ;;  %6384 = vmatpush3.bf16.msra.mxu0 %v6845_v13  ;;  %v7541_v17 = vld [vmem:[%s7061_s14 + $0x80] sm:$0x1] }
  0x86   : > { %6125 = vmatprep.mubr.bf16.mxu1 %v5308_v45  ;;  %6349 = vmatprep.mubr.bf16.mxu0 %v5612_v14  ;;  %v651_v61 = vrot.slane %v650_v22, 4  ;;  %v660_v6 = vor.u32 %v659_v51, %v655_v52  ;;  %v5582_v63 = vrot.slane %v5566_v43, 9  ;;  %v3010_v1 = vrot.slane %v5495_v39, 5  ;;  %v5568_v30 = vld [vmem:[%s7061_s14 + $0x84] sm:$0xe] }
  0x87   : > { %v3004_v7 = vsel %vm7339_vm5, %v5581_v57, %v3003_v58  ;;  %v3005_v10 = vrot.slane %v3003_v58, 4  ;;  %v3013_v60 = vrot.slane %v5496_v55, 5  ;;  %6417 = vmatprep.subr.bf16.mxu0 %v7525_v44  ;;  %v5318_v18 = vcombine.low %v6914_v36, %v7553_v62  ;;  %v5504_v39 = vld [vmem:[%s7061_s14 + $0x94] sm:$0xf]  ;;  %v5569_v42 = vld [vmem:[%s7061_s14 + $0x90] sm:$0xe] }
  0x88   : > { %v656_v19 = vsel %vm7093_vm2, %v651_v61, %v655_v52  ;;  %v661_v13 = vrot.slane %v660_v6, 4  ;;  %v3011_v28 = vsel %vm7339_vm5, %v5582_v63, %v3010_v1  ;;  %v3012_v8 = vrot.slane %v3010_v1, 4  ;;  %v5570_v50 = vld [vmem:[%s7061_s14 + $0x9c] sm:$0xe]  ;;  %v5507_v14 = vld [vmem:[%s7061_s14 + $0xa0] sm:$0xf] }
  0x89   : > { %v3007_v32 = vsel %vm7339_vm5, %v3005_v10, %v3006_v59  ;;  %v5583_v38 = vrot.slane %v5567_v24, 9  ;;  %v3017_v43 = vrot.slane %v7538_v11, 5  ;;  %v3020_v49 = vrot.slane %v7541_v17, 5  ;;  %v5508_v22 = vld [vmem:[%s7061_s14 + $0xa4] sm:$0x1] }
  0x8a   : > { %v666_v34 = vsel %vm7093_vm2, %v661_v13, %v665_v56  ;;  %v5613_v33 = vcombine.low %v3004_v7, %v3007_v32  ;;  %v3014_v46 = vsel %vm7339_vm5, %v3012_v8, %v3013_v60  ;;  %v5584_v52 = vrot.slane %v5568_v30, 9  ;;  %v5510_v59 = vld [vmem:[%s7061_s14 + $0xac] sm:$0xf]  ;;  %v7577_v61 = vld [vmem:[%s7061_s14 + $0x10] sm:$0xf] }
  0x8b   : > { %v5309_v0 = vcombine.low %v656_v19, %v666_v34  ;;  %v5614_v20 = vcombine.low %v3011_v28, %v3014_v46  ;;  %v3024_v53 = vrot.slane %v5501_v15, 5  ;;  %v3027_v45 = vrot.slane %v5502_v26, 5  ;;  %v6916_v24 = vld [vmem:[%s7061_s14 + $0xc] sm:$0xf]  ;;  %v6918_v8 = vld [vmem:[%s7061_s14 + $0x18] sm:$0xf] }
  0x8c   : > { %6350 = vmatmul.mubr.bf16.gmra.mrb[12].mxu0 %v5613_v33  ;;  %v3018_v51 = vsel %vm7339_vm5, %v5583_v38, %v3017_v43  ;;  %v3019_v55 = vrot.slane %v3017_v43, 4  ;;  %v3031_v58 = vrot.slane %v5504_v39, 5  ;;  %v5319_v6 = vcombine.low %v6916_v24, %v7577_v61  ;;  %v6836_v19 = vld [vmem:[%s8854_s1 + $0x88] sm:$0xff]   ;;  %v7589_v15 = vld [vmem:[%s7061_s14 + $0x1c] sm:$0xf] }
  0x8d   : > { %6126 = vmatmul.mubr.bf16.gmra.mrb[28].mxu1 %v5309_v0  ;;  %6353 = vmatprep.mubr.bf16.mxu0 %v5614_v20  ;;  %v3025_v56 = vsel %vm7339_vm5, %v5584_v52, %v3024_v53  ;;  %v3026_v57 = vrot.slane %v3024_v53, 4  ;;  %v5585_v1 = vrot.slane %v5569_v42, 9  ;;  %v3034_v7 = vrot.slane %v5505_v23, 5  ;;  %v5511_v30 = vld [vmem:[%s7061_s14 + $0xb0] sm:$0x1] }
  0x8e   : > { %6145 = vmatprep.mubr.bf16.mxu1 %v5318_v18  ;;  %v3021_v63 = vsel %vm7339_vm5, %v3019_v55, %v3020_v49  ;;  %v3033_v13 = vrot.slane %v3031_v58, 4  ;;  %v5586_v28 = vrot.slane %v5570_v50, 9  ;;  %v5320_v32 = vcombine.low %v6918_v8, %v7589_v15  ;;  %v5571_v34 = vld [vmem:[%s7061_s14 + $0xa8] sm:$0xe]  ;;  %v5513_v33 = vld [vmem:[%s7061_s14 + $0xb8] sm:$0xf] }
  0x8f   : > { %v5615_v10 = vcombine.low %v3018_v51, %v3021_v63  ;;  %v3028_v60 = vsel %vm7339_vm5, %v3026_v57, %v3027_v45  ;;  %v3038_v18 = vrot.slane %v5507_v14, 5  ;;  %v3041_v26 = vrot.slane %v5508_v22, 5  ;;  %v5514_v20 = vld [vmem:[%s7061_s14 + $0xbc] sm:$0x1]  ;;  %v5572_v23 = vld [vmem:[%s7061_s14 + $0xb4] sm:$0xe] }
  0x90   : > { %v5616_v36 = vcombine.low %v3025_v56, %v3028_v60  ;;  %v3045_v38 = vrot.slane %v5510_v59, 5  ;;  %v3032_v39 = vsel %vm7339_vm5, %v5585_v1, %v3031_v58  ;;  %v3035_v0 = vsel %vm7339_vm5, %v3033_v13, %v3034_v7  ;;  %v6840_v50 = vld [vmem:[%s8854_s1 + $0x90] sm:$0xff]   ;;  %v5516_v53 = vld [vmem:[%s7061_s14 + $0xc4] sm:$0xf]  ;;  %v7612_v51 = vld [vmem:[%s7061_s14 + $0x28] sm:$0xf] }
  0x91   : > { %v3040_v46 = vrot.slane %v3038_v18, 4  ;;  %v3039_v42 = vsel %vm7339_vm5, %v5586_v28, %v3038_v18  ;;  %v3052_v49 = vrot.slane %v5513_v33, 5  ;;  %v5587_v52 = vrot.slane %v5571_v34, 9  ;;  %v6920_v22 = vld [vmem:[%s7061_s14 + $0x24] sm:$0xf]  ;;  %v6844_v1 = vld [vmem:[%s8854_s1 + $0x98] sm:$0xff]  }
  0x92   : > { %v5617_v45 = vcombine.low %v3032_v39, %v3035_v0  ;;  %v3047_v14 = vrot.slane %v3045_v38, 4  ;;  %v5321_v55 = vcombine.low %v6920_v22, %v7612_v51  ;;  %v6922_v57 = vld [vmem:[%s7061_s14 + $0x30] sm:$0xf]  ;;  %v7617_v58 = vld [vmem:[%s7061_s14 + $0x34] sm:$0xf]  ;;  %v5588_v24 = vrot.slane %v5572_v23, 9 }
  0x93   : > { %v3042_v43 = vsel %vm7339_vm5, %v3040_v46, %v3041_v26  ;;  %v5322_v59 = vcombine.low %v6922_v57, %v7617_v58  ;;  %v3055_v63 = vrot.slane %v5514_v20, 5  ;;  %v5573_v7 = vld [vmem:[%s7061_s14 + $0xc0] sm:$0xe]  ;;  %v3046_v60 = vsel %vm7339_vm5, %v5587_v52, %v3045_v38  ;;  %v5517_v8 = vld [vmem:[%s7061_s14 + $0xc8] sm:$0x1]  ;;  %v6847_v22 = vld [vmem:[%s7061_s14 + $0x18] sm:$0xff]  }
  0x94   : > { %6354 = vmatmul.mubr.bf16.gmra.mrb[16].mxu0 %v5615_v10  ;;  %v5618_v56 = vcombine.low %v3039_v42, %v3042_v43  ;;  %v3059_v10 = vrot.slane %v5516_v53, 5  ;;  %v3053_v13 = vsel %vm7339_vm5, %v5588_v24, %v3052_v49  ;;  %v5589_v18 = vrot.slane %v5573_v7, 9  ;;  %v6924_v26 = vld [vmem:[%s7061_s14 + $0x3c] sm:$0xf]  ;;  %v6926_v39 = vld [vmem:[%s7061_s14 + $0x48] sm:$0xf] }
  0x95   : > { %6146 = vmatmul.mubr.bf16.vlgmr.msra.gmra.mrb[0].mxu1 %v5319_v6  ;;  %6357 = vmatprep.mubr.bf16.mxu0 %v5616_v36  ;;  %v3054_v6 = vrot.slane %v3052_v49, 4  ;;  %v3062_v38 = vrot.slane %v5517_v8, 5  ;;  %v7643_v0 = vld [vmem:[%s7061_s14 + $0x4c] sm:$0xf]  ;;  %v6861_v49 = vld [vmem:[%s8854_s1 + $0xb0] sm:$0xff]   ;;  %v2412_v52 = vshrl.u32 %v7538_v11, 16 }
  0x96   : > { %6178 = vmatpush3.bf16.msra.mxu1 %v7263_v4  ;;  %6149 = vmatprep.mubr.bf16.mxu1 %v5320_v32  ;;  %v3048_v4 = vrot.slane %v5511_v30, 5  ;;  %v6849_v32 = vld [vmem:[%s8854_s1 + $0xa0] sm:$0xff]   ;;  %v3061_v46 = vrot.slane %v3059_v10, 4  ;;  %v5324_v20 = vcombine.low %v6926_v39, %v7643_v0  ;;  %v6855_v23 = vld [vmem:[%s8854_s1 + $0xa8] sm:$0xff]   ;;  %v3060_v42 = vsel %vm7339_vm5, %v5589_v18, %v3059_v10  ;;  %v6853_v18 = vld [vmem:[%s7061_s14 + $0x30] sm:$0xff]  }
  0x97   : > { %6179 = vmatprep.subr.bf16.mxu1 %v6836_v19  ;;  %v3056_v28 = vsel %vm7339_vm5, %v3054_v6, %v3055_v63  ;;  %v7638_v30 = vld [vmem:[%s7061_s14 + $0x40] sm:$0xf]  ;;  %v7671_v57 = vrot.slane %v2412_v52, 4  ;;  %v6850_v6 = vld [vmem:[%s7061_s14 + $0x24] sm:$0xff]   ;;  %v1322_v7 = vrot.slane %v7577_v61, 5  ;;  %v2418_v8 = vshll.u32 %v7541_v17, 16 }
  0x98   : > { %v5323_v34 = vcombine.low %v6924_v26, %v7638_v30  ;;  %v5620_v33 = vcombine.low %v3053_v13, %v3056_v28  ;;  %v3063_v43 = vsel %vm7339_vm5, %v3061_v46, %v3062_v38  ;;  %v1262_v63 = vld [vmem:[%s7061_s14] sm:$0xe]  ;;  %v1263_v10 = vld [vmem:[%s7061_s14 + $0xc] sm:$0xe]  ;;  %v1329_v13 = vrot.slane %v7589_v15, 5 }
  0x99   : > { %v5621_v53 = vcombine.low %v3060_v42, %v3063_v43  ;;  %v1265_v61 = vld [vmem:[%s7061_s14 + $0x24] sm:$0xe]  ;;  %v5329_v15 = vcombine.low %v7391_v16, %v7399_v40  ;;  %v5330_v26 = vcombine.low %v7420_v2, %v7423_v3  ;;  %v5342_v17 = vrot.slane %v1262_v63, 9  ;;  %v6932_v38 = vld [vmem:[%s7061_s14 + $0x20] sm:$0x1]  ;;  %v6862_v2 = vld [vmem:[%s7061_s14 + $0x54] sm:$0xff]  }
  0x9a   : > { %6180 = vmatpush3.bf16.msra.mxu1 %v6836_v19  ;;  %v3049_v19 = vsel %vm7339_vm5, %v3047_v14, %v3048_v4  ;;  %v7660_v14 = vld [vmem:[%s7061_s14 + $0x58] sm:$0xf]  ;;  %v1331_v46 = vrot.slane %v1329_v13, 4  ;;  %v1332_v39 = vrot.slane %v6932_v38, 5  ;;  %v6933_v43 = vld [vmem:[%s7061_s14 + $0x2c] sm:$0x1] }
  0x9b   : > { %6181 = vmatprep.subr.bf16.mxu1 %v6840_v50  ;;  %v5619_v36 = vcombine.low %v3046_v60, %v3049_v19  ;;  %v7686_v60 = vld [vmem:[%s8854_s1 + $0xc0] sm:$0xff]   ;;  %v1264_v19 = vld [vmem:[%s7061_s14 + $0x18] sm:$0xe]  ;;  %v6936_v38 = vld [vmem:[%s7061_s14 + $0x50] sm:$0x1]  ;;  %v1364_v16 = vrot.slane %v7660_v14, 5 }
  0x9c   : > { %6358 = vmatmul.mubr.bf16.gmra.mrb[20].mxu0 %v5617_v45  ;;  %v6928_v45 = vld [vmem:[%s7061_s14 + $0x54] sm:$0xf]  ;;  %v7809_v40 = vld [vmem:[%s7061_s14 + $0x64] sm:$0xf] }
  0x9d   : > { %6150 = vmatmul.mubr.bf16.gmra.mrb[4].mxu1 %v5321_v55  ;;  %6361 = vmatprep.mubr.bf16.mxu0 %v5618_v56  ;;  %v5325_v4 = vcombine.low %v6928_v45, %v7660_v14  ;;  %v5326_v55 = vcombine.low %v7317_v25, %v7320_v35  ;;  %v6867_v56 = vld [vmem:[%s8854_s1 + $0xb8] sm:$0xff]   ;;  %v6931_v25 = vld [vmem:[%s7061_s14 + $0x14] sm:$0x1]  ;;  %v6865_v3 = vld [vmem:[%s7061_s14 + $0x60] sm:$0xff]  }
  0x9e   : > { %6153 = vmatprep.mubr.bf16.mxu1 %v5322_v59  ;;  %6182 = vmatpush3.bf16.msra.mxu1 %v6840_v50  ;;  %v2408_v50 = vshll.u32 %v7538_v11, 16  ;;  %v7674_v59 = vld [vmem:[%s7061_s14 + $0x8] sm:$0x1]  ;;  %v1325_v35 = vrot.slane %v6931_v25, 5 }
  0x9f   : > { %6183 = vmatprep.subr.bf16.mxu1 %v6844_v1  ;;  %v1318_v24 = vrot.slane %v7674_v59, 5 }
  0xa0   : > { %v7669_v11 = vrot.slane %v2408_v50, 5 }
  0xa2   : > { %6184 = vmatpush3.bf16.msra.mxu1 %v6844_v1  ;;  %v1315_v1 = vrot.slane %v7553_v62, 5  ;;  %v5327_v62 = vcombine.low %v7335_v5, %v7347_v21  ;;  %v5343_v21 = vrot.slane %v1263_v10, 9  ;;  %v5702_v10 = vld [vmem:[%s7061_s14 + $0x18] sm:$0xf] }
  0xa3   : > { %6185 = vmatprep.subr.bf16.mxu1 %v6849_v32 }
  0xa4   : > { %6362 = vmatmul.mubr.bf16.gmra.mrb[24].mxu0 %v5619_v36  ;;  %v5328_v36 = vcombine.low %v7358_v47, %v7369_v54  ;;  %v1317_v5 = vrot.slane %v1315_v1, 4  ;;  %v6857_v47 = vld [vmem:[%s8854_s1 + $0x1c8] sm:$0xff]   ;;  %v5344_v54 = vrot.slane %v1264_v19, 9  ;;  %v7729_v59 = vsel %vm7339_vm5, %v5342_v17, %v1315_v1  ;;  %v5703_v19 = vld [vmem:[%s7061_s14 + $0x1c] sm:$0xf] }
  0xa5   : > { %6154 = vmatmul.mubr.bf16.gmra.mrb[8].mxu1 %v5323_v34  ;;  %6365 = vmatprep.mubr.bf16.mxu0 %v5620_v33  ;;  %v1343_v34 = vrot.slane %v7617_v58, 5  ;;  %v1324_v33 = vrot.slane %v1322_v7, 4  ;;  %v5345_v58 = vrot.slane %v1265_v61, 9  ;;  %v1357_v1 = vrot.slane %v7643_v0, 5  ;;  %v6859_v0 = vld [vmem:[%s7061_s14 + $0x48] sm:$0xff]  }
  0xa6   : > { %6157 = vmatprep.mubr.bf16.mxu1 %v5324_v20  ;;  %6186 = vmatpush3.bf16.msra.mxu1 %v6849_v32  ;;  %v1336_v32 = vrot.slane %v7612_v51, 5  ;;  %v1266_v51 = vld [vmem:[%s7061_s14 + $0x30] sm:$0xe]  ;;  %v5331_v20 = vcombine.low %v7441_v31, %v7450_v48  ;;  %v7737_v25 = vsel %vm7339_vm5, %v1317_v5, %v1318_v24  ;;  %v7745_v63 = vsel %vm7339_vm5, %v5344_v54, %v1329_v13  ;;  %v1268_v13 = vld [vmem:[%s7061_s14 + $0x48] sm:$0xe] }
  0xa7   : > { %6187 = vmatprep.subr.bf16.mxu1 %v6855_v23  ;;  %v5346_v50 = vrot.slane %v1266_v51, 9  ;;  %v1345_v52 = vrot.slane %v1343_v34, 4  ;;  %v3822_v5 = vshrl.u32 %v5702_v10, 16  ;;  %v3835_v51 = vshrl.u32 %v5703_v19, 16  ;;  %v6868_v48 = vld [vmem:[%s7061_s14 + $0x6c] sm:$0xff]  }
  0xa8   : > { %v1338_v42 = vrot.slane %v1336_v32, 4  ;;  %v7757_v24 = vsel %vm7339_vm5, %v5345_v58, %v1336_v32  ;;  %v6935_v32 = vld [vmem:[%s7061_s14 + $0x44] sm:$0x1]  ;;  %v5348_v54 = vrot.slane %v1268_v13, 9  ;;  %v5706_v13 = vld [vmem:[%s7061_s14 + $0x28] sm:$0xf] }
  0xa9   : > { %v7767_v61 = vsel %vm7339_vm5, %v5346_v50, %v1343_v34  ;;  %v1353_v17 = vrot.slane %v6935_v32, 5  ;;  %v5704_v50 = vld [vmem:[%s7061_s14 + $0x20] sm:$0x1]  ;;  %v1270_v32 = vld [vmem:[%s7061_s14 + $0x60] sm:$0xe] }
  0xaa   : > { %6188 = vmatpush3.bf16.msra.mxu1 %v6855_v23  ;;  %v5332_v23 = vcombine.low %v7475_v27, %v7478_v29 }
  0xab   : > { %6189 = vmatprep.subr.bf16.mxu1 %v6861_v49 }
  0xac   : > { %6366 = vmatmul.mubr.bf16.gmra.mrb[28].mxu0 %v5621_v53  ;;  %v6934_v53 = vld [vmem:[%s7061_s14 + $0x38] sm:$0x1] }
  0xad   : > { %6158 = vmatmul.mubr.bf16.gmra.mrb[12].mxu1 %v5325_v4  ;;  %6385 = vmatprep.mubr.bf16.mxu0 %v6847_v22  ;;  %v1346_v45 = vrot.slane %v6934_v53, 5  ;;  %v1267_v4 = vld [vmem:[%s7061_s14 + $0x3c] sm:$0xe]  ;;  %v1350_v22 = vrot.slane %v7638_v30, 5  ;;  %v7733_v30 = vsel %vm7339_vm5, %v5343_v21, %v1322_v7  ;;  %v3825_v21 = vshll.u32 %v5702_v10, 16  ;;  %v6873_v53 = vld [vmem:[%s8854_s1 + $0x1e0] sm:$0xff]  }
  0xae   : > { %6161 = vmatprep.mubr.bf16.mxu1 %v5326_v55  ;;  %6190 = vmatpush3.bf16.msra.mxu1 %v6861_v49  ;;  %v1339_v49 = vrot.slane %v6933_v43, 5  ;;  %v7720_v55 = vrot.slane %v2418_v8, 5  ;;  %v6856_v7 = vld [vmem:[%s7061_s14 + $0x3c] sm:$0xff]   ;;  %v7753_v8 = vsel %vm7339_vm5, %v1331_v46, %v1332_v39  ;;  %v1359_v46 = vrot.slane %v1357_v1, 4  ;;  %v5708_v43 = vld [vmem:[%s7061_s14 + $0x30] sm:$0xf] }
  0xaf   : > { %6191 = vmatprep.subr.bf16.mxu1 %v6867_v56  ;;  %v1360_v39 = vrot.slane %v6936_v38, 5  ;;  %v3824_v10 = vrot.slane %v3822_v5, 4 }
  0xb0   : > { %8876 = vst [vmem:[#allocation2_spill] sm:$0xff] %v7720_v55 }
  0xb2   : > { %6192 = vmatpush3.bf16.msra.mxu1 %v6867_v56  ;;  %v6863_v56 = vld [vmem:[%s8854_s1 + $0x1d0] sm:$0xff]  }
  0xb3   : > { %6225 = vmatprep.subr.bf16.mxu1 %v7686_v60 }
  0xb4   : > { %6386 = vmatmul.mubr.bf16.vlgmr.msra.gmra.mrb[0].mxu0 %v6850_v6  ;;  %v7741_v6 = vsel %vm7339_vm5, %v1324_v33, %v1325_v35  ;;  %v7761_v35 = vsel %vm7339_vm5, %v1338_v42, %v1339_v49  ;;  %v3831_v33 = vshll.u32 %v5703_v19, 16  ;;  %v3827_v19 = vrot.slane %v3825_v21, 5  ;;  %v1271_v21 = vld [vmem:[%s7061_s14 + $0x6c] sm:$0xe] }
  0xb5   : > { %6162 = vmatmul.mubr.bf16.gmra.mrb[16].mxu1 %v5327_v62  ;;  %6418 = vmatpush3.bf16.msra.mxu0 %v7525_v44  ;;  %v5347_v62 = vrot.slane %v1267_v4, 9  ;;  %v5351_v58 = vrot.slane %v1271_v21, 9 }
  0xb6   : > { %6165 = vmatprep.mubr.bf16.mxu1 %v5328_v36  ;;  %6389 = vmatprep.mubr.bf16.mxu0 %v6853_v18  ;;  %v7771_v36 = vsel %vm7339_vm5, %v1345_v52, %v1346_v45  ;;  %v1352_v18 = vrot.slane %v1350_v22, 4  ;;  %v5705_v52 = vld [vmem:[%s7061_s14 + $0x24] sm:$0xf]  ;;  %v3859_v45 = vshrl.u32 %v5706_v13, 16 }
  0xb7   : > { %6419 = vmatprep.subr.bf16.mxu0 %v6857_v47  ;;  %v7788_v49 = vsel %vm7339_vm5, %v5347_v62, %v1350_v22  ;;  %v7805_v22 = vld [vmem:[%s7061_s14 + $0x54] sm:$0xe]  ;;  %v3837_v62 = vrot.slane %v3835_v51, 4  ;;  %v3846_v38 = vshrl.u32 %v5705_v52, 16  ;;  %v3849_v28 = vshll.u32 %v5705_v52, 16 }
  0xb8   : > { %v7802_v4 = vsel %vm7339_vm5, %v1352_v18, %v1353_v17  ;;  %v3841_v17 = vshll.u32 %v5704_v50, 16  ;;  %v5349_v5 = vrot.slane %v7805_v22, 9  ;;  %v6877_v50 = vld [vmem:[%s8854_s1 + $0x1e8] sm:$0xff]   ;;  %v1366_v52 = vrot.slane %v1364_v16, 4 }
  0xb9   : > { %6420 = vmatpush3.bf16.msra.mxu0 %v6857_v47  ;;  %v6869_v47 = vld [vmem:[%s8854_s1 + $0x1d8] sm:$0xff]   ;;  %v3828_v22 = vor.u32 %v3827_v19, %v3824_v10  ;;  %v3848_v34 = vrot.slane %v3846_v38, 4  ;;  %v3851_v44 = vrot.slane %v3849_v28, 5  ;;  %v6941_v10 = vld [vmem:[%s7061_s14 + $0x74] sm:$0x1]  ;;  %v3861_v28 = vrot.slane %v3859_v45, 4 }
  0xba   : > { %6421 = vmatprep.subr.bf16.mxu0 %v6863_v56  ;;  %v7843_v42 = vrot.slane %v3841_v17, 5  ;;  %v1381_v19 = vrot.slane %v6941_v10, 5  ;;  %v3870_v38 = vshrl.u32 %v5708_v43, 16  ;;  %v7868_v27 = vsel %vm7339_vm5, %v5349_v5, %v1364_v16 }
  0xbb   : > { %v3829_v21 = vrot.slane %v3828_v22, 4 }
  0xbc   : > { %6390 = vmatmul.mubr.bf16.gmra.mrb[4].mxu0 %v6856_v7  ;;  %v7815_v7 = vrot.slane %v3831_v33, 5  ;;  %v6939_v33 = vld [vmem:[%s7061_s14 + $0x70] sm:$0xf] }
  0xbd   : > { %6166 = vmatmul.mubr.bf16.gmra.mrb[20].mxu1 %v5329_v15  ;;  %6393 = vmatprep.mubr.bf16.mxu0 %v6859_v0  ;;  %v1371_v15 = vrot.slane %v7809_v40, 5  ;;  %v6938_v0 = vld [vmem:[%s7061_s14 + $0x5c] sm:$0x1]  ;;  %v1378_v51 = vrot.slane %v6939_v33, 5 }
  0xbe   : > { %6169 = vmatprep.mubr.bf16.mxu1 %v5330_v26  ;;  %6422 = vmatpush3.bf16.msra.mxu0 %v6863_v56  ;;  %v1367_v18 = vrot.slane %v6938_v0, 5  ;;  %v7824_v26 = vsel %vm7339_vm5, %v5348_v54, %v1357_v1  ;;  %v7828_v56 = vsel %vm7339_vm5, %v1359_v46, %v1360_v39  ;;  %v6940_v1 = vld [vmem:[%s7061_s14 + $0x68] sm:$0x1]  ;;  %v3855_v0 = vshll.u32 %v5706_v13, 16  ;;  %v6885_v40 = vld [vmem:[%s8854_s1 + $0x1f8] sm:$0xff]  }
  0xbf   : > { %6423 = vmatprep.subr.bf16.mxu0 %v6869_v47  ;;  %v1374_v54 = vrot.slane %v6940_v1, 5  ;;  %v5350_v46 = vrot.slane %v1270_v32, 9  ;;  %v1373_v39 = vrot.slane %v1371_v15, 4  ;;  %v3838_v33 = vor.u32 %v3837_v62, %v7815_v7  ;;  %v5709_v1 = vld [vmem:[%s7061_s14 + $0x34] sm:$0xf] }
  0xc0   : > { %v1380_v32 = vrot.slane %v1378_v51, 4  ;;  %v5707_v62 = vld [vmem:[%s7061_s14 + $0x2c] sm:$0x1]  ;;  %v7855_v17 = vrot.slane %v3855_v0, 5  ;;  %v3879_v13 = vshll.u32 %v5709_v1, 16  ;;  %v3883_v31 = vshrl.u32 %v5709_v1, 16 }
  0xc1   : > { %v3839_v10 = vrot.slane %v3838_v33, 4  ;;  %v7872_v29 = vsel %vm7339_vm5, %v1366_v52, %v1367_v18  ;;  %v7879_v45 = vsel %vm7339_vm5, %v5350_v46, %v1371_v15  ;;  %v7883_v14 = vsel %vm7339_vm5, %v1373_v39, %v1374_v54  ;;  %v1272_v18 = vld [vmem:[%s7061_s14 + $0x78] sm:$0xe] }
  0xc2   : > { %6424 = vmatpush3.bf16.msra.mxu0 %v6869_v47  ;;  %v7887_v16 = vsel %vm7339_vm5, %v5351_v58, %v1378_v51  ;;  %v7897_v15 = vsel %vm7339_vm5, %v1380_v32, %v1381_v19  ;;  %v3862_v5 = vor.u32 %v3861_v28, %v7855_v17  ;;  %v3872_v52 = vrot.slane %v3870_v38, 4  ;;  %v5711_v58 = vld [vmem:[%s7061_s14 + $0x3c] sm:$0xf]  ;;  %v5712_v51 = vld [vmem:[%s7061_s14 + $0x40] sm:$0xf] }
  0xc3   : > { %6425 = vmatprep.subr.bf16.mxu0 %v6873_v53  ;;  %v3834_v0 = vsel %vm7093_vm2, %v3829_v21, %v7815_v7  ;;  %v3844_v46 = vsel %vm7093_vm2, %v3839_v10, %v7843_v42  ;;  %v7908_v39 = vrot.slane %v3879_v13, 5  ;;  %v3885_v22 = vrot.slane %v3883_v31, 4  ;;  %v6943_v19 = vld [vmem:[%s7061_s14 + $0x80] sm:$0x1]  ;;  %v8067_v47 = vld [vmem:[%s7061_s14 + $0x68] sm:$0x1] }
  0xc4   : > { %6394 = vmatmul.mubr.bf16.gmra.mrb[8].mxu0 %v6862_v2  ;;  %v3873_v2 = vshll.u32 %v5708_v43, 16  ;;  %v3865_v43 = vshll.u32 %v5707_v62, 16  ;;  %v5352_v32 = vrot.slane %v1272_v18, 9  ;;  %v1273_v62 = vld [vmem:[%s7061_s14 + $0x84] sm:$0xe]  ;;  %v3894_v28 = vshrl.u32 %v5711_v58, 16 }
  0xc5   : > { %6170 = vmatmul.mubr.bf16.gmra.mrb[24].mxu1 %v5331_v20  ;;  %6397 = vmatprep.mubr.bf16.mxu0 %v6865_v3  ;;  %v6881_v20 = vld [vmem:[%s8854_s1 + $0x1f0] sm:$0xff]   ;;  %v6942_v3 = vld [vmem:[%s7061_s14 + $0x7c] sm:$0xf]  ;;  %v3897_v7 = vshll.u32 %v5711_v58, 16  ;;  %v3903_v38 = vshll.u32 %v5712_v51, 16  ;;  %v8877_v42 = vcombine.low %v7498_v41, %v7503_v12  ;;  %v7919_v13 = vrot.slane %v3862_v5, 4 }
  0xc6   : > { %6173 = vmatprep.mubr.bf16.mxu1 %v5332_v23  ;;  %6426 = vmatpush3.bf16.msra.mxu0 %v6873_v53  ;;  %v3852_v23 = vor.u32 %v3851_v44, %v3848_v34  ;;  %v6870_v53 = vld [vmem:[%s7061_s14 + $0x78] sm:$0xff]   ;;  %v1385_v44 = vrot.slane %v6942_v3, 5  ;;  %v3875_v54 = vrot.slane %v3873_v2, 5  ;;  %v7912_v1 = vrot.slane %v3865_v43, 5  ;;  %v7924_v21 = vld [vmem:[%s8854_s1 + $0x200] sm:$0xff]   ;;  %8885 = vst [vmem:[#allocation5_spill] sm:$0xff] %v8067_v47 }
  0xc7   : > { %6427 = vmatprep.subr.bf16.mxu0 %v6877_v50  ;;  %v5710_v34 = vld [vmem:[%s7061_s14 + $0x38] sm:$0x1]  ;;  %v3907_v2 = vshrl.u32 %v5712_v51, 16  ;;  %v6872_v43 = vld [vmem:[%s7061_s14 + $0x84] sm:$0xff]   ;;  %v3886_v12 = vor.u32 %v3885_v22, %v7908_v39  ;;  %v3899_v58 = vrot.slane %v3897_v7, 5  ;;  %v7946_v51 = vrot.slane %v3903_v38, 5 }
  0xc8   : > { %v7910_v33 = vrot.slane %v3852_v23, 4  ;;  %v1387_v10 = vrot.slane %v1385_v44, 4  ;;  %v3876_v31 = vor.u32 %v3875_v54, %v3872_v52  ;;  %v8878_v23 = vcombine.low %v7729_v59, %v7737_v25  ;;  %v6944_v18 = vld [vmem:[%s7061_s14 + $0x88] sm:$0xf]  ;;  %v5713_v5 = vld [vmem:[%s7061_s14 + $0x44] sm:$0x1] }
  0xc9   : > { %v1392_v3 = vrot.slane %v6944_v18, 5  ;;  %v7937_v59 = vcombine.low %v3834_v0, %v3844_v46  ;;  %v5714_v52 = vld [vmem:[%s7061_s14 + $0x48] sm:$0xf]  ;;  %v3896_v54 = vrot.slane %v3894_v28, 4  ;;  %v3909_v22 = vrot.slane %v3907_v2, 4 }
  0xca   : > { %6428 = vmatpush3.bf16.msra.mxu0 %v6877_v50  ;;  %v1388_v50 = vrot.slane %v6943_v19, 5  ;;  %v6874_v19 = vld [vmem:[%s7061_s14 + $0x90] sm:$0xff]   ;;  %v3858_v0 = vsel %vm7093_vm2, %v7910_v33, %v7855_v17  ;;  %v3877_v46 = vrot.slane %v3876_v31, 4  ;;  %v3868_v28 = vsel %vm7093_vm2, %v7919_v13, %v7912_v1  ;;  %v7968_v33 = vld [vmem:[%s7061_s14 + $0x58] sm:$0xf]  ;;  %v6875_v31 = vld [vmem:[%s8854_s1 + $0xc8] sm:$0xff]  }
  0xcb   : > { %6429 = vmatprep.subr.bf16.mxu0 %v6881_v20  ;;  %v3887_v38 = vrot.slane %v3886_v12, 4  ;;  %v1394_v2 = vrot.slane %v1392_v3, 4  ;;  %v5717_v17 = vld [vmem:[%s7061_s14 + $0x54] sm:$0xf]  ;;  %v3913_v1 = vshll.u32 %v5713_v5, 16  ;;  %v3918_v13 = vshrl.u32 %v5714_v52, 16 }
  0xcc   : > { %6398 = vmatmul.mubr.bf16.gmra.mrb[12].mxu0 %v6868_v48  ;;  %v3889_v48 = vshll.u32 %v5710_v34, 16  ;;  %v7964_v7 = vsel %vm7339_vm5, %v1387_v10, %v1388_v50  ;;  %v3921_v50 = vshll.u32 %v5714_v52, 16  ;;  %v3900_v10 = vor.u32 %v3899_v58, %v3896_v54  ;;  %v6876_v54 = vld [vmem:[%s7061_s14 + $0x9c] sm:$0xff]   ;;  %v6950_v41 = vld [vmem:[%s7061_s14 + $0xac] sm:$0xf] }
  0xcd   : > { %6174 = vmatmul.mubr.bf16.gmra.mrb[28].mxu1 %v8877_v42  ;;  %6401 = vmatprep.mubr.bf16.mxu0 %v6870_v53  ;;  %v5353_v53 = vrot.slane %v1273_v62, 9  ;;  %v6945_v42 = vld [vmem:[%s7061_s14 + $0x8c] sm:$0x1]  ;;  %v3951_v5 = vshll.u32 %v7968_v33, 16  ;;  %v8880_v52 = vcombine.low %v7745_v63, %v7753_v8  ;;  %v8004_v63 = vld [vmem:[%s7061_s14 + $0x50] sm:$0x1] }
  0xce   : > { %6193 = vmatprep.mubr.bf16.mxu1 %v8878_v23  ;;  %6430 = vmatpush3.bf16.msra.mxu0 %v6881_v20  ;;  %v7943_v20 = vsel %vm7339_vm5, %v5352_v32, %v1385_v44  ;;  %v3891_v62 = vrot.slane %v3889_v48, 5  ;;  %v1395_v23 = vrot.slane %v6945_v42, 5  ;;  %v1274_v44 = vld [vmem:[%s7061_s14 + $0x90] sm:$0xe]  ;;  %v7956_v32 = vld [vmem:[%s7061_s14 + $0x4c] sm:$0xf]  ;;  %v3910_v48 = vor.u32 %v3909_v22, %v7946_v51 }
  0xcf   : > { %6431 = vmatprep.subr.bf16.mxu0 %v6885_v40  ;;  %v3927_v12 = vshll.u32 %v7956_v32, 16  ;;  %v3931_v18 = vshrl.u32 %v7956_v32, 16  ;;  %v8879_v42 = vcombine.low %v7733_v30, %v7741_v6  ;;  %v6879_v30 = vld [vmem:[%s8854_s1 + $0xd0] sm:$0xff]   ;;  %v3882_v6 = vsel %vm7093_vm2, %v3877_v46, %v7908_v39  ;;  %v6878_v8 = vld [vmem:[%s7061_s14 + $0xa8] sm:$0xff]   ;;  %v8011_v39 = vld [vmem:[%s7061_s14 + $0x5c] sm:$0x1] }
  0xd0   : > { %v3892_v58 = vsel %vm7093_vm2, %v3887_v38, %v3891_v62  ;;  %v5354_v22 = vrot.slane %v1274_v44, 9  ;;  %v3923_v25 = vrot.slane %v3921_v50, 5  ;;  %8881 = vst [vmem:[#allocation3_spill] sm:$0xff] %v8011_v39  ;;  %v3901_v46 = vrot.slane %v3900_v10, 4 }
  0xd1   : > { %v3911_v62 = vrot.slane %v3910_v48, 4  ;;  %v8013_v38 = vrot.slane %v3927_v12, 5  ;;  %v8015_v34 = vrot.slane %v3951_v5, 5  ;;  %v8020_v50 = vcombine.low %v3858_v0, %v3868_v28  ;;  %v5720_v28 = vld [vmem:[%s7061_s14 + $0x60] sm:$0xf] }
  0xd2   : > { %6432 = vmatpush3.bf16.msra.mxu0 %v6885_v40  ;;  %v7976_v40 = vsel %vm7339_vm5, %v5353_v53, %v1392_v3  ;;  %v3942_v53 = vshrl.u32 %v5717_v17, 16  ;;  %v3945_v3 = vshll.u32 %v5717_v17, 16  ;;  %v6946_v17 = vld [vmem:[%s7061_s14 + $0x94] sm:$0xf]  ;;  %v8024_v48 = vcombine.low %v3882_v6, %v3892_v58 }
  0xd3   : > { %6465 = vmatprep.subr.bf16.mxu0 %v7924_v21  ;;  %v3937_v0 = vshll.u32 %v8004_v63, 16  ;;  %v3906_v6 = vsel %vm7093_vm2, %v3901_v46, %v7946_v51  ;;  %v8884_v46 = vcombine.low %v7767_v61, %v7771_v36 }
  0xd4   : > { %6402 = vmatmul.mubr.bf16.gmra.mrb[16].mxu0 %v6872_v43  ;;  %v3955_v43 = vshrl.u32 %v7968_v33, 16  ;;  %v3944_v44 = vrot.slane %v3942_v53, 4  ;;  %v6947_v53 = vld [vmem:[%s7061_s14 + $0x98] sm:$0x1] }
  0xd5   : > { %6194 = vmatmul.mubr.bf16.vlgmr.msra.gmra.mrb[0].mxu1 %v8879_v42  ;;  %6405 = vmatprep.mubr.bf16.mxu0 %v6874_v19  ;;  %v8007_v19 = vrot.slane %v3913_v1, 5  ;;  %v1399_v42 = vrot.slane %v6946_v17, 5  ;;  %v6948_v17 = vld [vmem:[%s7061_s14 + $0xa0] sm:$0xf]  ;;  %v3939_v36 = vrot.slane %v3937_v0, 5 }
  0xd6   : > { %6226 = vmatpush3.bf16.msra.mxu1 %v7686_v60  ;;  %6197 = vmatprep.mubr.bf16.mxu1 %v8880_v52  ;;  %v8001_v60 = vsel %vm7339_vm5, %v1394_v2, %v1395_v23  ;;  %v3920_v52 = vrot.slane %v3918_v13, 4  ;;  %v3933_v23 = vrot.slane %v3931_v18, 4  ;;  %v3947_v2 = vrot.slane %v3945_v3, 5  ;;  %v6883_v13 = vld [vmem:[%s8854_s1 + $0xd8] sm:$0xff]  }
  0xd7   : > { %6227 = vmatprep.subr.bf16.mxu1 %v6875_v31  ;;  %v3957_v1 = vrot.slane %v3955_v43, 4  ;;  %v1275_v18 = vld [vmem:[%s7061_s14 + $0x9c] sm:$0xe]  ;;  %v1402_v3 = vrot.slane %v6947_v53, 5  ;;  %v8037_v43 = vld [vmem:[%s7061_s14 + $0x64] sm:$0xf] }
  0xd8   : > { %v3924_v5 = vor.u32 %v3923_v25, %v3920_v52  ;;  %8882 = vst [vmem:[#allocation4_spill] sm:$0xff] %v8037_v43  ;;  %v3934_v58 = vor.u32 %v3933_v23, %v8013_v38  ;;  %v1406_v12 = vrot.slane %v6948_v17, 5  ;;  %v8883_v25 = vcombine.low %v7757_v24, %v7761_v35  ;;  %v6880_v23 = vld [vmem:[%s7061_s14 + $0xb4] sm:$0xff]   ;;  %v6886_v24 = vld [vmem:[%s8854_s1 + $0xe0] sm:$0xff]   ;;  %v5723_v17 = vld [vmem:[%s7061_s14 + $0x6c] sm:$0xf] }
  0xd9   : > { %v1401_v52 = vrot.slane %v1399_v42, 4  ;;  %v3948_v53 = vor.u32 %v3947_v2, %v3944_v44  ;;  %v3958_v51 = vor.u32 %v3957_v1, %v8015_v34  ;;  %v3966_v35 = vshrl.u32 %v5720_v28, 16  ;;  %v6949_v2 = vld [vmem:[%s7061_s14 + $0xa4] sm:$0x1] }
  0xda   : > { %6228 = vmatpush3.bf16.msra.mxu1 %v6875_v31  ;;  %v8031_v31 = vsel %vm7339_vm5, %v5354_v22, %v1399_v42  ;;  %v3961_v22 = vshll.u32 %v8011_v39, 16  ;;  %v3979_v42 = vshrl.u32 %v8037_v43, 16  ;;  %v3925_v61 = vrot.slane %v3924_v5, 4  ;;  %v8206_v39 = vld [vmem:[%s7061_s14 + $0x98] sm:$0x1] }
  0xdb   : > { %6229 = vmatprep.subr.bf16.mxu1 %v6879_v30  ;;  %v5355_v44 = vrot.slane %v1275_v18, 9  ;;  %v1409_v1 = vrot.slane %v6949_v2, 5  ;;  %v3949_v5 = vrot.slane %v3948_v53, 4  ;;  %v3959_v18 = vrot.slane %v3958_v51, 4  ;;  %8898 = vst [vmem:[#allocation14_spill] sm:$0xff] %v8206_v39 }
  0xdc   : > { %6406 = vmatmul.mubr.bf16.gmra.mrb[20].mxu0 %v6876_v54  ;;  %v3916_v54 = vsel %vm7093_vm2, %v3911_v62, %v8007_v19  ;;  %v3975_v19 = vshll.u32 %v8037_v43, 16  ;;  %v6882_v62 = vld [vmem:[%s7061_s14 + $0xc0] sm:$0xff]   ;;  %v3963_v10 = vrot.slane %v3961_v22, 5  ;;  %v8073_v43 = vsel %vm7339_vm5, %v1401_v52, %v1402_v3 }
  0xdd   : > { %6198 = vmatmul.mubr.bf16.gmra.mrb[4].mxu1 %v8883_v25  ;;  %6409 = vmatprep.mubr.bf16.mxu0 %v6878_v8  ;;  %v3969_v8 = vshll.u32 %v5720_v28, 16  ;;  %v3935_v25 = vrot.slane %v3934_v58, 4  ;;  %v1413_v28 = vrot.slane %v6950_v41, 5  ;;  %v8069_v55 = vcombine.low %v3906_v6, %v3916_v54  ;;  %v6888_v41 = vld [vmem:[%s8854_s1 + $0xe8] sm:$0xff]  }
  0xde   : > { %6201 = vmatprep.mubr.bf16.mxu1 %v8884_v46  ;;  %6230 = vmatpush3.bf16.msra.mxu1 %v6879_v30  ;;  %v1276_v30 = vld [vmem:[%s7061_s14 + $0xa8] sm:$0xe]  ;;  %v1408_v46 = vrot.slane %v1406_v12, 4  ;;  %v3968_v0 = vrot.slane %v3966_v35, 4  ;;  %v8075_v58 = vrot.slane %v3975_v19, 5  ;;  %v3981_v22 = vrot.slane %v3979_v42, 4 }
  0xdf   : > { %6231 = vmatprep.subr.bf16.mxu1 %v6883_v13  ;;  %v3971_v2 = vrot.slane %v3969_v8, 5  ;;  %v3930_v3 = vsel %vm7093_vm2, %v3925_v61, %v8013_v38  ;;  %v8085_v6 = vsel %vm7339_vm5, %v5355_v44, %v1406_v12  ;;  %v3990_v54 = vshrl.u32 %v5723_v17, 16  ;;  %v6951_v38 = vld [vmem:[%s7061_s14 + $0xb0] sm:$0x1]  ;;  %v1277_v19 = vld [vmem:[%s7061_s14 + $0xb4] sm:$0xe] }
  0xe0   : > { %v3993_v52 = vshll.u32 %v5723_v17, 16  ;;  %v3940_v53 = vsel %vm7093_vm2, %v3935_v25, %v3939_v36  ;;  %v8094_v51 = vsel %vm7339_vm5, %v1408_v46, %v1409_v1  ;;  %v5356_v35 = vrot.slane %v1276_v30, 9  ;;  %v8116_v30 = vld [vmem:[%s7061_s14 + $0x74] sm:$0x1]  ;;  %v6952_v25 = vld [vmem:[%s7061_s14 + $0xb8] sm:$0xf] }
  0xe1   : > { %v1416_v8 = vrot.slane %v6951_v38, 5  ;;  %v8887_v12 = vcombine.low %v7788_v49, %v7802_v4  ;;  %v3954_v42 = vsel %vm7093_vm2, %v3949_v5, %v8015_v34  ;;  %v3964_v61 = vsel %vm7093_vm2, %v3959_v18, %v3963_v10  ;;  %v6884_v4 = vld [vmem:[%s7061_s14 + $0xcc] sm:$0xff]   ;;  %8889 = vst [vmem:[#allocation7_spill] sm:$0xff] %v8116_v30  ;;  %v5729_v38 = vld [vmem:[%s7061_s14 + $0x84] sm:$0xf] }
  0xe2   : > { %6232 = vmatpush3.bf16.msra.mxu1 %v6883_v13  ;;  %v8088_v13 = vld [vmem:[%s7061_s14 + $0x70] sm:$0xf]  ;;  %v1415_v36 = vrot.slane %v1413_v28, 4  ;;  %v3985_v44 = vshll.u32 %v8067_v47, 16  ;;  %v8888_v49 = vcombine.low %v7824_v26, %v7828_v56  ;;  %v3982_v1 = vor.u32 %v3981_v22, %v8075_v58  ;;  %v8133_v22 = vld [vmem:[%s7061_s14 + $0x7c] sm:$0xf] }
  0xe3   : > { %6233 = vmatprep.subr.bf16.mxu1 %v6886_v24  ;;  %8886 = vst [vmem:[#allocation6_spill] sm:$0xff] %v8088_v13  ;;  %v3999_v34 = vshll.u32 %v8088_v13, 16  ;;  %v4003_v10 = vshrl.u32 %v8088_v13, 16  ;;  %v5357_v17 = vrot.slane %v1277_v19, 9  ;;  %v1420_v46 = vrot.slane %v6952_v25, 5  ;;  %8890 = vst [vmem:[#allocation8_spill] sm:$0xff] %v8133_v22 }
  0xe4   : > { %6410 = vmatmul.mubr.bf16.gmra.mrb[24].mxu0 %v6880_v23  ;;  %v6890_v23 = vld [vmem:[%s8854_s1 + $0xf0] sm:$0xff]   ;;  %v3992_v26 = vrot.slane %v3990_v54, 4  ;;  %v3995_v56 = vrot.slane %v3993_v52, 5  ;;  %v8124_v18 = vcombine.low %v3930_v3, %v3940_v53  ;;  %v8136_v19 = vcombine.low %v3954_v42, %v3964_v61  ;;  %v6953_v3 = vld [vmem:[%s7061_s14 + $0xbc] sm:$0x1] }
  0xe5   : > { %6202 = vmatmul.mubr.bf16.gmra.mrb[8].mxu1 %v8887_v12  ;;  %6413 = vmatprep.mubr.bf16.mxu0 %v6882_v62  ;;  %v3972_v62 = vor.u32 %v3971_v2, %v3968_v0  ;;  %v8130_v2 = vsel %vm7339_vm5, %v5356_v35, %v1413_v28  ;;  %v8140_v54 = vsel %vm7339_vm5, %v1415_v36, %v1416_v8  ;;  %v8142_v52 = vrot.slane %v3985_v44, 5  ;;  %v6892_v12 = vld [vmem:[%s8854_s1 + $0xf8] sm:$0xff]   ;;  %v8149_v28 = vld [vmem:[%s7061_s14 + $0x88] sm:$0xf] }
  0xe6   : > { %6205 = vmatprep.mubr.bf16.mxu1 %v8888_v49  ;;  %6234 = vmatpush3.bf16.msra.mxu1 %v6886_v24  ;;  %v5726_v24 = vld [vmem:[%s7061_s14 + $0x78] sm:$0xf]  ;;  %v1423_v53 = vrot.slane %v6953_v3, 5  ;;  %8891 = vst [vmem:[#allocation9_spill] sm:$0xff] %v8149_v28  ;;  %v8153_v42 = vrot.slane %v3982_v1, 4  ;;  %v8155_v61 = vrot.slane %v3999_v34, 5  ;;  %v8159_v36 = vsel %vm7339_vm5, %v5357_v17, %v1420_v46 }
  0xe7   : > { %6235 = vmatprep.subr.bf16.mxu1 %v6888_v41  ;;  %v8151_v35 = vrot.slane %v3972_v62, 4  ;;  %v4005_v8 = vrot.slane %v4003_v10, 4  ;;  %v1422_v44 = vrot.slane %v1420_v46, 4  ;;  %v3996_v49 = vor.u32 %v3995_v56, %v3992_v26  ;;  %v5732_v3 = vld [vmem:[%s7061_s14 + $0x90] sm:$0xf] }
  0xe8   : > { %v4009_v25 = vshll.u32 %v8116_v30, 16  ;;  %v4017_v0 = vshll.u32 %v5726_v24, 16  ;;  %v4023_v62 = vshll.u32 %v8133_v22, 16  ;;  %v4027_v1 = vshrl.u32 %v8133_v22, 16  ;;  %v8166_v34 = vld [vmem:[%s7061_s14 + $0x94] sm:$0xf] }
  0xe9   : > { %8892 = vst [vmem:[#allocation10_spill] sm:$0xff] %v8166_v34  ;;  %v8893_v10 = vcombine.low %v7868_v27, %v7872_v29  ;;  %v4038_v17 = vshrl.u32 %v5729_v38, 16  ;;  %v4041_v46 = vshll.u32 %v5729_v38, 16  ;;  %v4051_v26 = vshrl.u32 %v8149_v28, 16  ;;  %v5735_v38 = vld [vmem:[%s7061_s14 + $0x9c] sm:$0xf] }
  0xea   : > { %6236 = vmatpush3.bf16.msra.mxu1 %v6888_v41  ;;  %v4014_v41 = vshrl.u32 %v5726_v24, 16  ;;  %v8894_v56 = vcombine.low %v7879_v45, %v7883_v14  ;;  %v4006_v29 = vor.u32 %v4005_v8, %v8155_v61  ;;  %v4065_v24 = vshll.u32 %v5732_v3, 16  ;;  %v8188_v45 = vld [vmem:[%s7061_s14 + $0x80] sm:$0x1] }
  0xeb   : > { %6237 = vmatprep.subr.bf16.mxu1 %v6890_v23  ;;  %v8185_v5 = vrot.slane %v4009_v25, 5  ;;  %8895 = vst [vmem:[#allocation11_spill] sm:$0xff] %v8188_v45  ;;  %v4071_v14 = vshll.u32 %v8166_v34, 16  ;;  %v4019_v27 = vrot.slane %v4017_v0, 5  ;;  %v4029_v8 = vrot.slane %v4027_v1, 4 }
  0xec   : > { %6414 = vmatmul.mubr.bf16.gmra.mrb[28].mxu0 %v6884_v4  ;;  %v4047_v4 = vshll.u32 %v8149_v28, 16  ;;  %v8192_v28 = vrot.slane %v4023_v62, 5  ;;  %v8198_v22 = vld [vmem:[%s7061_s14 + $0xa0] sm:$0xf]  ;;  %v4040_v25 = vrot.slane %v4038_v17, 4  ;;  %v4043_v30 = vrot.slane %v4041_v46, 5 }
  0xed   : > { %6206 = vmatmul.mubr.bf16.gmra.mrb[12].mxu1 %v8893_v10  ;;  %6433 = vmatprep.mubr.bf16.mxu0 %v7937_v59  ;;  %v4062_v59 = vshrl.u32 %v5732_v3, 16  ;;  %v8183_v10 = vrot.slane %v3996_v49, 4  ;;  %v8195_v3 = vld [vmem:[%s7061_s14 + $0x8c] sm:$0x1]  ;;  %8897 = vst [vmem:[#allocation13_spill] sm:$0xff] %v8198_v22  ;;  %v4053_v47 = vrot.slane %v4051_v26, 4  ;;  %v8215_v62 = vsel %vm7339_vm5, %v1422_v44, %v1423_v53 }
  0xee   : > { %6209 = vmatprep.mubr.bf16.mxu1 %v8894_v56  ;;  %6238 = vmatpush3.bf16.msra.mxu1 %v6890_v23  ;;  %v4075_v23 = vshrl.u32 %v8166_v34, 16  ;;  %v4016_v56 = vrot.slane %v4014_v41, 4  ;;  %8896 = vst [vmem:[#allocation12_spill] sm:$0xff] %v8195_v3  ;;  %v6889_v49 = vld [vmem:[%s8854_s1 + $0x208] sm:$0xff]   ;;  %v8203_v13 = vrot.slane %v4047_v4, 5  ;;  %v4067_v34 = vrot.slane %v4065_v24, 5 }
  0xef   : > { %6239 = vmatprep.subr.bf16.mxu1 %v6892_v12  ;;  %v5738_v41 = vld [vmem:[%s7061_s14 + $0xa8] sm:$0xf]  ;;  %v4064_v1 = vrot.slane %v4062_v59, 4  ;;  %v8220_v17 = vld [vmem:[%s8854_s1 + $0x100] sm:$0xff]   ;;  %v8223_v46 = vrot.slane %v4071_v14, 5  ;;  %v4086_v26 = vshrl.u32 %v5735_v38, 16  ;;  %v8900_v24 = vcombine.low %v7887_v16, %v7897_v15 }
  0xf0   : > { %8899 = vst [vmem:[#allocation15_spill] sm:$0xff] %v8220_v17  ;;  %v4077_v4 = vrot.slane %v4075_v23, 4  ;;  %v4089_v0 = vshll.u32 %v5735_v38, 16  ;;  %v8226_v53 = vrot.slane %v4006_v29, 4  ;;  %v4095_v44 = vshll.u32 %v8198_v22, 16  ;;  %v6891_v16 = vld [vmem:[%s8854_s1 + $0x210] sm:$0xff]  }
  0xf1   : > { %v4099_v59 = vshrl.u32 %v8198_v22, 16  ;;  %v4020_v14 = vor.u32 %v4019_v27, %v4016_v56  ;;  %v4030_v38 = vor.u32 %v4029_v8, %v8192_v28  ;;  %v4044_v23 = vor.u32 %v4043_v30, %v4040_v25  ;;  %v8238_v29 = vld [vmem:[%s7061_s14 + $0xac] sm:$0xf]  ;;  %v8251_v25 = vld [vmem:[%s7061_s14 + $0xa4] sm:$0x1] }
  0xf2   : > { %6240 = vmatpush3.bf16.msra.mxu1 %v6892_v12  ;;  %v4033_v12 = vshll.u32 %v8188_v45, 16  ;;  %8901 = vst [vmem:[#allocation16_spill] sm:$0xff] %v8238_v29  ;;  %v4054_v15 = vor.u32 %v4053_v47, %v8203_v13  ;;  %v4110_v27 = vshrl.u32 %v5738_v41, 16  ;;  %v4113_v30 = vshll.u32 %v5738_v41, 16 }
  0xf3   : > { %6513 = vmatprep.subr.bf16.mxu1 %v8220_v17  ;;  %v8902_v17 = vcombine.low %v7943_v20, %v7964_v7  ;;  %v4068_v56 = vor.u32 %v4067_v34, %v4064_v1  ;;  %v4078_v8 = vor.u32 %v4077_v4, %v8223_v46  ;;  %v4088_v20 = vrot.slane %v4086_v26, 4 }
  0xf4   : > { %6434 = vmatmul.mubr.bf16.vlgmr.msra.gmra.mrb[0].mxu0 %v8020_v50  ;;  %v4057_v50 = vshll.u32 %v8195_v3, 16  ;;  %v4091_v7 = vrot.slane %v4089_v0, 5  ;;  %v4123_v22 = vshrl.u32 %v8238_v29, 16  ;;  %v4021_v47 = vrot.slane %v4020_v14, 4  ;;  %v6893_v0 = vld [vmem:[%s8854_s1 + $0x218] sm:$0xff]  }
  0xf5   : > { %6210 = vmatmul.mubr.bf16.gmra.mrb[16].mxu1 %v8900_v24  ;;  %6466 = vmatpush3.bf16.msra.mxu0 %v7924_v21  ;;  %v4081_v21 = vshll.u32 %v8206_v39, 16  ;;  %v4119_v24 = vshll.u32 %v8238_v29, 16  ;;  %v4031_v39 = vrot.slane %v4030_v38, 4  ;;  %v4035_v3 = vrot.slane %v4033_v12, 5 }
  0xf6   : > { %6213 = vmatprep.mubr.bf16.mxu1 %v8902_v17  ;;  %6437 = vmatprep.mubr.bf16.mxu0 %v8024_v48  ;;  %v8253_v17 = vrot.slane %v4095_v44, 5  ;;  %v4101_v48 = vrot.slane %v4099_v59, 4  ;;  %v4059_v41 = vrot.slane %v4057_v50, 5  ;;  %v4045_v34 = vrot.slane %v4044_v23, 4 }
  0xf7   : > { %6467 = vmatprep.subr.bf16.mxu0 %v6889_v49  ;;  %v4055_v1 = vrot.slane %v4054_v15, 4  ;;  %v4112_v4 = vrot.slane %v4110_v27, 4  ;;  %v4115_v45 = vrot.slane %v4113_v30, 5  ;;  %v4069_v26 = vrot.slane %v4068_v56, 4  ;;  %v8319_v27 = vld [vmem:[%s7061_s14 + $0xbc] sm:$0x1] }
  0xf8   : > { %v4083_v44 = vrot.slane %v4081_v21, 5  ;;  %v4092_v59 = vor.u32 %v4091_v7, %v4088_v20  ;;  %v4105_v29 = vshll.u32 %v8251_v25, 16  ;;  %v4102_v12 = vor.u32 %v4101_v48, %v8253_v17  ;;  %v8286_v21 = vld [vmem:[%s7061_s14 + $0xb0] sm:$0x1] }
  0xf9   : > { %6468 = vmatpush3.bf16.msra.mxu0 %v6889_v49  ;;  %v4079_v49 = vrot.slane %v4078_v8, 4  ;;  %v8263_v14 = vrot.slane %v4119_v24, 5  ;;  %v4125_v38 = vrot.slane %v4123_v22, 4  ;;  %v8903_v23 = vor.u32 %v7671_v57, %v7669_v11 }
  0xfa   : > { %6469 = vmatprep.subr.bf16.mxu0 %v6891_v16  ;;  %v8904_v15 = vcombine.low %v7976_v40, %v8001_v60  ;;  %v4012_v22 = vsel %vm7093_vm2, %v8226_v53, %v8185_v5  ;;  %v4026_v57 = vsel %vm7093_vm2, %v4021_v47, %v8192_v28  ;;  %v8905_v40 = vcombine.low %v8031_v31, %v8073_v43  ;;  %v6896_v31 = vld [vmem:[%s8854_s1 + $0x220] sm:$0xff]  }
  0xfb   : > { %v8268_v50 = vrot.slane %v8903_v23, 4  ;;  %v4036_v60 = vsel %vm7093_vm2, %v4031_v39, %v4035_v3  ;;  %v4116_v5 = vor.u32 %v4115_v45, %v4112_v4  ;;  %v4060_v28 = vsel %vm7093_vm2, %v4055_v1, %v4059_v41  ;;  %v5794_v41 = vld [vmem:[%s7061_s14 + $0x48] sm:$0xe] }
  0xfc   : > { %6438 = vmatmul.mubr.bf16.gmra.mrb[4].mxu0 %v8069_v55  ;;  %v4002_v55 = vsel %vm7093_vm2, %v8183_v10, %v8155_v61  ;;  %v5741_v61 = vld [vmem:[%s7061_s14 + $0xb4] sm:$0xf]  ;;  %v8298_v10 = vld [vmem:[%s7061_s14 + $0xb8] sm:$0xf]  ;;  %v4074_v39 = vsel %vm7093_vm2, %v4069_v26, %v8223_v46  ;;  %v8308_v43 = vrot.slane %v4092_v59, 4  ;;  %v8310_v3 = vrot.slane %v4105_v29, 5 }
  0xfd   : > { %6214 = vmatmul.mubr.bf16.gmra.mrb[20].mxu1 %v8904_v15  ;;  %6441 = vmatprep.mubr.bf16.mxu0 %v8124_v18  ;;  %v4050_v18 = vsel %vm7093_vm2, %v4045_v34, %v8203_v13  ;;  %v4084_v13 = vsel %vm7093_vm2, %v4079_v49, %v4083_v44  ;;  %v8314_v45 = vrot.slane %v4102_v12, 4  ;;  %v4126_v53 = vor.u32 %v4125_v38, %v8263_v14  ;;  %v5795_v26 = vld [vmem:[%s7061_s14 + $0x54] sm:$0xe] }
  0xfe   : > { %6217 = vmatprep.mubr.bf16.mxu1 %v8905_v40  ;;  %6470 = vmatpush3.bf16.msra.mxu0 %v6891_v16  ;;  %v4129_v16 = vshll.u32 %v8286_v21, 16  ;;  %v8906_v46 = vsel %vm7093_vm2, %v8153_v42, %v8142_v52  ;;  %v8907_v29 = vsel %vm7093_vm2, %v8151_v35, %v8075_v58  ;;  %v4134_v56 = vshrl.u32 %v5741_v61, 16 }
  0xff   : > { %6471 = vmatprep.subr.bf16.mxu0 %v6893_v0  ;;  %v5772_v30 = vcombine.low %v8907_v29, %v8906_v46  ;;  %v4137_v8 = vshll.u32 %v5741_v61, 16  ;;  %v4143_v20 = vshll.u32 %v8298_v10, 16  ;;  %v5388_v7 = vcombine.low %v8130_v2, %v8140_v54  ;;  %v6899_v2 = vld [vmem:[%s8854_s1 + $0x228] sm:$0xff]   ;;  %v5744_v54 = vld [vmem:[%s7061_s14 + $0xc0] sm:$0xf]  ;;  %v8911_v29 = vld [vmem:[#allocation5_spill] sm:$0xff] }
 0x100   : > { %v5389_v48 = vcombine.low %v8159_v36, %v8215_v62  ;;  %v5773_v24 = vcombine.low %v4002_v55, %v4012_v22  ;;  %v8336_v52 = vrot.slane %v4116_v5, 4  ;;  %v5774_v42 = vcombine.low %v4026_v57, %v4036_v60 }
 0x101   : > { %v8338_v58 = vcombine.low %v4050_v18, %v4060_v28  ;;  %v8340_v35 = vcombine.low %v4074_v39, %v4084_v13  ;;  %v4098_v47 = vsel %vm7093_vm2, %v8308_v43, %v8253_v17  ;;  %v4108_v34 = vsel %vm7093_vm2, %v8314_v45, %v8310_v3  ;;  %v5797_v28 = vld [vmem:[%s7061_s14 + $0x6c] sm:$0xe] }
 0x102   : > { %6472 = vmatpush3.bf16.msra.mxu0 %v6893_v0  ;;  %v8356_v1 = vrot.slane %v4126_v53, 4  ;;  %v8358_v4 = vrot.slane %v4129_v16, 5  ;;  %v4147_v0 = vshrl.u32 %v8298_v10, 16  ;;  %v8908_v44 = vcombine.low %v8085_v6, %v8094_v51  ;;  %v6902_v6 = vld [vmem:[%s8854_s1 + $0x230] sm:$0xff]   ;;  %v8380_v51 = vld [vmem:[%s7061_s14 + $0xc4] sm:$0xf] }
 0x103   : > { %6473 = vmatprep.subr.bf16.mxu0 %v6896_v31  ;;  %v8365_v59 = vrot.slane %v4134_v56, 4  ;;  %v8369_v49 = vrot.slane %v4143_v20, 5  ;;  %v4153_v12 = vshll.u32 %v8319_v27, 16  ;;  %v4122_v38 = vsel %vm7093_vm2, %v8336_v52, %v8263_v14  ;;  %v5796_v14 = vld [vmem:[%s7061_s14 + $0x60] sm:$0xe]  ;;  %v8909_v39 = vld [vmem:[#allocation3_spill] sm:$0xff] }
 0x104   : > { %6442 = vmatmul.mubr.bf16.gmra.mrb[8].mxu0 %v8136_v19  ;;  %v8367_v19 = vrot.slane %v4137_v8, 5  ;;  %v4158_v23 = vshrl.u32 %v5744_v54, 16  ;;  %v5810_v15 = vrot.slane %v5794_v41, 9  ;;  %v4621_v55 = vrot.slane %v7956_v32, 5  ;;  %v6894_v13 = vld [vmem:[%s7061_s14 + $0xc] sm:$0xff]   ;;  %v6905_v56 = vld [vmem:[%s8854_s1 + $0x238] sm:$0xff]  }
 0x105   : > { %6218 = vmatmul.mubr.bf16.gmra.mrb[24].mxu1 %v8908_v44  ;;  %6445 = vmatprep.mubr.bf16.mxu0 %v5772_v30  ;;  %v4161_v22 = vshll.u32 %v5744_v54, 16  ;;  %v4624_v57 = vrot.slane %v8004_v63, 5  ;;  %v5811_v40 = vrot.slane %v5795_v26, 9  ;;  %v4628_v60 = vrot.slane %v7968_v33, 5  ;;  %v8910_v16 = vld [vmem:[#allocation4_spill] sm:$0xff]  ;;  %v8912_v52 = vld [vmem:[#allocation6_spill] sm:$0xff] }
 0x106   : > { %6221 = vmatprep.mubr.bf16.mxu1 %v5388_v7  ;;  %6474 = vmatpush3.bf16.msra.mxu0 %v6896_v31  ;;  %v4132_v18 = vsel %vm7093_vm2, %v8356_v1, %v8358_v4  ;;  %v8390_v5 = vrot.slane %v4147_v0, 4  ;;  %v8394_v61 = vsel %vm7339_vm5, %v5810_v15, %v4621_v55  ;;  %v4623_v32 = vrot.slane %v4621_v55, 4  ;;  %v8913_v4 = vld [vmem:[#allocation7_spill] sm:$0xff] }
 0x107   : > { %6475 = vmatprep.subr.bf16.mxu0 %v6899_v2  ;;  %v4167_v31 = vshll.u32 %v8380_v51, 16  ;;  %v8400_v63 = vsel %vm7339_vm5, %v5811_v40, %v4628_v60  ;;  %v4630_v33 = vrot.slane %v4628_v60, 4  ;;  %v4631_v3 = vrot.slane %v8909_v39, 5  ;;  %v8431_v26 = vld [vmem:[%s7061_s14 + $0xc8] sm:$0x1]  ;;  %v6895_v40 = vld [vmem:[%s7061_s14 + $0x18] sm:$0xff]  }
 0x108   : > { %v8406_v45 = vsel %vm7339_vm5, %v4623_v32, %v4624_v57  ;;  %v5812_v53 = vrot.slane %v5796_v14, 9  ;;  %v4635_v46 = vrot.slane %v8910_v16, 5  ;;  %v4638_v30 = vrot.slane %v8911_v29, 5  ;;  %v6897_v39 = vld [vmem:[%s7061_s14 + $0x24] sm:$0xff]  }
 0x109   : > { %v5842_v8 = vcombine.low %v8394_v61, %v8406_v45  ;;  %v8417_v20 = vsel %vm7339_vm5, %v4630_v33, %v4631_v3  ;;  %v5813_v7 = vrot.slane %v5797_v28, 9  ;;  %v4645_v0 = vrot.slane %v8913_v4, 5  ;;  %v8915_v28 = vld [vmem:[#allocation11_spill] sm:$0xff]  ;;  %v5503_v61 = vld [vmem:[%s7061_s14 + $0x90] sm:$0xf] }
 0x10a   : > { %6476 = vmatpush3.bf16.msra.mxu0 %v6899_v2  ;;  %v4642_v2 = vrot.slane %v8912_v52, 5  ;;  %v5843_v54 = vcombine.low %v8400_v63, %v8417_v20  ;;  %v8424_v41 = vsel %vm7339_vm5, %v5812_v53, %v4635_v46  ;;  %v4637_v1 = vrot.slane %v4635_v46, 4  ;;  %v8916_v53 = vld [vmem:[#allocation2_spill] sm:$0xff]  ;;  %v6911_v45 = vld [vmem:[%s7061_s14 + $0xa8] sm:$0xff]  }
 0x10b   : > { %6477 = vmatprep.subr.bf16.mxu0 %v6902_v6  ;;  %v8433_v44 = vrot.slane %v4158_v23, 4  ;;  %v8446_v36 = vcombine.low %v4098_v47, %v4108_v34  ;;  %v4140_v62 = vor.u32 %v8367_v19, %v8365_v59  ;;  %v5798_v23 = vld [vmem:[%s7061_s14 + $0x78] sm:$0xe]  ;;  %v8458_v57 = vrot.slane %v4153_v12, 5  ;;  %v5747_v12 = vld [vmem:[%s7061_s14 + $0xcc] sm:$0xf] }
 0x10c   : > { %6446 = vmatmul.mubr.bf16.gmra.mrb[12].mxu0 %v5773_v24  ;;  %v8435_v24 = vrot.slane %v4161_v22, 5  ;;  %v8439_v15 = vsel %vm7339_vm5, %v5813_v7, %v4642_v2  ;;  %v4644_v55 = vrot.slane %v4642_v2, 4  ;;  %v8456_v22 = vcombine.low %v4122_v38, %v4132_v18  ;;  %v5497_v47 = vld [vmem:[%s7061_s14 + $0x78] sm:$0xf]  ;;  %v8914_v18 = vld [vmem:[#allocation8_spill] sm:$0xff] }
 0x10d   : > { %6222 = vmatmul.mubr.bf16.gmra.mrb[28].mxu1 %v5389_v48  ;;  %6449 = vmatprep.mubr.bf16.mxu0 %v5774_v42  ;;  %v4171_v48 = vshrl.u32 %v8380_v51, 16  ;;  %v8453_v42 = vsel %vm7339_vm5, %v4637_v1, %v4638_v30  ;;  %v4150_v34 = vor.u32 %v8390_v5, %v8369_v49  ;;  %v8469_v59 = vrot.slane %v4167_v31, 5  ;;  %v8483_v31 = vld [vmem:[%s7061_s14 + $0xd0] sm:$0xf]  ;;  %v8917_v1 = vld [vmem:[#allocation9_spill] sm:$0xff] }
 0x10e   : > { %6241 = vmatprep.mubr.bf16.mxu1 %v6894_v13  ;;  %6478 = vmatpush3.bf16.msra.mxu0 %v6902_v6  ;;  %v5844_v17 = vcombine.low %v8424_v41, %v8453_v42  ;;  %v8464_v43 = vsel %vm7339_vm5, %v4644_v55, %v4645_v0  ;;  %v4177_v19 = vshll.u32 %v8431_v26, 16  ;;  %v5799_v6 = vld [vmem:[%s7061_s14 + $0x84] sm:$0xe]  ;;  %v4164_v60 = vor.u32 %v8435_v24, %v8433_v44  ;;  %v8918_v24 = vld [vmem:[#allocation12_spill] sm:$0xff]  ;;  %v6975_v63 = vld [vmem:[%s7061_s14 + $0x8c] sm:$0x1] }
 0x10f   : > { %6479 = vmatprep.subr.bf16.mxu0 %v6905_v56  ;;  %v5845_v38 = vcombine.low %v8439_v15, %v8464_v43  ;;  %v5814_v14 = vrot.slane %v5798_v23, 9  ;;  %v4649_v32 = vrot.slane %v8914_v18, 5  ;;  %v4652_v33 = vrot.slane %v8915_v28, 5 }
 0x110   : > { %v4173_v5 = vrot.slane %v4171_v48, 4  ;;  %v2399_v3 = vshrl.u32 %v5497_v47, 16  ;;  %v2402_v13 = vshll.u32 %v5497_v47, 16  ;;  %v2421_v16 = vsel %vm7093_vm2, %v8268_v50, %v8916_v53 }
 0x111   : > { %v4182_v46 = vshrl.u32 %v5747_v12, 16  ;;  %v8491_v29 = vsel %vm7339_vm5, %v5814_v14, %v4649_v32  ;;  %v4651_v30 = vrot.slane %v4649_v32, 4  ;;  %v5815_v7 = vrot.slane %v5799_v6, 9  ;;  %v6955_v6 = vld [vmem:[%s8854_s1 + $0x108] sm:$0xff]  }
 0x112   : > { %6480 = vmatpush3.bf16.msra.mxu0 %v6905_v56  ;;  %v4185_v52 = vshll.u32 %v5747_v12, 16  ;;  %v2401_v2 = vrot.slane %v2399_v3, 4  ;;  %v2404_v56 = vrot.slane %v2402_v13, 5  ;;  %v4656_v4 = vrot.slane %v8917_v1, 5  ;;  %v5800_v12 = vld [vmem:[%s7061_s14 + $0x90] sm:$0xe] }
 0x113   : > { %v4191_v50 = vshll.u32 %v8483_v31, 16  ;;  %v4195_v0 = vshrl.u32 %v8483_v31, 16  ;;  %v8500_v44 = vsel %vm7339_vm5, %v4651_v30, %v4652_v33  ;;  %v4659_v55 = vrot.slane %v8918_v24, 5  ;;  %v6898_v3 = vld [vmem:[%s7061_s14 + $0x30] sm:$0xff]  }
 0x114   : > { %6450 = vmatmul.mubr.bf16.gmra.mrb[16].mxu0 %v8338_v58  ;;  %v8919_v58 = vld [vmem:[#allocation15_spill] sm:$0xff]  ;;  %v4174_v48 = vor.u32 %v4173_v5, %v8469_v59  ;;  %v2405_v23 = vor.u32 %v2404_v56, %v2401_v2  ;;  %v4658_v47 = vrot.slane %v4656_v4, 4  ;;  %v4151_v14 = vrot.slane %v4150_v34, 4  ;;  %v8521_v13 = vld [vmem:[%s7061_s14 + $0xd4] sm:$0x1]  ;;  %v8920_v2 = vld [vmem:[#allocation10_spill] sm:$0xff] }
 0x115   : > { %6242 = vmatmul.mubr.bf16.vlgmr.msra.gmra.mrb[0].mxu1 %v6895_v40  ;;  %6453 = vmatprep.mubr.bf16.mxu0 %v8340_v35  ;;  %v5846_v35 = vcombine.low %v8491_v29, %v8500_v44  ;;  %v4141_v40 = vrot.slane %v4140_v62, 4  ;;  %v4179_v18 = vrot.slane %v4177_v19, 5  ;;  %v8513_v32 = vsel %vm7339_vm5, %v5815_v7, %v4656_v4  ;;  %v6900_v19 = vld [vmem:[%s7061_s14 + $0x3c] sm:$0xff]   ;;  %v6956_v1 = vld [vmem:[%s8854_s1 + $0x110] sm:$0xff]  }
 0x116   : > { %6521 = vmatpush3.bf16.msra.mxu1 %v8919_v58  ;;  %6245 = vmatprep.mubr.bf16.mxu1 %v6897_v39  ;;  %v4184_v28 = vrot.slane %v4182_v46, 4  ;;  %v4187_v33 = vrot.slane %v4185_v52, 5  ;;  %v2406_v39 = vrot.slane %v2405_v23, 4  ;;  %v8517_v5 = vsel %vm7339_vm5, %v4658_v47, %v4659_v55  ;;  %v6957_v47 = vld [vmem:[%s7061_s14 + $0x1c] sm:$0xf] }
 0x117   : > { %6514 = vmatprep.subr.bf16.mxu1 %v6955_v6  ;;  %v8523_v53 = vrot.slane %v4191_v50, 5  ;;  %v4197_v30 = vrot.slane %v4195_v0, 4  ;;  %v5847_v62 = vcombine.low %v8513_v32, %v8517_v5  ;;  %v5816_v34 = vrot.slane %v5800_v12, 9 }
 0x118   : > { %v4165_v7 = vrot.slane %v4164_v60, 4  ;;  %v4175_v46 = vrot.slane %v4174_v48, 4  ;;  %v2411_v52 = vsel %vm7093_vm2, %v2406_v39, %v7669_v11  ;;  %v4663_v56 = vrot.slane %v8920_v2, 5  ;;  %v8921_v11 = vld [vmem:[#allocation14_spill] sm:$0xff]  ;;  %v6901_v39 = vld [vmem:[%s7061_s14 + $0x48] sm:$0xff]  }
 0x119   : > { %v4146_v4 = vsel %vm7093_vm2, %v4141_v40, %v8369_v49  ;;  %v4156_v60 = vsel %vm7093_vm2, %v4151_v14, %v8458_v57  ;;  %v8541_v50 = vcombine.low %v2411_v52, %v2421_v16  ;;  %v4666_v0 = vrot.slane %v8921_v11, 5  ;;  %v5790_v57 = vld [vmem:[%s7061_s14 + $0x18] sm:$0xe]  ;;  %v5801_v16 = vld [vmem:[%s7061_s14 + $0x9c] sm:$0xe] }
 0x11a   : > { %6522 = vmatpush3.bf16.msra.mxu1 %v6955_v6  ;;  %v4188_v24 = vor.u32 %v4187_v33, %v4184_v28  ;;  %v4201_v55 = vshll.u32 %v8521_v13, 16  ;;  %v8548_v58 = vsel %vm7339_vm5, %v5816_v34, %v4663_v56  ;;  %v4665_v48 = vrot.slane %v4663_v56, 4  ;;  %v6958_v40 = vld [vmem:[%s8854_s1 + $0x118] sm:$0xff]   ;;  %v6959_v2 = vld [vmem:[%s7061_s14 + $0x20] sm:$0x1] }
 0x11b   : > { %6515 = vmatprep.subr.bf16.mxu1 %v6956_v1  ;;  %v4198_v49 = vor.u32 %v4197_v30, %v8523_v53  ;;  %v4180_v23 = vsel %vm7093_vm2, %v4175_v46, %v4179_v18  ;;  %v4593_v12 = vrot.slane %v6957_v47, 5  ;;  %v5779_v6 = vcombine.low %v4146_v4, %v4156_v60  ;;  %v8922_v34 = vld [vmem:[#allocation13_spill] sm:$0xff]  ;;  %v5802_v11 = vld [vmem:[%s7061_s14 + $0xa8] sm:$0xe] }
 0x11c   : > { %6454 = vmatmul.mubr.bf16.gmra.mrb[20].mxu0 %v8446_v36  ;;  %v4170_v36 = vsel %vm7093_vm2, %v4165_v7, %v8469_v59  ;;  %v4189_v14 = vrot.slane %v4188_v24, 4  ;;  %v4203_v28 = vrot.slane %v4201_v55, 5  ;;  %v5806_v18 = vrot.slane %v5790_v57, 9  ;;  %v6903_v46 = vld [vmem:[%s7061_s14 + $0x54] sm:$0xff]   ;;  %v5791_v55 = vld [vmem:[%s7061_s14 + $0x24] sm:$0xe] }
 0x11d   : > { %6246 = vmatmul.mubr.bf16.gmra.mrb[4].mxu1 %v6898_v3  ;;  %6457 = vmatprep.mubr.bf16.mxu0 %v8456_v22  ;;  %v8562_v22 = vsel %vm7339_vm5, %v4665_v48, %v4666_v0  ;;  %v5817_v33 = vrot.slane %v5801_v16, 9  ;;  %v5780_v3 = vcombine.low %v4170_v36, %v4180_v23  ;;  %v4199_v30 = vrot.slane %v4198_v49, 4  ;;  %v6961_v48 = vld [vmem:[%s7061_s14 + $0x28] sm:$0xf]  ;;  %v6962_v36 = vld [vmem:[%s7061_s14 + $0x34] sm:$0xf] }
 0x11e   : > { %6249 = vmatprep.mubr.bf16.mxu1 %v6900_v19  ;;  %6523 = vmatpush3.bf16.msra.mxu1 %v6956_v1  ;;  %v5848_v59 = vcombine.low %v8548_v58, %v8562_v22  ;;  %v4670_v19 = vrot.slane %v8922_v34, 5  ;;  %v4673_v7 = vrot.slane %v8251_v25, 5  ;;  %v4595_v52 = vrot.slane %v4593_v12, 4  ;;  %v6960_v1 = vld [vmem:[%s8854_s1 + $0x120] sm:$0xff]  }
 0x11f   : > { %6516 = vmatprep.subr.bf16.mxu1 %v6958_v40  ;;  %v4596_v56 = vrot.slane %v6959_v2, 5  ;;  %v4594_v25 = vsel %vm7339_vm5, %v5806_v18, %v4593_v12  ;;  %v4194_v0 = vsel %vm7093_vm2, %v4189_v14, %v8523_v53  ;;  %v4204_v24 = vsel %vm7093_vm2, %v4199_v30, %v4203_v28  ;;  %v5792_v12 = vld [vmem:[%s7061_s14 + $0x30] sm:$0xe]  ;;  %v6904_v30 = vld [vmem:[%s7061_s14 + $0x60] sm:$0xff]  }
 0x120   : > { %v8579_v4 = vsel %vm7339_vm5, %v5817_v33, %v4670_v19  ;;  %v4672_v60 = vrot.slane %v4670_v19, 4  ;;  %v4600_v49 = vrot.slane %v6961_v48, 5  ;;  %v4607_v23 = vrot.slane %v6962_v36, 5  ;;  %v6964_v33 = vld [vmem:[%s7061_s14 + $0x2c] sm:$0x1] }
 0x121   : > { %v4597_v16 = vsel %vm7339_vm5, %v4595_v52, %v4596_v56  ;;  %v5818_v47 = vrot.slane %v5802_v11, 9  ;;  %v5781_v28 = vcombine.low %v4194_v0, %v4204_v24  ;;  %v5807_v18 = vrot.slane %v5791_v55, 9  ;;  %v6906_v52 = vld [vmem:[%s7061_s14 + $0x6c] sm:$0xff]   ;;  %v5803_v11 = vld [vmem:[%s7061_s14 + $0xb4] sm:$0xe] }
 0x122   : > { %6524 = vmatpush3.bf16.msra.mxu1 %v6958_v40  ;;  %v8593_v57 = vsel %vm7339_vm5, %v4672_v60, %v4673_v7  ;;  %v8923_v40 = vld [vmem:[#allocation16_spill] sm:$0xff]  ;;  %v5838_v34 = vcombine.low %v4594_v25, %v4597_v16  ;;  %v4602_v19 = vrot.slane %v4600_v49, 4  ;;  %v5808_v2 = vrot.slane %v5792_v12, 9  ;;  %v5793_v0 = vld [vmem:[%s7061_s14 + $0x3c] sm:$0xe] }
 0x123   : > { %6517 = vmatprep.subr.bf16.mxu1 %v6960_v1  ;;  %v5849_v53 = vcombine.low %v8579_v4, %v8593_v57  ;;  %v4677_v14 = vrot.slane %v8923_v40, 5  ;;  %v4609_v56 = vrot.slane %v4607_v23, 4  ;;  %v6966_v24 = vld [vmem:[%s7061_s14 + $0x40] sm:$0xf]  ;;  %v4601_v48 = vsel %vm7339_vm5, %v5807_v18, %v4600_v49  ;;  %v6968_v18 = vld [vmem:[%s7061_s14 + $0x44] sm:$0x1] }
 0x124   : > { %6458 = vmatmul.mubr.bf16.gmra.mrb[24].mxu0 %v5779_v6  ;;  %v6963_v6 = vld [vmem:[%s8854_s1 + $0x128] sm:$0xff]   ;;  %v4614_v55 = vrot.slane %v6966_v24, 5  ;;  %v4684_v12 = vrot.slane %v8298_v10, 5  ;;  %v4608_v49 = vsel %vm7339_vm5, %v5808_v2, %v4607_v23  ;;  %v6969_v10 = vld [vmem:[%s8854_s1 + $0x138] sm:$0xff]   ;;  %v5804_v23 = vld [vmem:[%s7061_s14 + $0xc0] sm:$0xe] }
 0x125   : > { %6250 = vmatmul.mubr.bf16.gmra.mrb[8].mxu1 %v6901_v39  ;;  %6461 = vmatprep.mubr.bf16.mxu0 %v5780_v3  ;;  %v4603_v39 = vrot.slane %v6964_v33, 5  ;;  %v4680_v3 = vrot.slane %v8286_v21, 5  ;;  %v8610_v7 = vsel %vm7339_vm5, %v5818_v47, %v4677_v14  ;;  %v6967_v21 = vld [vmem:[%s8854_s1 + $0x130] sm:$0xff]   ;;  %v5819_v47 = vrot.slane %v5803_v11, 9 }
 0x126   : > { %6253 = vmatprep.mubr.bf16.mxu1 %v6903_v46  ;;  %6525 = vmatpush3.bf16.msra.mxu1 %v6960_v1  ;;  %v4679_v46 = vrot.slane %v4677_v14, 4  ;;  %v6965_v1 = vld [vmem:[%s7061_s14 + $0x38] sm:$0x1]  ;;  %v5809_v14 = vrot.slane %v5793_v0, 9  ;;  %v4617_v33 = vrot.slane %v6968_v18, 5  ;;  %v4691_v11 = vrot.slane %v8380_v51, 5 }
 0x127   : > { %6518 = vmatprep.subr.bf16.mxu1 %v6963_v6  ;;  %v4610_v60 = vrot.slane %v6965_v1, 5  ;;  %v4604_v36 = vsel %vm7339_vm5, %v4602_v19, %v4603_v39  ;;  %v4686_v39 = vrot.slane %v4684_v12, 4  ;;  %v5494_v19 = vld [vmem:[%s7061_s14 + $0x6c] sm:$0xf]  ;;  %v6909_v18 = vld [vmem:[%s7061_s14 + $0x90] sm:$0xff]   ;;  %v2442_v20 = vshll.u32 %v6975_v63, 16 }
 0x128   : > { %v8622_v25 = vsel %vm7339_vm5, %v4679_v46, %v4680_v3  ;;  %v5839_v3 = vcombine.low %v4601_v48, %v4604_v36  ;;  %v4615_v1 = vsel %vm7339_vm5, %v5809_v14, %v4614_v55  ;;  %v2375_v0 = vshrl.u32 %v5494_v19, 16  ;;  %v5805_v51 = vld [vmem:[%s7061_s14 + $0xcc] sm:$0xe] }
 0x129   : > { %v5850_v16 = vcombine.low %v8610_v7, %v8622_v25  ;;  %v4611_v40 = vsel %vm7339_vm5, %v4609_v56, %v4610_v60  ;;  %v5820_v56 = vrot.slane %v5804_v23, 9  ;;  %v2378_v24 = vshll.u32 %v5494_v19, 16 }
 0x12a   : > { %6526 = vmatpush3.bf16.msra.mxu1 %v6963_v6  ;;  %v4687_v6 = vrot.slane %v8319_v27, 5  ;;  %v8642_v27 = vsel %vm7339_vm5, %v5819_v47, %v4684_v12  ;;  %v4694_v36 = vrot.slane %v8431_v26, 5  ;;  %v4693_v12 = vrot.slane %v4691_v11, 4 }
 0x12b   : > { %6519 = vmatprep.subr.bf16.mxu1 %v6967_v21  ;;  %v2380_v26 = vrot.slane %v2378_v24, 5  ;;  %v4701_v23 = vrot.slane %v8521_v13, 5 }
 0x12c   : > { %6462 = vmatmul.mubr.bf16.gmra.mrb[28].mxu0 %v5781_v28  ;;  %v4616_v28 = vrot.slane %v4614_v55, 4  ;;  %v8649_v46 = vsel %vm7339_vm5, %v4686_v39, %v4687_v6  ;;  %v8663_v55 = vsel %vm7339_vm5, %v5820_v56, %v4691_v11  ;;  %v4698_v39 = vrot.slane %v8483_v31, 5  ;;  %v6971_v56 = vld [vmem:[%s7061_s14 + $0x74] sm:$0x1] }
 0x12d   : > { %6254 = vmatmul.mubr.bf16.gmra.mrb[12].mxu1 %v6904_v30  ;;  %6481 = vmatprep.mubr.bf16.mxu0 %v5838_v34  ;;  %v6907_v30 = vld [vmem:[%s7061_s14 + $0x78] sm:$0xff]   ;;  %v5840_v34 = vcombine.low %v4608_v49, %v4611_v40  ;;  %v5851_v2 = vcombine.low %v8642_v27, %v8649_v46  ;;  %v8668_v49 = vsel %vm7339_vm5, %v4693_v12, %v4694_v36  ;;  %v2377_v40 = vrot.slane %v2375_v0, 4  ;;  %v6972_v0 = vld [vmem:[%s7061_s14 + $0x88] sm:$0xf] }
 0x12e   : > { %6257 = vmatprep.mubr.bf16.mxu1 %v6906_v52  ;;  %6527 = vmatpush3.bf16.msra.mxu1 %v6967_v21  ;;  %v6908_v52 = vld [vmem:[%s7061_s14 + $0x84] sm:$0xff]   ;;  %v4618_v60 = vsel %vm7339_vm5, %v4616_v28, %v4617_v33  ;;  %v6970_v21 = vld [vmem:[%s7061_s14 + $0x70] sm:$0xf]  ;;  %v5852_v28 = vcombine.low %v8663_v55, %v8668_v49  ;;  %v4700_v19 = vrot.slane %v4698_v39, 4  ;;  %v2432_v24 = vshll.u32 %v6972_v0, 16 }
 0x12f   : > { %6520 = vmatprep.subr.bf16.mxu1 %v6969_v10  ;;  %v2384_v48 = vshll.u32 %v6970_v21, 16  ;;  %v2388_v47 = vshrl.u32 %v6970_v21, 16  ;;  %v5841_v6 = vcombine.low %v4615_v1, %v4618_v60  ;;  %v2394_v1 = vshll.u32 %v6971_v56, 16 }
 0x130   : > { %v8690_v11 = vsel %vm7339_vm5, %v4700_v19, %v4701_v23  ;;  %v2436_v21 = vshrl.u32 %v6972_v0, 16  ;;  %v6974_v19 = vld [vmem:[%s7061_s14 + $0xa0] sm:$0xf] }
 0x131   : > { %v8670_v14 = vrot.slane %v2384_v48, 5  ;;  %v2390_v33 = vrot.slane %v2388_v47, 4  ;;  %v2484_v56 = vshrl.u32 %v6974_v19, 16 }
 0x132   : > { %6528 = vmatpush3.bf16.msra.mxu1 %v6969_v10  ;;  %v5821_v10 = vrot.slane %v5805_v51, 9 }
 0x133   : > { %v2391_v31 = vor.u32 %v2390_v33, %v8670_v14  ;;  %v2450_v33 = vshll.u32 %v5503_v61, 16 }
 0x134   : > { %6482 = vmatmul.mubr.bf16.vlgmr.msra.gmra.mrb[0].mxu0 %v5839_v3  ;;  %v6910_v3 = vld [vmem:[%s7061_s14 + $0x9c] sm:$0xff]  }
 0x135   : > { %6258 = vmatmul.mubr.bf16.gmra.mrb[16].mxu1 %v6907_v30  ;;  %6485 = vmatprep.mubr.bf16.mxu0 %v5840_v34  ;;  %v5500_v30 = vld [vmem:[%s7061_s14 + $0x84] sm:$0xf]  ;;  %v8681_v34 = vsel %vm7339_vm5, %v5821_v10, %v4698_v39  ;;  %v2392_v47 = vrot.slane %v2391_v31, 4  ;;  %v6973_v10 = vld [vmem:[%s7061_s14 + $0x94] sm:$0xf]  ;;  %v2452_v0 = vrot.slane %v2450_v33, 5 }
 0x136   : > { %6261 = vmatprep.mubr.bf16.mxu1 %v6908_v52  ;;  %v2381_v52 = vor.u32 %v2380_v26, %v2377_v40  ;;  %v2423_v13 = vshrl.u32 %v5500_v30, 16  ;;  %v2426_v60 = vshll.u32 %v5500_v30, 16  ;;  %v5853_v48 = vcombine.low %v8681_v34, %v8690_v11 }
 0x137   : > { %v8699_v40 = vrot.slane %v2432_v24, 5  ;;  %v2438_v26 = vrot.slane %v2436_v21, 4  ;;  %v2456_v39 = vshll.u32 %v6973_v10, 16  ;;  %v2460_v23 = vshrl.u32 %v6973_v10, 16  ;;  %v6977_v10 = vld [vmem:[%s7061_s14 + $0xa4] sm:$0x1] }
 0x138   : > { %v2382_v36 = vrot.slane %v2381_v52, 4  ;;  %v2425_v12 = vrot.slane %v2423_v13, 4  ;;  %v2428_v51 = vrot.slane %v2426_v60, 5  ;;  %v2480_v52 = vshll.u32 %v6974_v19, 16  ;;  %v6978_v19 = vld [vmem:[%s7061_s14 + $0xac] sm:$0xf] }
 0x139   : > { %v2439_v13 = vor.u32 %v2438_v26, %v8699_v40  ;;  %v8716_v41 = vrot.slane %v2456_v39, 5  ;;  %v2462_v42 = vrot.slane %v2460_v23, 4  ;;  %v2486_v21 = vrot.slane %v2484_v56, 4  ;;  %v5512_v23 = vld [vmem:[%s7061_s14 + $0xb4] sm:$0xf] }
 0x13a   : > { %v2490_v39 = vshll.u32 %v6977_v10, 16  ;;  %v2508_v15 = vshrl.u32 %v6978_v19, 16  ;;  %v2522_v63 = vshll.u32 %v5512_v23, 16 }
 0x13b   : > { %v2463_v26 = vor.u32 %v2462_v42, %v8716_v41 }
 0x13c   : > { %6486 = vmatmul.mubr.bf16.gmra.mrb[4].mxu0 %v5841_v6  ;;  %v5506_v6 = vld [vmem:[%s7061_s14 + $0x9c] sm:$0xf] }
 0x13d   : > { %6262 = vmatmul.mubr.bf16.gmra.mrb[20].mxu1 %v6909_v18  ;;  %6489 = vmatprep.mubr.bf16.mxu0 %v5842_v8  ;;  %v2396_v8 = vrot.slane %v2394_v1, 5  ;;  %v2447_v18 = vshrl.u32 %v5503_v61, 16  ;;  %v2474_v30 = vshll.u32 %v5506_v6, 16  ;;  %v2387_v1 = vsel %vm7093_vm2, %v2382_v36, %v8670_v14  ;;  %v6913_v61 = vld [vmem:[%s7061_s14 + $0xc0] sm:$0xff]  }
 0x13e   : > { %6265 = vmatprep.mubr.bf16.mxu1 %v6910_v3  ;;  %v2471_v3 = vshrl.u32 %v5506_v6, 16  ;;  %v8718_v14 = vrot.slane %v2480_v52, 5  ;;  %v2504_v52 = vshll.u32 %v6978_v19, 16 }
 0x13f   : > { %v2397_v31 = vsel %vm7093_vm2, %v2392_v47, %v2396_v8  ;;  %v2449_v60 = vrot.slane %v2447_v18, 4  ;;  %v2476_v24 = vrot.slane %v2474_v30, 5  ;;  %v2444_v8 = vrot.slane %v2442_v20, 5  ;;  %v6979_v20 = vld [vmem:[%s7061_s14 + $0xb8] sm:$0xf] }
 0x140   : > { %v2440_v47 = vrot.slane %v2439_v13, 4  ;;  %v2487_v33 = vor.u32 %v2486_v21, %v8718_v14  ;;  %v2528_v29 = vshll.u32 %v6979_v20, 16  ;;  %v2532_v44 = vshrl.u32 %v6979_v20, 16 }
 0x142   : > { %v2488_v13 = vrot.slane %v2487_v33, 4 }
 0x144   : > { %6490 = vmatmul.mubr.bf16.gmra.mrb[8].mxu0 %v5843_v54  ;;  %v2429_v54 = vor.u32 %v2428_v51, %v2425_v12  ;;  %v2453_v12 = vor.u32 %v2452_v0, %v2449_v60  ;;  %v6976_v51 = vld [vmem:[%s7061_s14 + $0x98] sm:$0x1]  ;;  %v2492_v60 = vrot.slane %v2490_v39, 5 }
 0x145   : > { %6266 = vmatmul.mubr.bf16.gmra.mrb[24].mxu1 %v6911_v45  ;;  %6493 = vmatprep.mubr.bf16.mxu0 %v5844_v17  ;;  %v2473_v17 = vrot.slane %v2471_v3, 4  ;;  %v5542_v45 = vcombine.low %v2387_v1, %v2397_v31  ;;  %v2466_v6 = vshll.u32 %v6976_v51, 16  ;;  %v2519_v31 = vshrl.u32 %v5512_v23, 16 }
 0x146   : > { %6269 = vmatprep.mubr.bf16.mxu1 %v6912_v9  ;;  %v2430_v36 = vrot.slane %v2429_v54, 4  ;;  %v5509_v9 = vld [vmem:[%s7061_s14 + $0xa8] sm:$0xf]  ;;  %v2454_v56 = vrot.slane %v2453_v12, 4  ;;  %v2493_v32 = vsel %vm7093_vm2, %v2488_v13, %v2492_v60 }
 0x147   : > { %v2477_v18 = vor.u32 %v2476_v24, %v2473_v17  ;;  %v2495_v3 = vshrl.u32 %v5509_v9, 16  ;;  %v2498_v30 = vshll.u32 %v5509_v9, 16  ;;  %v2468_v1 = vrot.slane %v2466_v6, 5 }
 0x148   : > { %v2435_v43 = vsel %vm7093_vm2, %v2430_v36, %v8699_v40  ;;  %v2506_v17 = vrot.slane %v2504_v52, 5  ;;  %v2510_v24 = vrot.slane %v2508_v15, 4  ;;  %v2521_v21 = vrot.slane %v2519_v31, 4  ;;  %v5515_v36 = vld [vmem:[%s7061_s14 + $0xc0] sm:$0xf] }
 0x149   : > { %v2478_v54 = vrot.slane %v2477_v18, 4  ;;  %v2497_v0 = vrot.slane %v2495_v3, 4  ;;  %v2500_v42 = vrot.slane %v2498_v30, 5  ;;  %v2543_v9 = vshrl.u32 %v5515_v36, 16  ;;  %v6981_v18 = vld [vmem:[%s7061_s14 + $0xc4] sm:$0xf] }
 0x14a   : > { %v2552_v33 = vshll.u32 %v6981_v18, 16 }
 0x14b   : > { %v2483_v51 = vsel %vm7093_vm2, %v2478_v54, %v8718_v14  ;;  %v2501_v5 = vor.u32 %v2500_v42, %v2497_v0  ;;  %v2556_v14 = vshrl.u32 %v6981_v18, 16  ;;  %v2545_v19 = vrot.slane %v2543_v9, 4 }
 0x14c   : > { %6494 = vmatmul.mubr.bf16.gmra.mrb[12].mxu0 %v5845_v38  ;;  %v2445_v38 = vsel %vm7093_vm2, %v2440_v47, %v2444_v8  ;;  %v2534_v8 = vrot.slane %v2532_v44, 4  ;;  %v2459_v47 = vsel %vm7093_vm2, %v2454_v56, %v8716_v41  ;;  %v6980_v41 = vld [vmem:[%s7061_s14 + $0xb0] sm:$0x1]  ;;  %v5546_v58 = vcombine.low %v2483_v51, %v2493_v32  ;;  %v6983_v44 = vld [vmem:[%s7061_s14 + $0xc8] sm:$0x1] }
 0x14d   : > { %6270 = vmatmul.mubr.bf16.gmra.mrb[28].mxu1 %v6913_v61  ;;  %6497 = vmatprep.mubr.bf16.mxu0 %v5846_v35  ;;  %v2464_v35 = vrot.slane %v2463_v26, 4  ;;  %v5544_v40 = vcombine.low %v2435_v43, %v2445_v38  ;;  %v2524_v61 = vrot.slane %v2522_v63, 5  ;;  %v2514_v6 = vshll.u32 %v6980_v41, 16 }
 0x14e   : > { %6305 = vmatprep.mubr.bf16.mxu1 %v5542_v45  ;;  %v2530_v45 = vrot.slane %v2528_v29, 5  ;;  %v2546_v26 = vshll.u32 %v5515_v36, 16  ;;  %v2502_v22 = vrot.slane %v2501_v5, 4  ;;  %v2554_v15 = vrot.slane %v2552_v33, 5 }
 0x14f   : > { %v2469_v12 = vsel %vm7093_vm2, %v2464_v35, %v2468_v1  ;;  %v2525_v10 = vor.u32 %v2524_v61, %v2521_v21  ;;  %v2516_v30 = vrot.slane %v2514_v6, 5  ;;  %v2558_v43 = vrot.slane %v2556_v14, 4 }
 0x150   : > { %v2535_v39 = vor.u32 %v2534_v8, %v2530_v45  ;;  %v5545_v3 = vcombine.low %v2459_v47, %v2469_v12  ;;  %v2548_v52 = vrot.slane %v2546_v26, 5  ;;  %v2507_v31 = vsel %vm7093_vm2, %v2502_v22, %v2506_v17 }
 0x151   : > { %v2526_v38 = vrot.slane %v2525_v10, 4  ;;  %v2559_v29 = vor.u32 %v2558_v43, %v2554_v15  ;;  %v2562_v35 = vshll.u32 %v6983_v44, 16 }
 0x152   : > { %v2536_v56 = vrot.slane %v2535_v39, 4  ;;  %v2549_v20 = vor.u32 %v2548_v52, %v2545_v19 }
 0x153   : > { %v2531_v4 = vsel %vm7093_vm2, %v2526_v38, %v2530_v45  ;;  %v2564_v54 = vrot.slane %v2562_v35, 5 }
 0x154   : > { %6498 = vmatmul.mubr.bf16.gmra.mrb[16].mxu0 %v5847_v62  ;;  %v2511_v62 = vor.u32 %v2510_v24, %v2506_v17  ;;  %v2550_v25 = vrot.slane %v2549_v20, 4 }
 0x155   : > { %6306 = vmatmul.mubr.bf16.vlgmr.msra.gmra.mrb[16].mxu1 %v8541_v50  ;;  %6501 = vmatprep.mubr.bf16.mxu0 %v5848_v59  ;;  %v6982_v50 = vld [vmem:[%s7061_s14 + $0xbc] sm:$0x1]  ;;  %s5864_s14 = sshll.u32 %s8925_s16, 8 }
 0x156   : > { %6309 = vmatprep.mubr.bf16.mxu1 %v5544_v40  ;;  %v2538_v23 = vshll.u32 %v6982_v50, 16  ;;  %v2512_v59 = vrot.slane %v2511_v62, 4  ;;  %v2555_v13 = vsel %vm7093_vm2, %v2550_v25, %v2554_v15  ;;  %s8803_s21 = scalar_lea.vmem %s8855_s2, %s5864_s14 }
 0x158   : > { %v2540_v1 = vrot.slane %v2538_v23, 5  ;;  %v2517_v63 = vsel %vm7093_vm2, %v2512_v59, %v2516_v30 }
 0x15a   : > { %v2541_v57 = vsel %vm7093_vm2, %v2536_v56, %v2540_v1 }
 0x15b   : > { %v5548_v7 = vcombine.low %v2531_v4, %v2541_v57 }
 0x15c   : > { %6502 = vmatmul.mubr.bf16.gmra.mrb[20].mxu0 %v5849_v53  ;;  %v5547_v53 = vcombine.low %v2507_v31, %v2517_v63 }
 0x15d   : > { %6310 = vmatmul.mubr.bf16.gmra.mrb[20].mxu1 %v5545_v3  ;;  %6505 = vmatprep.mubr.bf16.mxu0 %v5850_v16  ;;  %v2560_v16 = vrot.slane %v2559_v29, 4 }
 0x15e   : > { %6313 = vmatprep.mubr.bf16.mxu1 %v5546_v58 }
 0x15f   : > { %v2565_v60 = vsel %vm7093_vm2, %v2560_v16, %v2564_v54 }
 0x160   : > { %v5549_v0 = vcombine.low %v2555_v13, %v2565_v60 }
 0x164   : > { %6506 = vmatmul.mubr.bf16.gmra.mrb[24].mxu0 %v5851_v2 }
 0x165   : > { %6314 = vmatmul.mubr.bf16.gmra.mrb[24].mxu1 %v5547_v53  ;;  %6509 = vmatprep.mubr.bf16.mxu0 %v5852_v28 }
 0x166   : > { %6317 = vmatprep.mubr.bf16.mxu1 %v5548_v7 }
 0x16c   : > { %6510 = vmatmul.mubr.bf16.gmra.mrb[28].mxu0 %v5853_v48 }
 0x16d   : > { %6318 = vmatmul.mubr.bf16.gmra.mrb[28].mxu1 %v5549_v0 }
 0x1e8   : > { %v6243_v27 = vpop.f32.mrb[0].mxu1 }
 0x1e9   : > { %v1975_v46 = vpop.f32.mrb[1].mxu1 }
 0x1ea   : > { %v6244_v2 = vpop.f32.mrb[2].mxu1 }
 0x1eb   : > { %v1978_v42 = vpop.f32.mrb[3].mxu1 }
 0x1f0   : > { %v6247_v55 = vpop.f32.mrb[4].mxu1 }
 0x1f1   : > { %v1991_v49 = vpop.f32.mrb[5].mxu1 }
 0x1f2   : > { %v6248_v28 = vpop.f32.mrb[6].mxu1 }
 0x1f3   : > { %v1994_v17 = vpop.f32.mrb[7].mxu1 }
 0x1f8   : > { %v6251_v24 = vpop.f32.mrb[8].mxu1 }
 0x1f9   : > { %v2007_v40 = vpop.f32.mrb[9].mxu1 }
 0x1fa   : > { %v6252_v21 = vpop.f32.mrb[10].mxu1 }
 0x1fb   : > { %v8789_v37 = vpop.f32.mrb[11].mxu1 }
 0x200   : > { %v8791_v61 = vpop.f32.mrb[12].mxu1 }
 0x201   : > { %v8793_v45 = vpop.f32.mrb[13].mxu1 }
 0x202   : > { %v8795_v34 = vpop.f32.mrb[14].mxu1 }
 0x203   : > { %v8797_v11 = vpop.f32.mrb[15].mxu1 }
 0x207   : > { %v6483_v48 = vpop.f32.mrb[0].mxu0 }
 0x208   : > { %v6529_v8 = vadd.f32 %v6483_v48, %v6243_v27  ;;  %v4866_v36 = vpop.f32.mrb[1].mxu0 }
 0x209   : > { %v6530_v47 = vadd.f32 %v4866_v36, %v1975_v46  ;;  %v6484_v12 = vpop.f32.mrb[2].mxu0 }
 0x20a   : > { %5027 = vst [vmem:[%s8803_s21 + $0x10] sm:$0xff] %v6529_v8  ;;  %v6531_v51 = vadd.f32 %v6484_v12, %v6244_v2  ;;  %v4869_v32 = vpop.f32.mrb[3].mxu0  ;;  %v5097_v9 = vmul.f32 %v6529_v8, %v6529_v8 }
 0x20b   : > { %5025 = vst [vmem:[%s8803_s21] sm:$0xff] %v6530_v47  ;;  %v6532_v5 = vadd.f32 %v4869_v32, %v1978_v42  ;;  %v5095_v62 = vmul.f32 %v6530_v47, %v6530_v47 }
 0x20c   : > { %5028 = vst [vmem:[%s8803_s21 + $0x18] sm:$0xff] %v6531_v51  ;;  %v5098_v39 = vmul.f32 %v6531_v51, %v6531_v51 }
 0x20d   : > { %5026 = vst [vmem:[%s8803_s21 + $0x8] sm:$0xff] %v6532_v5  ;;  %v5057_v41 = vadd.f32 %v6532_v5, %v6530_v47  ;;  %v5096_v6 = vmul.f32 %v6532_v5, %v6532_v5 }
 0x20f   : > { %v5058_v26 = vadd.f32 %v6529_v8, %v5057_v41  ;;  %v5127_v18 = vadd.f32 %v5096_v6, %v5095_v62  ;;  %v6487_v33 = vpop.f32.mrb[4].mxu0 }
 0x210   : > { %v6533_v14 = vadd.f32 %v6487_v33, %v6247_v55  ;;  %v4882_v10 = vpop.f32.mrb[5].mxu0 }
 0x211   : > { %v5128_v50 = vadd.f32 %v5127_v18, %v5097_v9  ;;  %v6534_v23 = vadd.f32 %v4882_v10, %v1991_v49  ;;  %v5059_v3 = vadd.f32 %v6531_v51, %v5058_v26  ;;  %v6488_v58 = vpop.f32.mrb[6].mxu0 }
 0x212   : > { %5031 = vst [vmem:[%s8803_s21 + $0x30] sm:$0xff] %v6533_v14  ;;  %v6535_v22 = vadd.f32 %v6488_v58, %v6248_v28  ;;  %v4885_v59 = vpop.f32.mrb[7].mxu0  ;;  %v5101_v1 = vmul.f32 %v6533_v14, %v6533_v14 }
 0x213   : > { %5029 = vst [vmem:[%s8803_s21 + $0x20] sm:$0xff] %v6534_v23  ;;  %v5060_v30 = vadd.f32 %v6534_v23, %v5059_v3  ;;  %v5099_v19 = vmul.f32 %v6534_v23, %v6534_v23  ;;  %v5129_v52 = vadd.f32 %v5128_v50, %v5098_v39  ;;  %v6536_v15 = vadd.f32 %v4885_v59, %v1994_v17 }
 0x214   : > { %5032 = vst [vmem:[%s8803_s21 + $0x38] sm:$0xff] %v6535_v22  ;;  %v5102_v35 = vmul.f32 %v6535_v22, %v6535_v22 }
 0x215   : > { %v5130_v43 = vadd.f32 %v5129_v52, %v5099_v19  ;;  %5030 = vst [vmem:[%s8803_s21 + $0x28] sm:$0xff] %v6536_v15  ;;  %v5061_v38 = vadd.f32 %v6536_v15, %v5060_v30  ;;  %v5100_v56 = vmul.f32 %v6536_v15, %v6536_v15 }
 0x217   : > { %v5062_v31 = vadd.f32 %v6533_v14, %v5061_v38  ;;  %v5131_v63 = vadd.f32 %v5130_v43, %v5100_v56  ;;  %v6491_v20 = vpop.f32.mrb[8].mxu0 }
 0x218   : > { %v6537_v29 = vadd.f32 %v6491_v20, %v6251_v24  ;;  %v4898_v44 = vpop.f32.mrb[9].mxu0 }
 0x219   : > { %v5132_v4 = vadd.f32 %v5131_v63, %v5101_v1  ;;  %v6538_v57 = vadd.f32 %v4898_v44, %v2007_v40  ;;  %v5063_v53 = vadd.f32 %v6535_v22, %v5062_v31  ;;  %v6492_v7 = vpop.f32.mrb[10].mxu0 }
 0x21a   : > { %5035 = vst [vmem:[%s8803_s21 + $0x50] sm:$0xff] %v6537_v29  ;;  %v6539_v25 = vadd.f32 %v6492_v7, %v6252_v21  ;;  %v4901_v16 = vpop.f32.mrb[11].mxu0  ;;  %v5105_v42 = vmul.f32 %v6537_v29, %v6537_v29 }
 0x21b   : > { %5033 = vst [vmem:[%s8803_s21 + $0x40] sm:$0xff] %v6538_v57  ;;  %v5064_v54 = vadd.f32 %v6538_v57, %v5063_v53  ;;  %v5103_v13 = vmul.f32 %v6538_v57, %v6538_v57  ;;  %v5133_v60 = vadd.f32 %v5132_v4, %v5102_v35  ;;  %v6540_v0 = vadd.f32 %v4901_v16, %v8789_v37 }
 0x21c   : > { %5036 = vst [vmem:[%s8803_s21 + $0x58] sm:$0xff] %v6539_v25  ;;  %v5106_v40 = vmul.f32 %v6539_v25, %v6539_v25 }
 0x21d   : > { %v5134_v27 = vadd.f32 %v5133_v60, %v5103_v13  ;;  %5034 = vst [vmem:[%s8803_s21 + $0x48] sm:$0xff] %v6540_v0  ;;  %v5065_v46 = vadd.f32 %v6540_v0, %v5064_v54  ;;  %v5104_v2 = vmul.f32 %v6540_v0, %v6540_v0 }
 0x21f   : > { %v5066_v55 = vadd.f32 %v6537_v29, %v5065_v46  ;;  %v5135_v49 = vadd.f32 %v5134_v27, %v5104_v2  ;;  %v6495_v28 = vpop.f32.mrb[12].mxu0 }
 0x220   : > { %v6541_v17 = vadd.f32 %v6495_v28, %v8791_v61  ;;  %v4914_v24 = vpop.f32.mrb[13].mxu0 }
 0x221   : > { %v5136_v21 = vadd.f32 %v5135_v49, %v5105_v42  ;;  %v6542_v37 = vadd.f32 %v4914_v24, %v8793_v45  ;;  %v5067_v48 = vadd.f32 %v6539_v25, %v5066_v55  ;;  %v6496_v8 = vpop.f32.mrb[14].mxu0 }
 0x222   : > { %5039 = vst [vmem:[%s8803_s21 + $0x70] sm:$0xff] %v6541_v17  ;;  %v6543_v36 = vadd.f32 %v6496_v8, %v8795_v34  ;;  %v4917_v47 = vpop.f32.mrb[15].mxu0  ;;  %v5109_v6 = vmul.f32 %v6541_v17, %v6541_v17 }
 0x223   : > { %5037 = vst [vmem:[%s8803_s21 + $0x60] sm:$0xff] %v6542_v37  ;;  %v5068_v12 = vadd.f32 %v6542_v37, %v5067_v48  ;;  %v5107_v51 = vmul.f32 %v6542_v37, %v6542_v37  ;;  %v5137_v32 = vadd.f32 %v5136_v21, %v5106_v40  ;;  %v6544_v5 = vadd.f32 %v4917_v47, %v8797_v11 }
 0x224   : > { %5040 = vst [vmem:[%s8803_s21 + $0x78] sm:$0xff] %v6543_v36  ;;  %v5110_v33 = vmul.f32 %v6543_v36, %v6543_v36 }
 0x225   : > { %v5138_v61 = vadd.f32 %v5137_v32, %v5107_v51  ;;  %5038 = vst [vmem:[%s8803_s21 + $0x68] sm:$0xff] %v6544_v5  ;;  %v5069_v62 = vadd.f32 %v6544_v5, %v5068_v12  ;;  %v5108_v41 = vmul.f32 %v6544_v5, %v6544_v5 }
 0x227   : > { %v5070_v45 = vadd.f32 %v6541_v17, %v5069_v62  ;;  %v5139_v9 = vadd.f32 %v5138_v61, %v5108_v41  ;;  %v6499_v26 = vpop.f32.mrb[16].mxu0 }
 0x228   : > { %v6307_v18 = vpop.f32.mrb[16].mxu1  ;;  %v4930_v34 = vpop.f32.mrb[17].mxu0 }
 0x229   : > { %v5140_v14 = vadd.f32 %v5139_v9, %v5109_v6  ;;  %v6545_v10 = vadd.f32 %v6499_v26, %v6307_v18  ;;  %v2793_v39 = vpop.f32.mrb[17].mxu1  ;;  %v5071_v11 = vadd.f32 %v6543_v36, %v5070_v45  ;;  %v6500_v50 = vpop.f32.mrb[18].mxu0 }
 0x22a   : > { %v6546_v23 = vadd.f32 %v4930_v34, %v2793_v39  ;;  %v6308_v3 = vpop.f32.mrb[18].mxu1  ;;  %v4933_v58 = vpop.f32.mrb[19].mxu0 }
 0x22b   : > { %5043 = vst [vmem:[%s8803_s21 + $0x90] sm:$0xff] %v6545_v10  ;;  %v5141_v22 = vadd.f32 %v5140_v14, %v5110_v33  ;;  %v6547_v59 = vadd.f32 %v6500_v50, %v6308_v3  ;;  %v2796_v30 = vpop.f32.mrb[19].mxu1  ;;  %v5113_v31 = vmul.f32 %v6545_v10, %v6545_v10 }
 0x22c   : > { %5041 = vst [vmem:[%s8803_s21 + $0x80] sm:$0xff] %v6546_v23  ;;  %v5072_v19 = vadd.f32 %v6546_v23, %v5071_v11  ;;  %v5111_v52 = vmul.f32 %v6546_v23, %v6546_v23  ;;  %v6548_v15 = vadd.f32 %v4933_v58, %v2796_v30 }
 0x22d   : > { %5044 = vst [vmem:[%s8803_s21 + $0x98] sm:$0xff] %v6547_v59  ;;  %v5114_v53 = vmul.f32 %v6547_v59, %v6547_v59 }
 0x22e   : > { %v5142_v43 = vadd.f32 %v5141_v22, %v5111_v52  ;;  %5042 = vst [vmem:[%s8803_s21 + $0x88] sm:$0xff] %v6548_v15  ;;  %v5073_v38 = vadd.f32 %v6548_v15, %v5072_v19  ;;  %v5112_v56 = vmul.f32 %v6548_v15, %v6548_v15 }
 0x22f   : > { %v6503_v1 = vpop.f32.mrb[20].mxu0 }
 0x230   : > { %v5074_v63 = vadd.f32 %v6545_v10, %v5073_v38  ;;  %v5143_v20 = vadd.f32 %v5142_v43, %v5112_v56  ;;  %v6311_v29 = vpop.f32.mrb[20].mxu1  ;;  %v4946_v44 = vpop.f32.mrb[21].mxu0 }
 0x231   : > { %v6549_v35 = vadd.f32 %v6503_v1, %v6311_v29  ;;  %v2809_v4 = vpop.f32.mrb[21].mxu1  ;;  %v6504_v57 = vpop.f32.mrb[22].mxu0 }
 0x232   : > { %v5144_v7 = vadd.f32 %v5143_v20, %v5113_v31  ;;  %v6550_v25 = vadd.f32 %v4946_v44, %v2809_v4  ;;  %v5075_v16 = vadd.f32 %v6547_v59, %v5074_v63  ;;  %v6312_v54 = vpop.f32.mrb[22].mxu1  ;;  %v4949_v13 = vpop.f32.mrb[23].mxu0 }
 0x233   : > { %5047 = vst [vmem:[%s8803_s21 + $0xb0] sm:$0xff] %v6549_v35  ;;  %v6551_v60 = vadd.f32 %v6504_v57, %v6312_v54  ;;  %v2812_v0 = vpop.f32.mrb[23].mxu1  ;;  %v5117_v24 = vmul.f32 %v6549_v35, %v6549_v35 }
 0x234   : > { %5045 = vst [vmem:[%s8803_s21 + $0xa0] sm:$0xff] %v6550_v25  ;;  %v5076_v27 = vadd.f32 %v6550_v25, %v5075_v16  ;;  %v5115_v46 = vmul.f32 %v6550_v25, %v6550_v25  ;;  %v5145_v2 = vadd.f32 %v5144_v7, %v5114_v53  ;;  %v6552_v42 = vadd.f32 %v4949_v13, %v2812_v0 }
 0x235   : > { %5048 = vst [vmem:[%s8803_s21 + $0xb8] sm:$0xff] %v6551_v60  ;;  %v5118_v12 = vmul.f32 %v6551_v60, %v6551_v60 }
 0x236   : > { %v5146_v55 = vadd.f32 %v5145_v2, %v5115_v46  ;;  %5046 = vst [vmem:[%s8803_s21 + $0xa8] sm:$0xff] %v6552_v42  ;;  %v5077_v49 = vadd.f32 %v6552_v42, %v5076_v27  ;;  %v5116_v28 = vmul.f32 %v6552_v42, %v6552_v42 }
 0x237   : > { %v6507_v17 = vpop.f32.mrb[24].mxu0 }
 0x238   : > { %v5078_v40 = vadd.f32 %v6549_v35, %v5077_v49  ;;  %v5147_v21 = vadd.f32 %v5146_v55, %v5116_v28  ;;  %v6315_v37 = vpop.f32.mrb[24].mxu1  ;;  %v4962_v48 = vpop.f32.mrb[25].mxu0 }
 0x239   : > { %v6553_v8 = vadd.f32 %v6507_v17, %v6315_v37  ;;  %v2825_v36 = vpop.f32.mrb[25].mxu1  ;;  %v6508_v47 = vpop.f32.mrb[26].mxu0 }
 0x23a   : > { %v5148_v51 = vadd.f32 %v5147_v21, %v5117_v24  ;;  %v6554_v32 = vadd.f32 %v4962_v48, %v2825_v36  ;;  %v5079_v5 = vadd.f32 %v6551_v60, %v5078_v40  ;;  %v6316_v61 = vpop.f32.mrb[26].mxu1  ;;  %v4965_v62 = vpop.f32.mrb[27].mxu0 }
 0x23b   : > { %5051 = vst [vmem:[%s8803_s21 + $0xd0] sm:$0xff] %v6553_v8  ;;  %v6555_v41 = vadd.f32 %v6508_v47, %v6316_v61  ;;  %v2828_v6 = vpop.f32.mrb[27].mxu1  ;;  %v5121_v39 = vmul.f32 %v6553_v8, %v6553_v8 }
 0x23c   : > { %5049 = vst [vmem:[%s8803_s21 + $0xc0] sm:$0xff] %v6554_v32  ;;  %v5080_v45 = vadd.f32 %v6554_v32, %v5079_v5  ;;  %v5119_v9 = vmul.f32 %v6554_v32, %v6554_v32  ;;  %v5149_v26 = vadd.f32 %v5148_v51, %v5118_v12  ;;  %v6556_v18 = vadd.f32 %v4965_v62, %v2828_v6 }
 0x23d   : > { %5052 = vst [vmem:[%s8803_s21 + $0xd8] sm:$0xff] %v6555_v41  ;;  %v5122_v30 = vmul.f32 %v6555_v41, %v6555_v41 }
 0x23e   : > { %v5150_v34 = vadd.f32 %v5149_v26, %v5119_v9  ;;  %5050 = vst [vmem:[%s8803_s21 + $0xc8] sm:$0xff] %v6556_v18  ;;  %v5081_v33 = vadd.f32 %v6556_v18, %v5080_v45  ;;  %v5120_v14 = vmul.f32 %v6556_v18, %v6556_v18 }
 0x23f   : > { %v6511_v10 = vpop.f32.mrb[28].mxu0 }
 0x240   : > { %v5082_v11 = vadd.f32 %v6553_v8, %v5081_v33  ;;  %v5151_v50 = vadd.f32 %v5150_v34, %v5120_v14  ;;  %v6319_v23 = vpop.f32.mrb[28].mxu1  ;;  %v4978_v3 = vpop.f32.mrb[29].mxu0 }
 0x241   : > { %v6557_v58 = vadd.f32 %v6511_v10, %v6319_v23  ;;  %v2841_v22 = vpop.f32.mrb[29].mxu1  ;;  %v6512_v59 = vpop.f32.mrb[30].mxu0 }
 0x242   : > { %v5152_v19 = vadd.f32 %v5151_v50, %v5121_v39  ;;  %v6558_v52 = vadd.f32 %v4978_v3, %v2841_v22  ;;  %v5083_v15 = vadd.f32 %v6555_v41, %v5082_v11  ;;  %v6320_v43 = vpop.f32.mrb[30].mxu1  ;;  %v4981_v38 = vpop.f32.mrb[31].mxu0 }
 0x243   : > { %5055 = vst [vmem:[%s8803_s21 + $0xf0] sm:$0xff] %v6557_v58  ;;  %v6559_v56 = vadd.f32 %v6512_v59, %v6320_v43  ;;  %v2844_v1 = vpop.f32.mrb[31].mxu1  ;;  %v5125_v57 = vmul.f32 %v6557_v58, %v6557_v58 }
 0x244   : > { %5053 = vst [vmem:[%s8803_s21 + $0xe0] sm:$0xff] %v6558_v52  ;;  %v5084_v31 = vadd.f32 %v6558_v52, %v5083_v15  ;;  %v5123_v63 = vmul.f32 %v6558_v52, %v6558_v52  ;;  %v5153_v20 = vadd.f32 %v5152_v19, %v5122_v30  ;;  %v6560_v29 = vadd.f32 %v4981_v38, %v2844_v1 }
 0x245   : > { %5056 = vst [vmem:[%s8803_s21 + $0xf8] sm:$0xff] %v6559_v56  ;;  %v5126_v25 = vmul.f32 %v6559_v56, %v6559_v56 }
 0x246   : > { %v5154_v44 = vadd.f32 %v5153_v20, %v5123_v63  ;;  %5054 = vst [vmem:[%s8803_s21 + $0xe8] sm:$0xff] %v6560_v29  ;;  %v5085_v35 = vadd.f32 %v6560_v29, %v5084_v31  ;;  %v5124_v4 = vmul.f32 %v6560_v29, %v6560_v29 }
 0x248   : > { %v5086_v53 = vadd.f32 %v6557_v58, %v5085_v35  ;;  %v5155_v7 = vadd.f32 %v5154_v44, %v5124_v4 }
 0x24a   : > { %v5087_v16 = vadd.f32 %v6559_v56, %v5086_v53  ;;  %v5156_v54 = vadd.f32 %v5155_v7, %v5125_v57 }
 0x24c   : > { %v5088_v13 = vrot.slane %v5087_v16, 4  ;;  %v5157_v60 = vadd.f32 %v5156_v54, %v5126_v25 }
 0x24e   : > { %v5089_v0 = vadd.f32 %v5088_v13, %v5087_v16  ;;  %v5158_v27 = vrot.slane %v5157_v60, 4 }
 0x250   : > { %v5090_v46 = vrot.slane %v5089_v0, 2  ;;  %v5159_v2 = vadd.f32 %v5158_v27, %v5157_v60 }
 0x252   : > { %v5091_v42 = vadd.f32 %v5090_v46, %v5089_v0  ;;  %v5160_v55 = vrot.slane %v5159_v2, 2 }
 0x254   : > { %v5092_v49 = vrot.slane %v5091_v42, 1  ;;  %v5161_v28 = vadd.f32 %v5160_v55, %v5159_v2 }
 0x256   : > { %v5093_v17 = vadd.f32 %v5092_v49, %v5091_v42  ;;  %v5162_v24 = vrot.slane %v5161_v28, 1 }
 0x258   : > { %5094 = vst [vmem:[%s211_s24] sm:$0x1] %v5093_v17  ;;  %v5163_v40 = vadd.f32 %v5162_v24, %v5161_v28 }
 0x25a   : > { %5164 = vst [vmem:[%s214_s27] sm:$0x1] %v5163_v40 }
 0x25b PF: > { %s15_s15 = sadd.s32 1, %s6990_s15  }
 0x25c   : > { %p12_p4 = scmp.ge.s32.totalorder %s15_s15, 4  }
 0x25e   :  { %14 = sbr.rel (!%p12_p4) target bundleno = 1 (0x1), region = 92 }

</bundles_post_ra>
